<compile_context>
chip_gen: v7x
topology: tpu7x:2x2x1
jax: 0.10.0
libtpu: 0.0.40
codegen_flags: <defaults>
</compile_context>

<pallas_src>
import functools
import numpy as np
import jax
import jax.numpy as jnp
from jax import lax
from jax.experimental import pallas as pl
from jax.experimental.pallas import tpu as pltpu


_PW_PARAMS = pltpu.CompilerParams(
    dimension_semantics=("parallel",),
    vmem_limit_bytes=32 * 1024 * 1024,
)


# ----------------------------- tiling helper --------------------------------

def _choose_tm(n_rows, row_bytes, fixed_bytes=0, budget=20 << 20, cap=512,
               min_steps=8):
    """Row-tile size for the pointwise (matmul) kernels.

    Prefers large tiles (512-row tiles reach ~85% of HBM roofline vs ~63% at
    256), keeps the double-buffered row streams plus weights inside a VMEM
    budget, aims for >= min_steps grid steps so v7x's two TensorCores each get
    several pipelined steps (but never shrinks below 256 rows, which would hurt
    single-TC v5e/v6e), and prefers a tile that divides n_rows exactly so no
    jnp.pad / out[:M] HBM round trips are needed.
    """
    avail = max(budget - 2 * fixed_bytes, 16 * row_bytes)
    tm = min(cap, max(8, avail // max(2 * row_bytes, 1)))
    if n_rows // max(tm, 1) < min_steps:
        tm = min(tm, max(256, n_rows // min_steps))
    tm = max(8, min(tm, n_rows))
    tm -= tm % 8
    tm = max(8, tm)
    if n_rows % 8 == 0:
        cand = tm
        while cand >= 8:
            if n_rows % cand == 0:
                return cand
            cand -= 8
    return tm


# --------------------------- pointwise kernels -------------------------------
# NOTE: the BN scale is applied in-kernel (one VPU multiply) rather than folded
# into the conv weights so the numerics match the conv-then-BN reference under
# TPU default matmul precision.

def _pw_kernel(x_ref, w_ref, s_ref, b_ref, o_ref, *, relu):
    # x: (TM, Cin), w: (Cin, Cout), s/b: (1, Cout)
    y = jnp.dot(x_ref[...], w_ref[...], preferred_element_type=jnp.float32)
    y = y * s_ref[...] + b_ref[...]
    if relu:
        y = jnp.maximum(y, 0.0)
    o_ref[...] = y.astype(o_ref.dtype)


def pointwise_conv_bn(x2d, w, scale, bias, relu):
    """1x1x1 conv (matmul) + folded BN affine (+ optional ReLU)."""
    M, Cin = x2d.shape
    Cout = w.shape[1]
    tm = _choose_tm(M, 4 * (Cin + Cout), fixed_bytes=4 * Cin * Cout)
    Mp = pl.cdiv(M, tm) * tm
    xp = jnp.pad(x2d, ((0, Mp - M), (0, 0))) if Mp != M else x2d
    out = pl.pallas_call(
        functools.partial(_pw_kernel, relu=relu),
        out_shape=jax.ShapeDtypeStruct((Mp, Cout), x2d.dtype),
        grid=(Mp // tm,),
        in_specs=[
            pl.BlockSpec((tm, Cin), lambda i: (i, 0)),
            pl.BlockSpec((Cin, Cout), lambda i: (0, 0)),
            pl.BlockSpec((1, Cout), lambda i: (0, 0)),
            pl.BlockSpec((1, Cout), lambda i: (0, 0)),
        ],
        out_specs=pl.BlockSpec((tm, Cout), lambda i: (i, 0)),
        compiler_params=_PW_PARAMS,
    )(xp, w, scale.reshape(1, Cout), bias.reshape(1, Cout))
    return out[:M] if Mp != M else out


def _pw3_identity_kernel(x_ref, w_ref, s_ref, b_ref, r_ref, o_ref):
    # conv3 + BN + identity residual add + final ReLU (fused)
    y = jnp.dot(x_ref[...], w_ref[...], preferred_element_type=jnp.float32)
    y = y * s_ref[...] + b_ref[...] + r_ref[...]
    o_ref[...] = jnp.maximum(y, 0.0).astype(o_ref.dtype)


def conv3_bn_identity_relu(x2d, w, scale, bias, residual2d):
    M, Cin = x2d.shape
    Cout = w.shape[1]
    tm = _choose_tm(M, 4 * (Cin + 2 * Cout), fixed_bytes=4 * Cin * Cout)
    Mp = pl.cdiv(M, tm) * tm
    if Mp != M:
        x2d = jnp.pad(x2d, ((0, Mp - M), (0, 0)))
        residual2d = jnp.pad(residual2d, ((0, Mp - M), (0, 0)))
    out = pl.pallas_call(
        _pw3_identity_kernel,
        out_shape=jax.ShapeDtypeStruct((Mp, Cout), x2d.dtype),
        grid=(Mp // tm,),
        in_specs=[
            pl.BlockSpec((tm, Cin), lambda i: (i, 0)),
            pl.BlockSpec((Cin, Cout), lambda i: (0, 0)),
            pl.BlockSpec((1, Cout), lambda i: (0, 0)),
            pl.BlockSpec((1, Cout), lambda i: (0, 0)),
            pl.BlockSpec((tm, Cout), lambda i: (i, 0)),
        ],
        out_specs=pl.BlockSpec((tm, Cout), lambda i: (i, 0)),
        compiler_params=_PW_PARAMS,
    )(x2d, w, scale.reshape(1, Cout), bias.reshape(1, Cout), residual2d)
    return out[:M] if Mp != M else out


def _pw3_downsample_kernel(x_ref, w_ref, s_ref, b_ref,
                           xr_ref, wd_ref, sd_ref, bd_ref, o_ref):
    # conv3 + BN + (downsample 1x1x1 conv + BN) residual + final ReLU (fused)
    y = jnp.dot(x_ref[...], w_ref[...], preferred_element_type=jnp.float32)
    y = y * s_ref[...] + b_ref[...]
    r = jnp.dot(xr_ref[...], wd_ref[...], preferred_element_type=jnp.float32)
    r = r * sd_ref[...] + bd_ref[...]
    o_ref[...] = jnp.maximum(y + r, 0.0).astype(o_ref.dtype)


def conv3_bn_downsample_relu(x2d, w, scale, bias, xr2d, wd, sd, bd):
    M, Cin = x2d.shape
    Cout = w.shape[1]
    Cr = xr2d.shape[1]
    tm = _choose_tm(M, 4 * (Cin + Cr + Cout),
                    fixed_bytes=4 * (Cin + Cr) * Cout)
    Mp = pl.cdiv(M, tm) * tm
    if Mp != M:
        x2d = jnp.pad(x2d, ((0, Mp - M), (0, 0)))
        xr2d = jnp.pad(xr2d, ((0, Mp - M), (0, 0)))
    out = pl.pallas_call(
        _pw3_downsample_kernel,
        out_shape=jax.ShapeDtypeStruct((Mp, Cout), x2d.dtype),
        grid=(Mp // tm,),
        in_specs=[
            pl.BlockSpec((tm, Cin), lambda i: (i, 0)),
            pl.BlockSpec((Cin, Cout), lambda i: (0, 0)),
            pl.BlockSpec((1, Cout), lambda i: (0, 0)),
            pl.BlockSpec((1, Cout), lambda i: (0, 0)),
            pl.BlockSpec((tm, Cr), lambda i: (i, 0)),
            pl.BlockSpec((Cr, Cout), lambda i: (0, 0)),
            pl.BlockSpec((1, Cout), lambda i: (0, 0)),
            pl.BlockSpec((1, Cout), lambda i: (0, 0)),
        ],
        out_specs=pl.BlockSpec((tm, Cout), lambda i: (i, 0)),
        compiler_params=_PW_PARAMS,
    )(x2d, w, scale.reshape(1, Cout), bias.reshape(1, Cout),
      xr2d, wd, sd.reshape(1, Cout), bd.reshape(1, Cout))
    return out[:M] if Mp != M else out


# --------------------------- grouped 3x3x3 conv ------------------------------

def _gconv_body(get_phase, w_ref, s_ref, b_ref, o_ref, *, stride, Ho, Wo):
    """27-tap grouped conv as 27 lane-dense MXU dots accumulated in f32."""
    mo = Ho * Wo
    pw = o_ref.shape[-1]
    acc = jnp.zeros((mo, pw), jnp.float32)
    t = 0
    for kd in range(3):
        # The stride*stride spatial phases of this depth tap (1 at stride==1).
        phases = [get_phase(kd, q) for q in range(stride * stride)]
        for kh in range(3):
            for kw in range(3):
                plane = phases[(kh % stride) * stride + (kw % stride)]
                win = plane[kh // stride:kh // stride + Ho,
                            kw // stride:kw // stride + Wo, :]
                acc = acc + jnp.dot(win.reshape(mo, pw), w_ref[0, t],
                                    preferred_element_type=jnp.float32)
                t += 1
    # Single full-tile lane-dense BN + ReLU epilogue.
    y = acc * s_ref[...] + b_ref[...]
    o_ref[0, 0] = jnp.maximum(y, 0.0).astype(o_ref.dtype)


def _gconv_kernel_slab(x_ref, w_ref, s_ref, b_ref, o_ref, *, stride, Ho, Wo):
    # x_ref: (1, (D+2)*stride*stride, Hph, Wph, PW) -- full padded depth slab,
    # resident across the sequential output-depth grid axis.
    d = pl.program_id(2)
    ss = stride * stride

    def get_phase(kd, q):
        return x_ref[0, (d * stride + kd) * ss + q]

    _gconv_body(get_phase, w_ref, s_ref, b_ref, o_ref,
                stride=stride, Ho=Ho, Wo=Wo)


def _gconv_kernel_planes(p0_ref, p1_ref, p2_ref, w_ref, s_ref, b_ref, o_ref,
                         *, stride, Ho, Wo):
    refs = (p0_ref, p1_ref, p2_ref)

    def get_phase(kd, q):
        return refs[kd][0, q]

    _gconv_body(get_phase, w_ref, s_ref, b_ref, o_ref,
                stride=stride, Ho=Ho, Wo=Wo)


def grouped_conv3x3_bn_relu(x_ndhwc, w_packed, scale, bias, stride=1):
    """Grouped 3x3x3 conv (pad=1, stride) + folded BN + ReLU.

    x_ndhwc:  (N, D, H, W, C) channel-last activation.
    w_packed: (n_packs, 27, PW, PW) block-diagonal packed weight
              (PW = groups_per_pack * C_per_group, see pack_grouped_weight).
    """
    N, D, H, W, C = x_ndhwc.shape
    n_packs, _, PW, _ = w_packed.shape
    assert n_packs * PW == C
    s = stride
    Do = (D - 1) // s + 1
    Ho = (H - 1) // s + 1
    Wo = (W - 1) // s + 1
    Mo = Ho * Wo
    Dp = D + 2

    # Spatial phase decomposition (XLA side; a no-op at stride == 1):
    #   xph[n, (dp*s + ph)*s + pw, i, j, c] = xpad[n, dp, i*s + ph, j*s + pw, c]
    # so every in-kernel tap window is a unit-stride static slice -- the
    # in-plane stride is folded into the gather (no dense compute + ::s slice,
    # no wasted MXU FLOPs or output HBM writes).
    Hph = max(-(-(H + 2) // s), Ho + 2 // s)
    Wph = max(-(-(W + 2) // s), Wo + 2 // s)
    xp = jnp.pad(x_ndhwc, ((0, 0), (1, 1),
                           (1, s * Hph - H - 1), (1, s * Wph - W - 1), (0, 0)))
    xp = xp.reshape(N, Dp, Hph, s, Wph, s, C)
    xp = xp.transpose(0, 1, 3, 5, 2, 4, 6).reshape(N, Dp * s * s, Hph, Wph, C)

    s2 = scale.reshape(1, C)
    b2 = bias.reshape(1, C)

    w_spec = pl.BlockSpec((1, 27, PW, PW), lambda n, p, d: (p, 0, 0, 0))
    sb_spec = pl.BlockSpec((1, PW), lambda n, p, d: (0, p))
    common = dict(
        out_shape=jax.ShapeDtypeStruct((N, Do, Mo, C), x_ndhwc.dtype),
        grid=(N, n_packs, Do),
        out_specs=pl.BlockSpec((1, 1, Mo, PW), lambda n, p, d: (n, d, 0, p)),
        compiler_params=pltpu.CompilerParams(
            # batch / pack axes feed v7x's two TensorCores; the output-depth
            # axis stays sequential so the resident input slab is reused.
            dimension_semantics=("parallel", "parallel", "arbitrary"),
            vmem_limit_bytes=32 * 1024 * 1024),
    )

    slab_bytes = Dp * s * s * Hph * Wph * PW * 4
    fixed_bytes = 2 * 27 * PW * PW * 4 + 8 * Mo * PW * 4
    if 2 * slab_bytes + fixed_bytes <= (20 << 20):
        # Whole padded depth slab resident per (n, pack): its block index does
        # not depend on d, so each input element is fetched from HBM once.
        out = pl.pallas_call(
            functools.partial(_gconv_kernel_slab, stride=s, Ho=Ho, Wo=Wo),
            in_specs=[
                pl.BlockSpec((1, Dp * s * s, Hph, Wph, PW),
                             lambda n, p, d: (n, 0, 0, 0, p)),
                w_spec, sb_spec, sb_spec,
            ],
            **common,
        )(xp, w_packed, s2, b2)
    else:
        # TODO(synk): for very large planes, switch to memory_space=pl.ANY with
        # a manual rolling 3-plane DMA buffer so each plane is fetched once;
        # this fallback still refetches each halo plane up to 3x.
        def plane_spec(k):
            return pl.BlockSpec((1, s * s, Hph, Wph, PW),
                                lambda n, p, d: (n, d * s + k, 0, 0, p))
        out = pl.pallas_call(
            functools.partial(_gconv_kernel_planes, stride=s, Ho=Ho, Wo=Wo),
            in_specs=[plane_spec(0), plane_spec(1), plane_spec(2),
                      w_spec, sb_spec, sb_spec],
            **common,
        )(xp, xp, xp, w_packed, s2, b2)
    return out.reshape(N, Do, Ho, Wo, C)


# ------------------------- parameter preparation ----------------------------

def fold_bn(gamma, beta, mean, var, eps=1e-5):
    scale = gamma / jnp.sqrt(var + eps)
    return scale, beta - mean * scale


def _groups_per_pack(G, Cpg, target=128):
    """Groups per block-diagonal pack so PW = P*Cpg is lane-dense."""
    P = 1
    while P < G and G % (2 * P) == 0 and 2 * P * Cpg <= target:
        P *= 2
    if (P * Cpg) % 128 != 0 and P != G:
        P = G   # one dense block-diagonal pack: lane dim == full C
    return P


def pack_grouped_weight(w, cardinality):
    """torch (C_out, C_in/groups, 3, 3, 3) grouped weight ->
    (n_packs, 27, PW, PW) block-diagonal packs, PW = groups_per_pack * Cpg.

    Packing ~128 output lanes per dot keeps the MXU N dimension and every
    activation/output access lane-dense (unmasked vst); the zero off-diagonal
    blocks cost at most ~2x MXU FLOPs, absorbed by the memory-bound regime.
    """
    C, Cpg = w.shape[0], w.shape[1]
    G = cardinality
    assert C == G * Cpg
    P = _groups_per_pack(G, Cpg)
    PW = P * Cpg
    n_packs = G // P
    wt = w.reshape(n_packs, P, Cpg, Cpg, 3, 3, 3)   # (p, g, co, ci, kd, kh, kw)
    wt = wt.transpose(0, 1, 4, 5, 6, 3, 2)          # (p, g, kd, kh, kw, ci, co)
    eye = jnp.eye(P, dtype=w.dtype)
    bd = jnp.einsum('pgdefio,gh->pdefgiho', wt, eye)  # block-diag within pack
    return bd.reshape(n_packs, 27, PW, PW)


def prepare_kernel_params(raw, cardinality):
    p = {}
    p["w1"] = raw["w1"].reshape(raw["w1"].shape[0], -1).T
    p["s1"], p["b1"] = fold_bn(*raw["bn1"])
    p["w2"] = pack_grouped_weight(raw["w2"], cardinality)
    p["s2"], p["b2"] = fold_bn(*raw["bn2"])
    p["w3"] = raw["w3"].reshape(raw["w3"].shape[0], -1).T
    p["s3"], p["b3"] = fold_bn(*raw["bn3"])
    if "wd" in raw:
        p["wd"] = raw["wd"].reshape(raw["wd"].shape[0], -1).T
        p["sd"], p["bd"] = fold_bn(*raw["bnd"])
    return p


def init_params(key, in_channels, channels, out_channels, cardinality):
    ks = jax.random.split(key, 16)

    def conv_w(k, shape):
        bound = 1.0 / np.sqrt(float(np.prod(shape[1:])))
        return jax.random.uniform(k, shape, jnp.float32, -bound, bound)

    def bn_p(kg, kb, km, kv, c):
        gamma = jax.random.uniform(kg, (c,), jnp.float32, 0.5, 1.5)
        beta = jax.random.uniform(kb, (c,), jnp.float32, -0.5, 0.5)
        mean = jax.random.uniform(km, (c,), jnp.float32, -0.2, 0.2)
        var = jax.random.uniform(kv, (c,), jnp.float32, 0.5, 1.5)
        return (gamma, beta, mean, var)

    raw = {
        "w1": conv_w(ks[0], (channels, in_channels, 1, 1, 1)),
        "bn1": bn_p(ks[1], ks[2], ks[3], ks[4], channels),
        "w2": conv_w(ks[5], (channels, channels // cardinality, 3, 3, 3)),
        "bn2": bn_p(ks[6], ks[7], ks[8], ks[9], channels),
        "w3": conv_w(ks[10], (out_channels, channels, 1, 1, 1)),
        "bn3": bn_p(ks[11], ks[12], ks[13], ks[14], out_channels),
    }
    if in_channels != out_channels:
        kd = jax.random.split(ks[15], 5)
        raw["wd"] = conv_w(kd[0], (out_channels, in_channels, 1, 1, 1))
        raw["bnd"] = bn_p(kd[1], kd[2], kd[3], kd[4], out_channels)
    return raw


# ------------------------------ forward pass --------------------------------

def bottleneck_forward(x, p, cardinality, stride=1):
    """x: (N, C_in, D, H, W) float32, PyTorch NCDHW. Returns NCDHW."""
    del cardinality  # already baked into the packed conv2 weight
    N, Cin, D, H, W = x.shape
    x_cl = jnp.transpose(x, (0, 2, 3, 4, 1))        # (N, D, H, W, Cin)
    M = N * D * H * W
    channels = p["w1"].shape[1]
    # identity residual with stride>1 would shape-mismatch (same as PyTorch)
    assert ("wd" in p) or stride == 1

    # conv1 (1x1x1) + BN + ReLU
    out1 = pointwise_conv_bn(x_cl.reshape(M, Cin), p["w1"], p["s1"], p["b1"],
                             relu=True).reshape(N, D, H, W, channels)
    # TODO(synk): fuse conv1 into the conv2 pipeline (keep per-depth tiles in
    # VMEM) to drop one full HBM round trip of the (M, channels) activation.

    # conv2 grouped 3x3x3, pad=1, stride (+ BN + ReLU)
    out2 = grouped_conv3x3_bn_relu(out1, p["w2"], p["s2"], p["b2"], stride)
    No, Do, Ho, Wo = out2.shape[:4]
    Mo = No * Do * Ho * Wo
    out2_2d = out2.reshape(Mo, channels)

    # residual input (strided view of x for stride > 1)
    x_s = x_cl[:, ::stride, ::stride, ::stride, :] if stride > 1 else x_cl
    Cout = p["w3"].shape[1]

    # conv3 (1x1x1) + BN + residual (optionally downsampled) + ReLU, one kernel
    if "wd" in p:
        out = conv3_bn_downsample_relu(out2_2d, p["w3"], p["s3"], p["b3"],
                                       x_s.reshape(Mo, Cin),
                                       p["wd"], p["sd"], p["bd"])
    else:
        out = conv3_bn_identity_relu(out2_2d, p["w3"], p["s3"], p["b3"],
                                     x_s.reshape(Mo, Cin))
    return out.reshape(No, Do, Ho, Wo, Cout).transpose(0, 4, 1, 2, 3)


# ------------------------------ pure-JAX ref ---------------------------------

def _conv3d_ref(x, w, stride=1, padding=0, groups=1):
    return lax.conv_general_dilated(
        x, w, window_strides=(stride,) * 3, padding=[(padding, padding)] * 3,
        dimension_numbers=('NCDHW', 'OIDHW', 'NCDHW'),
        feature_group_count=groups)


def _bn_ref(x, gamma, beta, mean, var, eps=1e-5):
    shp = (1, -1, 1, 1, 1)
    return ((x - mean.reshape(shp)) / jnp.sqrt(var.reshape(shp) + eps)
            * gamma.reshape(shp) + beta.reshape(shp))


def bottleneck_reference(x, raw, cardinality, stride=1):
    out = jax.nn.relu(_bn_ref(_conv3d_ref(x, raw["w1"]), *raw["bn1"]))
    out = jax.nn.relu(_bn_ref(_conv3d_ref(out, raw["w2"], stride, 1,
                                          cardinality), *raw["bn2"]))
    out = _bn_ref(_conv3d_ref(out, raw["w3"]), *raw["bn3"])
    if "wd" in raw:
        residual = _bn_ref(_conv3d_ref(x, raw["wd"], stride), *raw["bnd"])
    else:
        residual = x
    return jax.nn.relu(out + residual)


# ----------------------------------- main ------------------------------------

if __name__ == "__main__":
    fwd = jax.jit(bottleneck_forward, static_argnums=(2, 3))
    ref_fn = jax.jit(bottleneck_reference, static_argnums=(2, 3))

    def run_case(key, N, Cin, D, H, W, channels, Cout, cardinality, stride):
        k_x, k_p = jax.random.split(key)
        x = jax.random.normal(k_x, (N, Cin, D, H, W), jnp.float32)
        raw = init_params(k_p, Cin, channels, Cout, cardinality)
        kp = prepare_kernel_params(raw, cardinality)
        out = jax.block_until_ready(fwd(x, kp, cardinality, stride))
        ref = jax.block_until_ready(ref_fn(x, raw, cardinality, stride))
        assert out.shape == ref.shape
        np.testing.assert_allclose(np.asarray(out), np.asarray(ref),
                                   rtol=2e-4, atol=2e-4)

    key = jax.random.PRNGKey(0)
    k1, k2, k3 = jax.random.split(key, 3)

    # Bottleneck(16, 16, 32, cardinality=4, stride=1): downsample branch.
    run_case(k1, 2, 16, 4, 8, 8, 16, 32, 4, 1)
    # Strided block: Bottleneck(16, 16, 32, cardinality=4, stride=2).
    run_case(k2, 2, 16, 4, 8, 8, 16, 32, 4, 2)
    # Identity residual: Bottleneck(32, 16, 32, cardinality=4, stride=1).
    run_case(k3, 2, 32, 4, 8, 8, 16, 32, 4, 1)

    print("KERNEL_OK")
</pallas_src>

<mosaic_0001>
module attributes {stable_mosaic.version = 11 : i64} {
  func.func @_gconv_kernel_slab(%arg0: i32, %arg1: i32, %arg2: i32, %arg3: memref<1x6x10x10x16xf32, #tpu.memory_space<vmem>>, %arg4: memref<1x27x16x16xf32, #tpu.memory_space<vmem>>, %arg5: memref<1x16xf32, #tpu.memory_space<vmem>>, %arg6: memref<1x16xf32, #tpu.memory_space<vmem>>, %arg7: memref<1x1x64x16xf32, #tpu.memory_space<vmem>>) attributes {dimension_semantics = [#tpu.dimension_semantics<parallel>, #tpu.dimension_semantics<parallel>, #tpu.dimension_semantics<arbitrary>], iteration_bounds = array<i64: 2, 1, 4>, scalar_prefetch = 0 : i64, scratch_operands = 0 : i64, tpu.core_type = #tpu.core_type<tc>, window_params = [{transform_indices = @transform_0, window_bounds = array<i64: 1, 6, 10, 10, 16>}, {transform_indices = @transform_1, window_bounds = array<i64: 1, 27, 16, 16>}, {transform_indices = @transform_2, window_bounds = array<i64: 1, 16>}, {transform_indices = @transform_3, window_bounds = array<i64: 1, 16>}, {transform_indices = @transform_4, window_bounds = array<i64: 1, 1, 64, 16>}]} {
    %cst = arith.constant 0.000000e+00 : f32
    %0 = vector.broadcast %cst : f32 to vector<64x16xf32>
    %c1_i32 = arith.constant 1 : i32
    %1 = arith.muli %arg2, %c1_i32 : i32
    %c0_i32 = arith.constant 0 : i32
    %2 = arith.addi %1, %c0_i32 : i32
    %c1_i32_0 = arith.constant 1 : i32
    %3 = arith.muli %2, %c1_i32_0 : i32
    %c0_i32_1 = arith.constant 0 : i32
    %4 = arith.addi %3, %c0_i32_1 : i32
    %c0 = arith.constant 0 : index
    %5 = arith.index_cast %4 : i32 to index
    %c0_2 = arith.constant 0 : index
    %c0_3 = arith.constant 0 : index
    %c0_4 = arith.constant 0 : index
    %6 = vector.load %arg3[%c0, %5, %c0_2, %c0_3, %c0_4] : memref<1x6x10x10x16xf32, #tpu.memory_space<vmem>>, vector<1x1x10x10x16xf32>
    %7 = vector.shape_cast %6 : vector<1x1x10x10x16xf32> to vector<10x10x16xf32>
    %8 = vector.extract_strided_slice %7 {offsets = [0, 0, 0], sizes = [8, 8, 16], strides = [1, 1, 1]} : vector<10x10x16xf32> to vector<8x8x16xf32>
    %9 = vector.shape_cast %8 : vector<8x8x16xf32> to vector<64x16xf32>
    %c0_5 = arith.constant 0 : index
    %c0_6 = arith.constant 0 : index
    %c0_7 = arith.constant 0 : index
    %c0_8 = arith.constant 0 : index
    %10 = vector.load %arg4[%c0_5, %c0_6, %c0_7, %c0_8] : memref<1x27x16x16xf32, #tpu.memory_space<vmem>>, vector<1x1x16x16xf32>
    %11 = vector.shape_cast %10 : vector<1x1x16x16xf32> to vector<16x16xf32>
    %cst_9 = arith.constant dense<0.000000e+00> : vector<64x16xf32>
    %12 = tpu.matmul %9, %11, %cst_9 {dimension_numbers = #tpu.dot_dimension_numbers<[1], [0], [0], [1], [0, 0, 1, 1], [], []>} : vector<64x16xf32>, vector<16x16xf32>, vector<64x16xf32> -> vector<64x16xf32>
    %13 = arith.addf %0, %12 : vector<64x16xf32>
    %14 = vector.extract_strided_slice %7 {offsets = [0, 1, 0], sizes = [8, 8, 16], strides = [1, 1, 1]} : vector<10x10x16xf32> to vector<8x8x16xf32>
    %15 = vector.shape_cast %14 : vector<8x8x16xf32> to vector<64x16xf32>
    %c0_10 = arith.constant 0 : index
    %c1 = arith.constant 1 : index
    %c0_11 = arith.constant 0 : index
    %c0_12 = arith.constant 0 : index
    %16 = vector.load %arg4[%c0_10, %c1, %c0_11, %c0_12] : memref<1x27x16x16xf32, #tpu.memory_space<vmem>>, vector<1x1x16x16xf32>
    %17 = vector.shape_cast %16 : vector<1x1x16x16xf32> to vector<16x16xf32>
    %cst_13 = arith.constant dense<0.000000e+00> : vector<64x16xf32>
    %18 = tpu.matmul %15, %17, %cst_13 {dimension_numbers = #tpu.dot_dimension_numbers<[1], [0], [0], [1], [0, 0, 1, 1], [], []>} : vector<64x16xf32>, vector<16x16xf32>, vector<64x16xf32> -> vector<64x16xf32>
    %19 = arith.addf %13, %18 : vector<64x16xf32>
    %20 = vector.extract_strided_slice %7 {offsets = [0, 2, 0], sizes = [8, 8, 16], strides = [1, 1, 1]} : vector<10x10x16xf32> to vector<8x8x16xf32>
    %21 = vector.shape_cast %20 : vector<8x8x16xf32> to vector<64x16xf32>
    %c0_14 = arith.constant 0 : index
    %c2 = arith.constant 2 : index
    %c0_15 = arith.constant 0 : index
    %c0_16 = arith.constant 0 : index
    %22 = vector.load %arg4[%c0_14, %c2, %c0_15, %c0_16] : memref<1x27x16x16xf32, #tpu.memory_space<vmem>>, vector<1x1x16x16xf32>
    %23 = vector.shape_cast %22 : vector<1x1x16x16xf32> to vector<16x16xf32>
    %cst_17 = arith.constant dense<0.000000e+00> : vector<64x16xf32>
    %24 = tpu.matmul %21, %23, %cst_17 {dimension_numbers = #tpu.dot_dimension_numbers<[1], [0], [0], [1], [0, 0, 1, 1], [], []>} : vector<64x16xf32>, vector<16x16xf32>, vector<64x16xf32> -> vector<64x16xf32>
    %25 = arith.addf %19, %24 : vector<64x16xf32>
    %26 = vector.extract_strided_slice %7 {offsets = [1, 0, 0], sizes = [8, 8, 16], strides = [1, 1, 1]} : vector<10x10x16xf32> to vector<8x8x16xf32>
    %27 = vector.shape_cast %26 : vector<8x8x16xf32> to vector<64x16xf32>
    %c0_18 = arith.constant 0 : index
    %c3 = arith.constant 3 : index
    %c0_19 = arith.constant 0 : index
    %c0_20 = arith.constant 0 : index
    %28 = vector.load %arg4[%c0_18, %c3, %c0_19, %c0_20] : memref<1x27x16x16xf32, #tpu.memory_space<vmem>>, vector<1x1x16x16xf32>
    %29 = vector.shape_cast %28 : vector<1x1x16x16xf32> to vector<16x16xf32>
    %cst_21 = arith.constant dense<0.000000e+00> : vector<64x16xf32>
    %30 = tpu.matmul %27, %29, %cst_21 {dimension_numbers = #tpu.dot_dimension_numbers<[1], [0], [0], [1], [0, 0, 1, 1], [], []>} : vector<64x16xf32>, vector<16x16xf32>, vector<64x16xf32> -> vector<64x16xf32>
    %31 = arith.addf %25, %30 : vector<64x16xf32>
    %32 = vector.extract_strided_slice %7 {offsets = [1, 1, 0], sizes = [8, 8, 16], strides = [1, 1, 1]} : vector<10x10x16xf32> to vector<8x8x16xf32>
    %33 = vector.shape_cast %32 : vector<8x8x16xf32> to vector<64x16xf32>
    %c0_22 = arith.constant 0 : index
    %c4 = arith.constant 4 : index
    %c0_23 = arith.constant 0 : index
    %c0_24 = arith.constant 0 : index
    %34 = vector.load %arg4[%c0_22, %c4, %c0_23, %c0_24] : memref<1x27x16x16xf32, #tpu.memory_space<vmem>>, vector<1x1x16x16xf32>
    %35 = vector.shape_cast %34 : vector<1x1x16x16xf32> to vector<16x16xf32>
    %cst_25 = arith.constant dense<0.000000e+00> : vector<64x16xf32>
    %36 = tpu.matmul %33, %35, %cst_25 {dimension_numbers = #tpu.dot_dimension_numbers<[1], [0], [0], [1], [0, 0, 1, 1], [], []>} : vector<64x16xf32>, vector<16x16xf32>, vector<64x16xf32> -> vector<64x16xf32>
    %37 = arith.addf %31, %36 : vector<64x16xf32>
    %38 = vector.extract_strided_slice %7 {offsets = [1, 2, 0], sizes = [8, 8, 16], strides = [1, 1, 1]} : vector<10x10x16xf32> to vector<8x8x16xf32>
    %39 = vector.shape_cast %38 : vector<8x8x16xf32> to vector<64x16xf32>
    %c0_26 = arith.constant 0 : index
    %c5 = arith.constant 5 : index
    %c0_27 = arith.constant 0 : index
    %c0_28 = arith.constant 0 : index
    %40 = vector.load %arg4[%c0_26, %c5, %c0_27, %c0_28] : memref<1x27x16x16xf32, #tpu.memory_space<vmem>>, vector<1x1x16x16xf32>
    %41 = vector.shape_cast %40 : vector<1x1x16x16xf32> to vector<16x16xf32>
    %cst_29 = arith.constant dense<0.000000e+00> : vector<64x16xf32>
    %42 = tpu.matmul %39, %41, %cst_29 {dimension_numbers = #tpu.dot_dimension_numbers<[1], [0], [0], [1], [0, 0, 1, 1], [], []>} : vector<64x16xf32>, vector<16x16xf32>, vector<64x16xf32> -> vector<64x16xf32>
    %43 = arith.addf %37, %42 : vector<64x16xf32>
    %44 = vector.extract_strided_slice %7 {offsets = [2, 0, 0], sizes = [8, 8, 16], strides = [1, 1, 1]} : vector<10x10x16xf32> to vector<8x8x16xf32>
    %45 = vector.shape_cast %44 : vector<8x8x16xf32> to vector<64x16xf32>
    %c0_30 = arith.constant 0 : index
    %c6 = arith.constant 6 : index
    %c0_31 = arith.constant 0 : index
    %c0_32 = arith.constant 0 : index
    %46 = vector.load %arg4[%c0_30, %c6, %c0_31, %c0_32] : memref<1x27x16x16xf32, #tpu.memory_space<vmem>>, vector<1x1x16x16xf32>
    %47 = vector.shape_cast %46 : vector<1x1x16x16xf32> to vector<16x16xf32>
    %cst_33 = arith.constant dense<0.000000e+00> : vector<64x16xf32>
    %48 = tpu.matmul %45, %47, %cst_33 {dimension_numbers = #tpu.dot_dimension_numbers<[1], [0], [0], [1], [0, 0, 1, 1], [], []>} : vector<64x16xf32>, vector<16x16xf32>, vector<64x16xf32> -> vector<64x16xf32>
    %49 = arith.addf %43, %48 : vector<64x16xf32>
    %50 = vector.extract_strided_slice %7 {offsets = [2, 1, 0], sizes = [8, 8, 16], strides = [1, 1, 1]} : vector<10x10x16xf32> to vector<8x8x16xf32>
    %51 = vector.shape_cast %50 : vector<8x8x16xf32> to vector<64x16xf32>
    %c0_34 = arith.constant 0 : index
    %c7 = arith.constant 7 : index
    %c0_35 = arith.constant 0 : index
    %c0_36 = arith.constant 0 : index
    %52 = vector.load %arg4[%c0_34, %c7, %c0_35, %c0_36] : memref<1x27x16x16xf32, #tpu.memory_space<vmem>>, vector<1x1x16x16xf32>
    %53 = vector.shape_cast %52 : vector<1x1x16x16xf32> to vector<16x16xf32>
    %cst_37 = arith.constant dense<0.000000e+00> : vector<64x16xf32>
    %54 = tpu.matmul %51, %53, %cst_37 {dimension_numbers = #tpu.dot_dimension_numbers<[1], [0], [0], [1], [0, 0, 1, 1], [], []>} : vector<64x16xf32>, vector<16x16xf32>, vector<64x16xf32> -> vector<64x16xf32>
    %55 = arith.addf %49, %54 : vector<64x16xf32>
    %56 = vector.extract_strided_slice %7 {offsets = [2, 2, 0], sizes = [8, 8, 16], strides = [1, 1, 1]} : vector<10x10x16xf32> to vector<8x8x16xf32>
    %57 = vector.shape_cast %56 : vector<8x8x16xf32> to vector<64x16xf32>
    %c0_38 = arith.constant 0 : index
    %c8 = arith.constant 8 : index
    %c0_39 = arith.constant 0 : index
    %c0_40 = arith.constant 0 : index
    %58 = vector.load %arg4[%c0_38, %c8, %c0_39, %c0_40] : memref<1x27x16x16xf32, #tpu.memory_space<vmem>>, vector<1x1x16x16xf32>
    %59 = vector.shape_cast %58 : vector<1x1x16x16xf32> to vector<16x16xf32>
    %cst_41 = arith.constant dense<0.000000e+00> : vector<64x16xf32>
    %60 = tpu.matmul %57, %59, %cst_41 {dimension_numbers = #tpu.dot_dimension_numbers<[1], [0], [0], [1], [0, 0, 1, 1], [], []>} : vector<64x16xf32>, vector<16x16xf32>, vector<64x16xf32> -> vector<64x16xf32>
    %61 = arith.addf %55, %60 : vector<64x16xf32>
    %c1_i32_42 = arith.constant 1 : i32
    %62 = arith.muli %arg2, %c1_i32_42 : i32
    %c1_i32_43 = arith.constant 1 : i32
    %63 = arith.addi %62, %c1_i32_43 : i32
    %c1_i32_44 = arith.constant 1 : i32
    %64 = arith.muli %63, %c1_i32_44 : i32
    %c0_i32_45 = arith.constant 0 : i32
    %65 = arith.addi %64, %c0_i32_45 : i32
    %c0_46 = arith.constant 0 : index
    %66 = arith.index_cast %65 : i32 to index
    %c0_47 = arith.constant 0 : index
    %c0_48 = arith.constant 0 : index
    %c0_49 = arith.constant 0 : index
    %67 = vector.load %arg3[%c0_46, %66, %c0_47, %c0_48, %c0_49] : memref<1x6x10x10x16xf32, #tpu.memory_space<vmem>>, vector<1x1x10x10x16xf32>
    %68 = vector.shape_cast %67 : vector<1x1x10x10x16xf32> to vector<10x10x16xf32>
    %69 = vector.extract_strided_slice %68 {offsets = [0, 0, 0], sizes = [8, 8, 16], strides = [1, 1, 1]} : vector<10x10x16xf32> to vector<8x8x16xf32>
    %70 = vector.shape_cast %69 : vector<8x8x16xf32> to vector<64x16xf32>
    %c0_50 = arith.constant 0 : index
    %c9 = arith.constant 9 : index
    %c0_51 = arith.constant 0 : index
    %c0_52 = arith.constant 0 : index
    %71 = vector.load %arg4[%c0_50, %c9, %c0_51, %c0_52] : memref<1x27x16x16xf32, #tpu.memory_space<vmem>>, vector<1x1x16x16xf32>
    %72 = vector.shape_cast %71 : vector<1x1x16x16xf32> to vector<16x16xf32>
    %cst_53 = arith.constant dense<0.000000e+00> : vector<64x16xf32>
    %73 = tpu.matmul %70, %72, %cst_53 {dimension_numbers = #tpu.dot_dimension_numbers<[1], [0], [0], [1], [0, 0, 1, 1], [], []>} : vector<64x16xf32>, vector<16x16xf32>, vector<64x16xf32> -> vector<64x16xf32>
    %74 = arith.addf %61, %73 : vector<64x16xf32>
    %75 = vector.extract_strided_slice %68 {offsets = [0, 1, 0], sizes = [8, 8, 16], strides = [1, 1, 1]} : vector<10x10x16xf32> to vector<8x8x16xf32>
    %76 = vector.shape_cast %75 : vector<8x8x16xf32> to vector<64x16xf32>
    %c0_54 = arith.constant 0 : index
    %c10 = arith.constant 10 : index
    %c0_55 = arith.constant 0 : index
    %c0_56 = arith.constant 0 : index
    %77 = vector.load %arg4[%c0_54, %c10, %c0_55, %c0_56] : memref<1x27x16x16xf32, #tpu.memory_space<vmem>>, vector<1x1x16x16xf32>
    %78 = vector.shape_cast %77 : vector<1x1x16x16xf32> to vector<16x16xf32>
    %cst_57 = arith.constant dense<0.000000e+00> : vector<64x16xf32>
    %79 = tpu.matmul %76, %78, %cst_57 {dimension_numbers = #tpu.dot_dimension_numbers<[1], [0], [0], [1], [0, 0, 1, 1], [], []>} : vector<64x16xf32>, vector<16x16xf32>, vector<64x16xf32> -> vector<64x16xf32>
    %80 = arith.addf %74, %79 : vector<64x16xf32>
    %81 = vector.extract_strided_slice %68 {offsets = [0, 2, 0], sizes = [8, 8, 16], strides = [1, 1, 1]} : vector<10x10x16xf32> to vector<8x8x16xf32>
    %82 = vector.shape_cast %81 : vector<8x8x16xf32> to vector<64x16xf32>
    %c0_58 = arith.constant 0 : index
    %c11 = arith.constant 11 : index
    %c0_59 = arith.constant 0 : index
    %c0_60 = arith.constant 0 : index
    %83 = vector.load %arg4[%c0_58, %c11, %c0_59, %c0_60] : memref<1x27x16x16xf32, #tpu.memory_space<vmem>>, vector<1x1x16x16xf32>
    %84 = vector.shape_cast %83 : vector<1x1x16x16xf32> to vector<16x16xf32>
    %cst_61 = arith.constant dense<0.000000e+00> : vector<64x16xf32>
    %85 = tpu.matmul %82, %84, %cst_61 {dimension_numbers = #tpu.dot_dimension_numbers<[1], [0], [0], [1], [0, 0, 1, 1], [], []>} : vector<64x16xf32>, vector<16x16xf32>, vector<64x16xf32> -> vector<64x16xf32>
    %86 = arith.addf %80, %85 : vector<64x16xf32>
    %87 = vector.extract_strided_slice %68 {offsets = [1, 0, 0], sizes = [8, 8, 16], strides = [1, 1, 1]} : vector<10x10x16xf32> to vector<8x8x16xf32>
    %88 = vector.shape_cast %87 : vector<8x8x16xf32> to vector<64x16xf32>
    %c0_62 = arith.constant 0 : index
    %c12 = arith.constant 12 : index
    %c0_63 = arith.constant 0 : index
    %c0_64 = arith.constant 0 : index
    %89 = vector.load %arg4[%c0_62, %c12, %c0_63, %c0_64] : memref<1x27x16x16xf32, #tpu.memory_space<vmem>>, vector<1x1x16x16xf32>
    %90 = vector.shape_cast %89 : vector<1x1x16x16xf32> to vector<16x16xf32>
    %cst_65 = arith.constant dense<0.000000e+00> : vector<64x16xf32>
    %91 = tpu.matmul %88, %90, %cst_65 {dimension_numbers = #tpu.dot_dimension_numbers<[1], [0], [0], [1], [0, 0, 1, 1], [], []>} : vector<64x16xf32>, vector<16x16xf32>, vector<64x16xf32> -> vector<64x16xf32>
    %92 = arith.addf %86, %91 : vector<64x16xf32>
    %93 = vector.extract_strided_slice %68 {offsets = [1, 1, 0], sizes = [8, 8, 16], strides = [1, 1, 1]} : vector<10x10x16xf32> to vector<8x8x16xf32>
    %94 = vector.shape_cast %93 : vector<8x8x16xf32> to vector<64x16xf32>
    %c0_66 = arith.constant 0 : index
    %c13 = arith.constant 13 : index
    %c0_67 = arith.constant 0 : index
    %c0_68 = arith.constant 0 : index
    %95 = vector.load %arg4[%c0_66, %c13, %c0_67, %c0_68] : memref<1x27x16x16xf32, #tpu.memory_space<vmem>>, vector<1x1x16x16xf32>
    %96 = vector.shape_cast %95 : vector<1x1x16x16xf32> to vector<16x16xf32>
    %cst_69 = arith.constant dense<0.000000e+00> : vector<64x16xf32>
    %97 = tpu.matmul %94, %96, %cst_69 {dimension_numbers = #tpu.dot_dimension_numbers<[1], [0], [0], [1], [0, 0, 1, 1], [], []>} : vector<64x16xf32>, vector<16x16xf32>, vector<64x16xf32> -> vector<64x16xf32>
    %98 = arith.addf %92, %97 : vector<64x16xf32>
    %99 = vector.extract_strided_slice %68 {offsets = [1, 2, 0], sizes = [8, 8, 16], strides = [1, 1, 1]} : vector<10x10x16xf32> to vector<8x8x16xf32>
    %100 = vector.shape_cast %99 : vector<8x8x16xf32> to vector<64x16xf32>
    %c0_70 = arith.constant 0 : index
    %c14 = arith.constant 14 : index
    %c0_71 = arith.constant 0 : index
    %c0_72 = arith.constant 0 : index
    %101 = vector.load %arg4[%c0_70, %c14, %c0_71, %c0_72] : memref<1x27x16x16xf32, #tpu.memory_space<vmem>>, vector<1x1x16x16xf32>
    %102 = vector.shape_cast %101 : vector<1x1x16x16xf32> to vector<16x16xf32>
    %cst_73 = arith.constant dense<0.000000e+00> : vector<64x16xf32>
    %103 = tpu.matmul %100, %102, %cst_73 {dimension_numbers = #tpu.dot_dimension_numbers<[1], [0], [0], [1], [0, 0, 1, 1], [], []>} : vector<64x16xf32>, vector<16x16xf32>, vector<64x16xf32> -> vector<64x16xf32>
    %104 = arith.addf %98, %103 : vector<64x16xf32>
    %105 = vector.extract_strided_slice %68 {offsets = [2, 0, 0], sizes = [8, 8, 16], strides = [1, 1, 1]} : vector<10x10x16xf32> to vector<8x8x16xf32>
    %106 = vector.shape_cast %105 : vector<8x8x16xf32> to vector<64x16xf32>
    %c0_74 = arith.constant 0 : index
    %c15 = arith.constant 15 : index
    %c0_75 = arith.constant 0 : index
    %c0_76 = arith.constant 0 : index
    %107 = vector.load %arg4[%c0_74, %c15, %c0_75, %c0_76] : memref<1x27x16x16xf32, #tpu.memory_space<vmem>>, vector<1x1x16x16xf32>
    %108 = vector.shape_cast %107 : vector<1x1x16x16xf32> to vector<16x16xf32>
    %cst_77 = arith.constant dense<0.000000e+00> : vector<64x16xf32>
    %109 = tpu.matmul %106, %108, %cst_77 {dimension_numbers = #tpu.dot_dimension_numbers<[1], [0], [0], [1], [0, 0, 1, 1], [], []>} : vector<64x16xf32>, vector<16x16xf32>, vector<64x16xf32> -> vector<64x16xf32>
    %110 = arith.addf %104, %109 : vector<64x16xf32>
    %111 = vector.extract_strided_slice %68 {offsets = [2, 1, 0], sizes = [8, 8, 16], strides = [1, 1, 1]} : vector<10x10x16xf32> to vector<8x8x16xf32>
    %112 = vector.shape_cast %111 : vector<8x8x16xf32> to vector<64x16xf32>
    %c0_78 = arith.constant 0 : index
    %c16 = arith.constant 16 : index
    %c0_79 = arith.constant 0 : index
    %c0_80 = arith.constant 0 : index
    %113 = vector.load %arg4[%c0_78, %c16, %c0_79, %c0_80] : memref<1x27x16x16xf32, #tpu.memory_space<vmem>>, vector<1x1x16x16xf32>
    %114 = vector.shape_cast %113 : vector<1x1x16x16xf32> to vector<16x16xf32>
    %cst_81 = arith.constant dense<0.000000e+00> : vector<64x16xf32>
    %115 = tpu.matmul %112, %114, %cst_81 {dimension_numbers = #tpu.dot_dimension_numbers<[1], [0], [0], [1], [0, 0, 1, 1], [], []>} : vector<64x16xf32>, vector<16x16xf32>, vector<64x16xf32> -> vector<64x16xf32>
    %116 = arith.addf %110, %115 : vector<64x16xf32>
    %117 = vector.extract_strided_slice %68 {offsets = [2, 2, 0], sizes = [8, 8, 16], strides = [1, 1, 1]} : vector<10x10x16xf32> to vector<8x8x16xf32>
    %118 = vector.shape_cast %117 : vector<8x8x16xf32> to vector<64x16xf32>
    %c0_82 = arith.constant 0 : index
    %c17 = arith.constant 17 : index
    %c0_83 = arith.constant 0 : index
    %c0_84 = arith.constant 0 : index
    %119 = vector.load %arg4[%c0_82, %c17, %c0_83, %c0_84] : memref<1x27x16x16xf32, #tpu.memory_space<vmem>>, vector<1x1x16x16xf32>
    %120 = vector.shape_cast %119 : vector<1x1x16x16xf32> to vector<16x16xf32>
    %cst_85 = arith.constant dense<0.000000e+00> : vector<64x16xf32>
    %121 = tpu.matmul %118, %120, %cst_85 {dimension_numbers = #tpu.dot_dimension_numbers<[1], [0], [0], [1], [0, 0, 1, 1], [], []>} : vector<64x16xf32>, vector<16x16xf32>, vector<64x16xf32> -> vector<64x16xf32>
    %122 = arith.addf %116, %121 : vector<64x16xf32>
    %c1_i32_86 = arith.constant 1 : i32
    %123 = arith.muli %arg2, %c1_i32_86 : i32
    %c2_i32 = arith.constant 2 : i32
    %124 = arith.addi %123, %c2_i32 : i32
    %c1_i32_87 = arith.constant 1 : i32
    %125 = arith.muli %124, %c1_i32_87 : i32
    %c0_i32_88 = arith.constant 0 : i32
    %126 = arith.addi %125, %c0_i32_88 : i32
    %c0_89 = arith.constant 0 : index
    %127 = arith.index_cast %126 : i32 to index
    %c0_90 = arith.constant 0 : index
    %c0_91 = arith.constant 0 : index
    %c0_92 = arith.constant 0 : index
    %128 = vector.load %arg3[%c0_89, %127, %c0_90, %c0_91, %c0_92] : memref<1x6x10x10x16xf32, #tpu.memory_space<vmem>>, vector<1x1x10x10x16xf32>
    %129 = vector.shape_cast %128 : vector<1x1x10x10x16xf32> to vector<10x10x16xf32>
    %130 = vector.extract_strided_slice %129 {offsets = [0, 0, 0], sizes = [8, 8, 16], strides = [1, 1, 1]} : vector<10x10x16xf32> to vector<8x8x16xf32>
    %131 = vector.shape_cast %130 : vector<8x8x16xf32> to vector<64x16xf32>
    %c0_93 = arith.constant 0 : index
    %c18 = arith.constant 18 : index
    %c0_94 = arith.constant 0 : index
    %c0_95 = arith.constant 0 : index
    %132 = vector.load %arg4[%c0_93, %c18, %c0_94, %c0_95] : memref<1x27x16x16xf32, #tpu.memory_space<vmem>>, vector<1x1x16x16xf32>
    %133 = vector.shape_cast %132 : vector<1x1x16x16xf32> to vector<16x16xf32>
    %cst_96 = arith.constant dense<0.000000e+00> : vector<64x16xf32>
    %134 = tpu.matmul %131, %133, %cst_96 {dimension_numbers = #tpu.dot_dimension_numbers<[1], [0], [0], [1], [0, 0, 1, 1], [], []>} : vector<64x16xf32>, vector<16x16xf32>, vector<64x16xf32> -> vector<64x16xf32>
    %135 = arith.addf %122, %134 : vector<64x16xf32>
    %136 = vector.extract_strided_slice %129 {offsets = [0, 1, 0], sizes = [8, 8, 16], strides = [1, 1, 1]} : vector<10x10x16xf32> to vector<8x8x16xf32>
    %137 = vector.shape_cast %136 : vector<8x8x16xf32> to vector<64x16xf32>
    %c0_97 = arith.constant 0 : index
    %c19 = arith.constant 19 : index
    %c0_98 = arith.constant 0 : index
    %c0_99 = arith.constant 0 : index
    %138 = vector.load %arg4[%c0_97, %c19, %c0_98, %c0_99] : memref<1x27x16x16xf32, #tpu.memory_space<vmem>>, vector<1x1x16x16xf32>
    %139 = vector.shape_cast %138 : vector<1x1x16x16xf32> to vector<16x16xf32>
    %cst_100 = arith.constant dense<0.000000e+00> : vector<64x16xf32>
    %140 = tpu.matmul %137, %139, %cst_100 {dimension_numbers = #tpu.dot_dimension_numbers<[1], [0], [0], [1], [0, 0, 1, 1], [], []>} : vector<64x16xf32>, vector<16x16xf32>, vector<64x16xf32> -> vector<64x16xf32>
    %141 = arith.addf %135, %140 : vector<64x16xf32>
    %142 = vector.extract_strided_slice %129 {offsets = [0, 2, 0], sizes = [8, 8, 16], strides = [1, 1, 1]} : vector<10x10x16xf32> to vector<8x8x16xf32>
    %143 = vector.shape_cast %142 : vector<8x8x16xf32> to vector<64x16xf32>
    %c0_101 = arith.constant 0 : index
    %c20 = arith.constant 20 : index
    %c0_102 = arith.constant 0 : index
    %c0_103 = arith.constant 0 : index
    %144 = vector.load %arg4[%c0_101, %c20, %c0_102, %c0_103] : memref<1x27x16x16xf32, #tpu.memory_space<vmem>>, vector<1x1x16x16xf32>
    %145 = vector.shape_cast %144 : vector<1x1x16x16xf32> to vector<16x16xf32>
    %cst_104 = arith.constant dense<0.000000e+00> : vector<64x16xf32>
    %146 = tpu.matmul %143, %145, %cst_104 {dimension_numbers = #tpu.dot_dimension_numbers<[1], [0], [0], [1], [0, 0, 1, 1], [], []>} : vector<64x16xf32>, vector<16x16xf32>, vector<64x16xf32> -> vector<64x16xf32>
    %147 = arith.addf %141, %146 : vector<64x16xf32>
    %148 = vector.extract_strided_slice %129 {offsets = [1, 0, 0], sizes = [8, 8, 16], strides = [1, 1, 1]} : vector<10x10x16xf32> to vector<8x8x16xf32>
    %149 = vector.shape_cast %148 : vector<8x8x16xf32> to vector<64x16xf32>
    %c0_105 = arith.constant 0 : index
    %c21 = arith.constant 21 : index
    %c0_106 = arith.constant 0 : index
    %c0_107 = arith.constant 0 : index
    %150 = vector.load %arg4[%c0_105, %c21, %c0_106, %c0_107] : memref<1x27x16x16xf32, #tpu.memory_space<vmem>>, vector<1x1x16x16xf32>
    %151 = vector.shape_cast %150 : vector<1x1x16x16xf32> to vector<16x16xf32>
    %cst_108 = arith.constant dense<0.000000e+00> : vector<64x16xf32>
    %152 = tpu.matmul %149, %151, %cst_108 {dimension_numbers = #tpu.dot_dimension_numbers<[1], [0], [0], [1], [0, 0, 1, 1], [], []>} : vector<64x16xf32>, vector<16x16xf32>, vector<64x16xf32> -> vector<64x16xf32>
    %153 = arith.addf %147, %152 : vector<64x16xf32>
    %154 = vector.extract_strided_slice %129 {offsets = [1, 1, 0], sizes = [8, 8, 16], strides = [1, 1, 1]} : vector<10x10x16xf32> to vector<8x8x16xf32>
    %155 = vector.shape_cast %154 : vector<8x8x16xf32> to vector<64x16xf32>
    %c0_109 = arith.constant 0 : index
    %c22 = arith.constant 22 : index
    %c0_110 = arith.constant 0 : index
    %c0_111 = arith.constant 0 : index
    %156 = vector.load %arg4[%c0_109, %c22, %c0_110, %c0_111] : memref<1x27x16x16xf32, #tpu.memory_space<vmem>>, vector<1x1x16x16xf32>
    %157 = vector.shape_cast %156 : vector<1x1x16x16xf32> to vector<16x16xf32>
    %cst_112 = arith.constant dense<0.000000e+00> : vector<64x16xf32>
    %158 = tpu.matmul %155, %157, %cst_112 {dimension_numbers = #tpu.dot_dimension_numbers<[1], [0], [0], [1], [0, 0, 1, 1], [], []>} : vector<64x16xf32>, vector<16x16xf32>, vector<64x16xf32> -> vector<64x16xf32>
    %159 = arith.addf %153, %158 : vector<64x16xf32>
    %160 = vector.extract_strided_slice %129 {offsets = [1, 2, 0], sizes = [8, 8, 16], strides = [1, 1, 1]} : vector<10x10x16xf32> to vector<8x8x16xf32>
    %161 = vector.shape_cast %160 : vector<8x8x16xf32> to vector<64x16xf32>
    %c0_113 = arith.constant 0 : index
    %c23 = arith.constant 23 : index
    %c0_114 = arith.constant 0 : index
    %c0_115 = arith.constant 0 : index
    %162 = vector.load %arg4[%c0_113, %c23, %c0_114, %c0_115] : memref<1x27x16x16xf32, #tpu.memory_space<vmem>>, vector<1x1x16x16xf32>
    %163 = vector.shape_cast %162 : vector<1x1x16x16xf32> to vector<16x16xf32>
    %cst_116 = arith.constant dense<0.000000e+00> : vector<64x16xf32>
    %164 = tpu.matmul %161, %163, %cst_116 {dimension_numbers = #tpu.dot_dimension_numbers<[1], [0], [0], [1], [0, 0, 1, 1], [], []>} : vector<64x16xf32>, vector<16x16xf32>, vector<64x16xf32> -> vector<64x16xf32>
    %165 = arith.addf %159, %164 : vector<64x16xf32>
    %166 = vector.extract_strided_slice %129 {offsets = [2, 0, 0], sizes = [8, 8, 16], strides = [1, 1, 1]} : vector<10x10x16xf32> to vector<8x8x16xf32>
    %167 = vector.shape_cast %166 : vector<8x8x16xf32> to vector<64x16xf32>
    %c0_117 = arith.constant 0 : index
    %c24 = arith.constant 24 : index
    %c0_118 = arith.constant 0 : index
    %c0_119 = arith.constant 0 : index
    %168 = vector.load %arg4[%c0_117, %c24, %c0_118, %c0_119] : memref<1x27x16x16xf32, #tpu.memory_space<vmem>>, vector<1x1x16x16xf32>
    %169 = vector.shape_cast %168 : vector<1x1x16x16xf32> to vector<16x16xf32>
    %cst_120 = arith.constant dense<0.000000e+00> : vector<64x16xf32>
    %170 = tpu.matmul %167, %169, %cst_120 {dimension_numbers = #tpu.dot_dimension_numbers<[1], [0], [0], [1], [0, 0, 1, 1], [], []>} : vector<64x16xf32>, vector<16x16xf32>, vector<64x16xf32> -> vector<64x16xf32>
    %171 = arith.addf %165, %170 : vector<64x16xf32>
    %172 = vector.extract_strided_slice %129 {offsets = [2, 1, 0], sizes = [8, 8, 16], strides = [1, 1, 1]} : vector<10x10x16xf32> to vector<8x8x16xf32>
    %173 = vector.shape_cast %172 : vector<8x8x16xf32> to vector<64x16xf32>
    %c0_121 = arith.constant 0 : index
    %c25 = arith.constant 25 : index
    %c0_122 = arith.constant 0 : index
    %c0_123 = arith.constant 0 : index
    %174 = vector.load %arg4[%c0_121, %c25, %c0_122, %c0_123] : memref<1x27x16x16xf32, #tpu.memory_space<vmem>>, vector<1x1x16x16xf32>
    %175 = vector.shape_cast %174 : vector<1x1x16x16xf32> to vector<16x16xf32>
    %cst_124 = arith.constant dense<0.000000e+00> : vector<64x16xf32>
    %176 = tpu.matmul %173, %175, %cst_124 {dimension_numbers = #tpu.dot_dimension_numbers<[1], [0], [0], [1], [0, 0, 1, 1], [], []>} : vector<64x16xf32>, vector<16x16xf32>, vector<64x16xf32> -> vector<64x16xf32>
    %177 = arith.addf %171, %176 : vector<64x16xf32>
    %178 = vector.extract_strided_slice %129 {offsets = [2, 2, 0], sizes = [8, 8, 16], strides = [1, 1, 1]} : vector<10x10x16xf32> to vector<8x8x16xf32>
    %179 = vector.shape_cast %178 : vector<8x8x16xf32> to vector<64x16xf32>
    %c0_125 = arith.constant 0 : index
    %c26 = arith.constant 26 : index
    %c0_126 = arith.constant 0 : index
    %c0_127 = arith.constant 0 : index
    %180 = vector.load %arg4[%c0_125, %c26, %c0_126, %c0_127] : memref<1x27x16x16xf32, #tpu.memory_space<vmem>>, vector<1x1x16x16xf32>
    %181 = vector.shape_cast %180 : vector<1x1x16x16xf32> to vector<16x16xf32>
    %cst_128 = arith.constant dense<0.000000e+00> : vector<64x16xf32>
    %182 = tpu.matmul %179, %181, %cst_128 {dimension_numbers = #tpu.dot_dimension_numbers<[1], [0], [0], [1], [0, 0, 1, 1], [], []>} : vector<64x16xf32>, vector<16x16xf32>, vector<64x16xf32> -> vector<64x16xf32>
    %183 = arith.addf %177, %182 : vector<64x16xf32>
    %c0_129 = arith.constant 0 : index
    %c0_130 = arith.constant 0 : index
    %184 = vector.load %arg5[%c0_129, %c0_130] : memref<1x16xf32, #tpu.memory_space<vmem>>, vector<1x16xf32>
    %185 = vector.broadcast %184 : vector<1x16xf32> to vector<64x16xf32>
    %186 = arith.mulf %183, %185 : vector<64x16xf32>
    %c0_131 = arith.constant 0 : index
    %c0_132 = arith.constant 0 : index
    %187 = vector.load %arg6[%c0_131, %c0_132] : memref<1x16xf32, #tpu.memory_space<vmem>>, vector<1x16xf32>
    %188 = vector.broadcast %187 : vector<1x16xf32> to vector<64x16xf32>
    %189 = arith.addf %186, %188 : vector<64x16xf32>
    %cst_133 = arith.constant 0.000000e+00 : f32
    %190 = vector.broadcast %cst_133 : f32 to vector<64x16xf32>
    %191 = arith.maximumf %189, %190 : vector<64x16xf32>
    %c0_134 = arith.constant 0 : index
    %c0_135 = arith.constant 0 : index
    %c0_136 = arith.constant 0 : index
    %c0_137 = arith.constant 0 : index
    %192 = vector.load %arg7[%c0_134, %c0_135, %c0_136, %c0_137] : memref<1x1x64x16xf32, #tpu.memory_space<vmem>>, vector<1x1x64x16xf32>
    %193 = vector.shape_cast %192 : vector<1x1x64x16xf32> to vector<64x16xf32>
    %194 = vector.shape_cast %191 : vector<64x16xf32> to vector<1x1x64x16xf32>
    tpu.vector_store %arg7[%c0_134, %c0_135, %c0_136, %c0_137], %194 {strides = array<i32>} : memref<1x1x64x16xf32, #tpu.memory_space<vmem>>, vector<1x1x64x16xf32>,
    return
  }
  func.func @transform_0(%arg0: i32, %arg1: i32, %arg2: i32) -> (i32, i32, i32, i32, i32) {
    %c0_i32 = arith.constant 0 : i32
    %c0_i32_0 = arith.constant 0 : i32
    %c0_i32_1 = arith.constant 0 : i32
    %c0_i32_2 = arith.constant 0 : i32
    return %arg0, %c0_i32, %c0_i32_0, %c0_i32_1, %arg1 : i32, i32, i32, i32, i32
  }
  func.func @transform_1(%arg0: i32, %arg1: i32, %arg2: i32) -> (i32, i32, i32, i32) {
    %c0_i32 = arith.constant 0 : i32
    %c0_i32_0 = arith.constant 0 : i32
    %c0_i32_1 = arith.constant 0 : i32
    %c0_i32_2 = arith.constant 0 : i32
    return %arg1, %c0_i32, %c0_i32_0, %c0_i32_1 : i32, i32, i32, i32
  }
  func.func @transform_2(%arg0: i32, %arg1: i32, %arg2: i32) -> (i32, i32) {
    %c0_i32 = arith.constant 0 : i32
    %c0_i32_0 = arith.constant 0 : i32
    return %c0_i32, %arg1 : i32, i32
  }
  func.func @transform_3(%arg0: i32, %arg1: i32, %arg2: i32) -> (i32, i32) {
    %c0_i32 = arith.constant 0 : i32
    %c0_i32_0 = arith.constant 0 : i32
    return %c0_i32, %arg1 : i32, i32
  }
  func.func @transform_4(%arg0: i32, %arg1: i32, %arg2: i32) -> (i32, i32, i32, i32) {
    %c0_i32 = arith.constant 0 : i32
    %c0_i32_0 = arith.constant 0 : i32
    return %arg0, %arg2, %c0_i32, %arg1 : i32, i32, i32, i32
  }
}

module attributes {stable_mosaic.version = 11 : i64} {
  func.func @_pw_kernel(%arg0: i32, %arg1: memref<256x16xf32, #tpu.memory_space<vmem>>, %arg2: memref<16x16xf32, #tpu.memory_space<vmem>>, %arg3: memref<1x16xf32, #tpu.memory_space<vmem>>, %arg4: memref<1x16xf32, #tpu.memory_space<vmem>>, %arg5: memref<256x16xf32, #tpu.memory_space<vmem>>) attributes {dimension_semantics = [#tpu.dimension_semantics<parallel>], iteration_bounds = array<i64: 2>, scalar_prefetch = 0 : i64, scratch_operands = 0 : i64, tpu.core_type = #tpu.core_type<tc>, window_params = [{transform_indices = @transform_0, window_bounds = array<i64: 256, 16>}, {pipeline_mode = #tpu.pipeline_mode<synchronous>, transform_indices = @transform_1, window_bounds = array<i64: 16, 16>}, {pipeline_mode = #tpu.pipeline_mode<synchronous>, transform_indices = @transform_2, window_bounds = array<i64: 1, 16>}, {pipeline_mode = #tpu.pipeline_mode<synchronous>, transform_indices = @transform_3, window_bounds = array<i64: 1, 16>}, {transform_indices = @transform_4, window_bounds = array<i64: 256, 16>}]} {
    %c0 = arith.constant 0 : index
    %c0_0 = arith.constant 0 : index
    %0 = vector.load %arg1[%c0, %c0_0] : memref<256x16xf32, #tpu.memory_space<vmem>>, vector<256x16xf32>
    %c0_1 = arith.constant 0 : index
    %c0_2 = arith.constant 0 : index
    %1 = vector.load %arg2[%c0_1, %c0_2] : memref<16x16xf32, #tpu.memory_space<vmem>>, vector<16x16xf32>
    %cst = arith.constant dense<0.000000e+00> : vector<256x16xf32>
    %2 = tpu.matmul %0, %1, %cst {dimension_numbers = #tpu.dot_dimension_numbers<[1], [0], [0], [1], [0, 0, 1, 1], [], []>} : vector<256x16xf32>, vector<16x16xf32>, vector<256x16xf32> -> vector<256x16xf32>
    %c0_3 = arith.constant 0 : index
    %c0_4 = arith.constant 0 : index
    %3 = vector.load %arg3[%c0_3, %c0_4] : memref<1x16xf32, #tpu.memory_space<vmem>>, vector<1x16xf32>
    %4 = vector.broadcast %3 : vector<1x16xf32> to vector<256x16xf32>
    %5 = arith.mulf %2, %4 : vector<256x16xf32>
    %c0_5 = arith.constant 0 : index
    %c0_6 = arith.constant 0 : index
    %6 = vector.load %arg4[%c0_5, %c0_6] : memref<1x16xf32, #tpu.memory_space<vmem>>, vector<1x16xf32>
    %7 = vector.broadcast %6 : vector<1x16xf32> to vector<256x16xf32>
    %8 = arith.addf %5, %7 : vector<256x16xf32>
    %cst_7 = arith.constant 0.000000e+00 : f32
    %9 = vector.broadcast %cst_7 : f32 to vector<256x16xf32>
    %10 = arith.maximumf %8, %9 : vector<256x16xf32>
    %c0_8 = arith.constant 0 : index
    %c0_9 = arith.constant 0 : index
    %11 = vector.load %arg5[%c0_8, %c0_9] : memref<256x16xf32, #tpu.memory_space<vmem>>, vector<256x16xf32>
    tpu.vector_store %arg5[%c0_8, %c0_9], %10 {strides = array<i32>} : memref<256x16xf32, #tpu.memory_space<vmem>>, vector<256x16xf32>,
    return
  }
  func.func @transform_0(%arg0: i32) -> (i32, i32) {
    %c0_i32 = arith.constant 0 : i32
    %c0_i32_0 = arith.constant 0 : i32
    return %arg0, %c0_i32 : i32, i32
  }
  func.func @transform_1(%arg0: i32) -> (i32, i32) {
    %c0_i32 = arith.constant 0 : i32
    %c0_i32_0 = arith.constant 0 : i32
    %c0_i32_1 = arith.constant 0 : i32
    return %c0_i32, %c0_i32_0 : i32, i32
  }
  func.func @transform_2(%arg0: i32) -> (i32, i32) {
    %c0_i32 = arith.constant 0 : i32
    %c0_i32_0 = arith.constant 0 : i32
    %c0_i32_1 = arith.constant 0 : i32
    return %c0_i32, %c0_i32_0 : i32, i32
  }
  func.func @transform_3(%arg0: i32) -> (i32, i32) {
    %c0_i32 = arith.constant 0 : i32
    %c0_i32_0 = arith.constant 0 : i32
    %c0_i32_1 = arith.constant 0 : i32
    return %c0_i32, %c0_i32_0 : i32, i32
  }
  func.func @transform_4(%arg0: i32) -> (i32, i32) {
    %c0_i32 = arith.constant 0 : i32
    %c0_i32_0 = arith.constant 0 : i32
    return %arg0, %c0_i32 : i32, i32
  }
}

module attributes {stable_mosaic.version = 11 : i64} {
  func.func @_pw3_downsample_kernel(%arg0: i32, %arg1: memref<256x16xf32, #tpu.memory_space<vmem>>, %arg2: memref<16x32xf32, #tpu.memory_space<vmem>>, %arg3: memref<1x32xf32, #tpu.memory_space<vmem>>, %arg4: memref<1x32xf32, #tpu.memory_space<vmem>>, %arg5: memref<256x16xf32, #tpu.memory_space<vmem>>, %arg6: memref<16x32xf32, #tpu.memory_space<vmem>>, %arg7: memref<1x32xf32, #tpu.memory_space<vmem>>, %arg8: memref<1x32xf32, #tpu.memory_space<vmem>>, %arg9: memref<256x32xf32, #tpu.memory_space<vmem>>) attributes {dimension_semantics = [#tpu.dimension_semantics<parallel>], iteration_bounds = array<i64: 2>, scalar_prefetch = 0 : i64, scratch_operands = 0 : i64, tpu.core_type = #tpu.core_type<tc>, window_params = [{transform_indices = @transform_0, window_bounds = array<i64: 256, 16>}, {pipeline_mode = #tpu.pipeline_mode<synchronous>, transform_indices = @transform_1, window_bounds = array<i64: 16, 32>}, {pipeline_mode = #tpu.pipeline_mode<synchronous>, transform_indices = @transform_2, window_bounds = array<i64: 1, 32>}, {pipeline_mode = #tpu.pipeline_mode<synchronous>, transform_indices = @transform_3, window_bounds = array<i64: 1, 32>}, {transform_indices = @transform_4, window_bounds = array<i64: 256, 16>}, {pipeline_mode = #tpu.pipeline_mode<synchronous>, transform_indices = @transform_5, window_bounds = array<i64: 16, 32>}, {pipeline_mode = #tpu.pipeline_mode<synchronous>, transform_indices = @transform_6, window_bounds = array<i64: 1, 32>}, {pipeline_mode = #tpu.pipeline_mode<synchronous>, transform_indices = @transform_7, window_bounds = array<i64: 1, 32>}, {transform_indices = @transform_8, window_bounds = array<i64: 256, 32>}]} {
    %c0 = arith.constant 0 : index
    %c0_0 = arith.constant 0 : index
    %0 = vector.load %arg1[%c0, %c0_0] : memref<256x16xf32, #tpu.memory_space<vmem>>, vector<256x16xf32>
    %c0_1 = arith.constant 0 : index
    %c0_2 = arith.constant 0 : index
    %1 = vector.load %arg2[%c0_1, %c0_2] : memref<16x32xf32, #tpu.memory_space<vmem>>, vector<16x32xf32>
    %cst = arith.constant dense<0.000000e+00> : vector<256x32xf32>
    %2 = tpu.matmul %0, %1, %cst {dimension_numbers = #tpu.dot_dimension_numbers<[1], [0], [0], [1], [0, 0, 1, 1], [], []>} : vector<256x16xf32>, vector<16x32xf32>, vector<256x32xf32> -> vector<256x32xf32>
    %c0_3 = arith.constant 0 : index
    %c0_4 = arith.constant 0 : index
    %3 = vector.load %arg3[%c0_3, %c0_4] : memref<1x32xf32, #tpu.memory_space<vmem>>, vector<1x32xf32>
    %4 = vector.broadcast %3 : vector<1x32xf32> to vector<256x32xf32>
    %5 = arith.mulf %2, %4 : vector<256x32xf32>
    %c0_5 = arith.constant 0 : index
    %c0_6 = arith.constant 0 : index
    %6 = vector.load %arg4[%c0_5, %c0_6] : memref<1x32xf32, #tpu.memory_space<vmem>>, vector<1x32xf32>
    %7 = vector.broadcast %6 : vector<1x32xf32> to vector<256x32xf32>
    %8 = arith.addf %5, %7 : vector<256x32xf32>
    %c0_7 = arith.constant 0 : index
    %c0_8 = arith.constant 0 : index
    %9 = vector.load %arg5[%c0_7, %c0_8] : memref<256x16xf32, #tpu.memory_space<vmem>>, vector<256x16xf32>
    %c0_9 = arith.constant 0 : index
    %c0_10 = arith.constant 0 : index
    %10 = vector.load %arg6[%c0_9, %c0_10] : memref<16x32xf32, #tpu.memory_space<vmem>>, vector<16x32xf32>
    %cst_11 = arith.constant dense<0.000000e+00> : vector<256x32xf32>
    %11 = tpu.matmul %9, %10, %cst_11 {dimension_numbers = #tpu.dot_dimension_numbers<[1], [0], [0], [1], [0, 0, 1, 1], [], []>} : vector<256x16xf32>, vector<16x32xf32>, vector<256x32xf32> -> vector<256x32xf32>
    %c0_12 = arith.constant 0 : index
    %c0_13 = arith.constant 0 : index
    %12 = vector.load %arg7[%c0_12, %c0_13] : memref<1x32xf32, #tpu.memory_space<vmem>>, vector<1x32xf32>
    %13 = vector.broadcast %12 : vector<1x32xf32> to vector<256x32xf32>
    %14 = arith.mulf %11, %13 : vector<256x32xf32>
    %c0_14 = arith.constant 0 : index
    %c0_15 = arith.constant 0 : index
    %15 = vector.load %arg8[%c0_14, %c0_15] : memref<1x32xf32, #tpu.memory_space<vmem>>, vector<1x32xf32>
    %16 = vector.broadcast %15 : vector<1x32xf32> to vector<256x32xf32>
    %17 = arith.addf %14, %16 : vector<256x32xf32>
    %18 = arith.addf %8, %17 : vector<256x32xf32>
    %cst_16 = arith.constant 0.000000e+00 : f32
    %19 = vector.broadcast %cst_16 : f32 to vector<256x32xf32>
    %20 = arith.maximumf %18, %19 : vector<256x32xf32>
    %c0_17 = arith.constant 0 : index
    %c0_18 = arith.constant 0 : index
    %21 = vector.load %arg9[%c0_17, %c0_18] : memref<256x32xf32, #tpu.memory_space<vmem>>, vector<256x32xf32>
    tpu.vector_store %arg9[%c0_17, %c0_18], %20 {strides = array<i32>} : memref<256x32xf32, #tpu.memory_space<vmem>>, vector<256x32xf32>,
    return
  }
  func.func @transform_0(%arg0: i32) -> (i32, i32) {
    %c0_i32 = arith.constant 0 : i32
    %c0_i32_0 = arith.constant 0 : i32
    return %arg0, %c0_i32 : i32, i32
  }
  func.func @transform_1(%arg0: i32) -> (i32, i32) {
    %c0_i32 = arith.constant 0 : i32
    %c0_i32_0 = arith.constant 0 : i32
    %c0_i32_1 = arith.constant 0 : i32
    return %c0_i32, %c0_i32_0 : i32, i32
  }
  func.func @transform_2(%arg0: i32) -> (i32, i32) {
    %c0_i32 = arith.constant 0 : i32
    %c0_i32_0 = arith.constant 0 : i32
    %c0_i32_1 = arith.constant 0 : i32
    return %c0_i32, %c0_i32_0 : i32, i32
  }
  func.func @transform_3(%arg0: i32) -> (i32, i32) {
    %c0_i32 = arith.constant 0 : i32
    %c0_i32_0 = arith.constant 0 : i32
    %c0_i32_1 = arith.constant 0 : i32
    return %c0_i32, %c0_i32_0 : i32, i32
  }
  func.func @transform_4(%arg0: i32) -> (i32, i32) {
    %c0_i32 = arith.constant 0 : i32
    %c0_i32_0 = arith.constant 0 : i32
    return %arg0, %c0_i32 : i32, i32
  }
  func.func @transform_5(%arg0: i32) -> (i32, i32) {
    %c0_i32 = arith.constant 0 : i32
    %c0_i32_0 = arith.constant 0 : i32
    %c0_i32_1 = arith.constant 0 : i32
    return %c0_i32, %c0_i32_0 : i32, i32
  }
  func.func @transform_6(%arg0: i32) -> (i32, i32) {
    %c0_i32 = arith.constant 0 : i32
    %c0_i32_0 = arith.constant 0 : i32
    %c0_i32_1 = arith.constant 0 : i32
    return %c0_i32, %c0_i32_0 : i32, i32
  }
  func.func @transform_7(%arg0: i32) -> (i32, i32) {
    %c0_i32 = arith.constant 0 : i32
    %c0_i32_0 = arith.constant 0 : i32
    %c0_i32_1 = arith.constant 0 : i32
    return %c0_i32, %c0_i32_0 : i32, i32
  }
  func.func @transform_8(%arg0: i32) -> (i32, i32) {
    %c0_i32 = arith.constant 0 : i32
    %c0_i32_0 = arith.constant 0 : i32
    return %arg0, %c0_i32 : i32, i32
  }
}

</mosaic_0001>

<bundles_post_ra>
// kernel: bottleneck_forward.3
= control target key start
LH: loop header
LB: loop body
LE: loop exit
PB: predicated region body
PF: predicated region fallthrough
CT: control target
= control target key end

     0   :  { %s933_s15 = smov 0   ;;  %s1169_s0 = inlined_call_operand.vmem [shape: f32[512,16], index: 0, kind: input, shape index: {}]   ;;  %s1170_s1 = inlined_call_operand.vmem [shape: f32[16,16], index: 1, kind: input, shape index: {}]   ;;  %s1171_s2 = inlined_call_operand.vmem [shape: f32[1,16], index: 2, kind: input, shape index: {}]   ;;  %s1172_s3 = inlined_call_operand.vmem [shape: f32[1,16], index: 3, kind: input, shape index: {}]   ;;  %s1173_s4 = inlined_call_operand.vmem [shape: f32[512,16], index: 4, kind: output, shape index: {}]  }
   0x1 LB: > { %s755_s16 = sadd.s32 4294967295, %s906_s15   ;;  %p759_p0 = scmp.ge.s32.totalorder %s906_s15, 1  ;;  %s906_s15 = sphi %s933_s15, %s14_s15  }
   0x2   : > { %p163_p1 = scmp.lt.s32.totalorder %s906_s15, 3 }
   0x4   : > { %p164_p2 = pnand %p759_p0, %p163_p1 }
   0x5   : > { %v233_v0 = vld [vmem:[%s1170_s1] sm:$0xff] (!%p164_p2)  ;;  %v234_v1 = vld [vmem:[%s1170_s1 + $0x8] sm:$0xff] (!%p164_p2)  ;;  %s760_s21 = sshll.u32 (!%p164_p2), %s755_s16, 5  ;;  %vm235_vm0 = vcmask (!%p164_p2), 130048  }
   0x6   : > { %167 = sbr.rel (%p164_p2) target bundleno = 267 (0x10b), region = 36  ;;  %v886_v2 = vpack.c.bf16 (!%p164_p2), %v234_v1, %v233_v0  ;;  %p190_p3 = scmp.lt.s32.totalorder (!%p164_p2), %s760_s21, 63  ;;  %v1024_v35 = vld [vmem:[%s1171_s2] ss:$0 sm:$0xff] (!%p164_p2) }
   0x7   : > { %v1029_v37 = vld [vmem:[%s1172_s3] ss:$0 sm:$0xff] (!%p164_p2) }
   0x8   : > { %887 = vmatprep.subr.bf16.mxu0 (!%p164_p2), %v886_v2  ;;  %890 = vmatprep.subr.bf16.mxu1 (!%p164_p2), %v886_v2 }
   0x9   : > { %889 = vmatpush3.bf16.msra.mxu0 (!%p164_p2), %v886_v2  ;;  %891 = vmatpush3.bf16.msra.mxu1 (!%p164_p2), %v886_v2 }
   0xd   : > { %s1175_s21 = smov (!%p190_p3, %s760_s21), 63 }
   0xe   : > { %s761_s22 = sshll.u32 %s1175_s21, 3 }
   0xf   : > { %s955_s25 = scalar_lea.vmem %s1169_s0, %s761_s22  ;;  %s1042_s6 = scalar_lea.vmem %s1173_s4, %s761_s22 }
  0x10   : > { %v201_v3 = vld [vmem:[%s955_s25] sm:$0xff]  ;;  %v202_v5 = vld [vmem:[%s955_s25 + $0x8] sm:$0xff]  ;;  %v203_v7 = vld [vmem:[%s955_s25 + $0x10] sm:$0xff] }
  0x11   : > { %v217_v4 = vld [vmem:[%s955_s25 + $0x80] sm:$0xff]  ;;  %838 = vmatprep.mubr.msk.f32.mxu0 %vm235_vm0, %v201_v3  ;;  %v218_v6 = vld [vmem:[%s955_s25 + $0x88] sm:$0xff]  ;;  %v219_v8 = vld [vmem:[%s955_s25 + $0x90] sm:$0xff] }
  0x12   : > { %862 = vmatprep.mubr.msk.f32.mxu1 %vm235_vm0, %v217_v4  ;;  %839 = vmatmul.mubr.msk.f32.vlgmr.msra.gmra.mrb[0].mxu0 %vm235_vm0, %v202_v5  ;;  %v204_v9 = vld [vmem:[%s955_s25 + $0x18] sm:$0xff]  ;;  %v205_v11 = vld [vmem:[%s955_s25 + $0x20] sm:$0xff]  ;;  %v206_v13 = vld [vmem:[%s955_s25 + $0x28] sm:$0xff] }
  0x13   : > { %863 = vmatmul.mubr.msk.f32.vlgmr.msra.gmra.mrb[0].mxu1 %vm235_vm0, %v218_v6  ;;  %841 = vmatprep.mubr.msk.f32.mxu0 %vm235_vm0, %v203_v7  ;;  %v220_v10 = vld [vmem:[%s955_s25 + $0x98] sm:$0xff]  ;;  %v221_v12 = vld [vmem:[%s955_s25 + $0xa0] sm:$0xff]  ;;  %v222_v14 = vld [vmem:[%s955_s25 + $0xa8] sm:$0xff] }
  0x14   : > { %865 = vmatprep.mubr.msk.f32.mxu1 %vm235_vm0, %v219_v8  ;;  %v207_v15 = vld [vmem:[%s955_s25 + $0x30] sm:$0xff]  ;;  %v208_v17 = vld [vmem:[%s955_s25 + $0x38] sm:$0xff]  ;;  %v209_v19 = vld [vmem:[%s955_s25 + $0x40] sm:$0xff] }
  0x15   : > { %v223_v16 = vld [vmem:[%s955_s25 + $0xb0] sm:$0xff]  ;;  %v224_v18 = vld [vmem:[%s955_s25 + $0xb8] sm:$0xff]  ;;  %v225_v20 = vld [vmem:[%s955_s25 + $0xc0] sm:$0xff] }
  0x16   : > { %842 = vmatmul.mubr.msk.f32.gmra.mrb[2].mxu0 %vm235_vm0, %v204_v9  ;;  %v210_v21 = vld [vmem:[%s955_s25 + $0x48] sm:$0xff]  ;;  %v211_v23 = vld [vmem:[%s955_s25 + $0x50] sm:$0xff]  ;;  %v212_v25 = vld [vmem:[%s955_s25 + $0x58] sm:$0xff] }
  0x17   : > { %866 = vmatmul.mubr.msk.f32.gmra.mrb[2].mxu1 %vm235_vm0, %v220_v10  ;;  %844 = vmatprep.mubr.msk.f32.mxu0 %vm235_vm0, %v205_v11  ;;  %v226_v22 = vld [vmem:[%s955_s25 + $0xc8] sm:$0xff]  ;;  %v227_v24 = vld [vmem:[%s955_s25 + $0xd0] sm:$0xff]  ;;  %v228_v26 = vld [vmem:[%s955_s25 + $0xd8] sm:$0xff] }
  0x18   : > { %868 = vmatprep.mubr.msk.f32.mxu1 %vm235_vm0, %v221_v12  ;;  %v213_v27 = vld [vmem:[%s955_s25 + $0x60] sm:$0xff]  ;;  %v214_v29 = vld [vmem:[%s955_s25 + $0x68] sm:$0xff]  ;;  %v215_v31 = vld [vmem:[%s955_s25 + $0x70] sm:$0xff] }
  0x19   : > { %v229_v28 = vld [vmem:[%s955_s25 + $0xe0] sm:$0xff]  ;;  %v230_v30 = vld [vmem:[%s955_s25 + $0xe8] sm:$0xff]  ;;  %v231_v32 = vld [vmem:[%s955_s25 + $0xf0] sm:$0xff] }
  0x1a   : > { %845 = vmatmul.mubr.msk.f32.gmra.mrb[4].mxu0 %vm235_vm0, %v206_v13  ;;  %v216_v33 = vld [vmem:[%s955_s25 + $0x78] sm:$0xff] }
  0x1b   : > { %869 = vmatmul.mubr.msk.f32.gmra.mrb[4].mxu1 %vm235_vm0, %v222_v14  ;;  %847 = vmatprep.mubr.msk.f32.mxu0 %vm235_vm0, %v207_v15  ;;  %v232_v34 = vld [vmem:[%s955_s25 + $0xf8] sm:$0xff] }
  0x1c   : > { %871 = vmatprep.mubr.msk.f32.mxu1 %vm235_vm0, %v223_v16 }
  0x1e   : > { %848 = vmatmul.mubr.msk.f32.gmra.mrb[6].mxu0 %vm235_vm0, %v208_v17 }
  0x1f   : > { %872 = vmatmul.mubr.msk.f32.gmra.mrb[6].mxu1 %vm235_vm0, %v224_v18  ;;  %850 = vmatprep.mubr.msk.f32.mxu0 %vm235_vm0, %v209_v19 }
  0x20   : > { %874 = vmatprep.mubr.msk.f32.mxu1 %vm235_vm0, %v225_v20 }
  0x22   : > { %851 = vmatmul.mubr.msk.f32.gmra.mrb[8].mxu0 %vm235_vm0, %v210_v21 }
  0x23   : > { %875 = vmatmul.mubr.msk.f32.gmra.mrb[8].mxu1 %vm235_vm0, %v226_v22  ;;  %853 = vmatprep.mubr.msk.f32.mxu0 %vm235_vm0, %v211_v23 }
  0x24   : > { %877 = vmatprep.mubr.msk.f32.mxu1 %vm235_vm0, %v227_v24 }
  0x26   : > { %854 = vmatmul.mubr.msk.f32.gmra.mrb[10].mxu0 %vm235_vm0, %v212_v25 }
  0x27   : > { %878 = vmatmul.mubr.msk.f32.gmra.mrb[10].mxu1 %vm235_vm0, %v228_v26  ;;  %856 = vmatprep.mubr.msk.f32.mxu0 %vm235_vm0, %v213_v27 }
  0x28   : > { %880 = vmatprep.mubr.msk.f32.mxu1 %vm235_vm0, %v229_v28 }
  0x2a   : > { %857 = vmatmul.mubr.msk.f32.gmra.mrb[12].mxu0 %vm235_vm0, %v214_v29 }
  0x2b   : > { %881 = vmatmul.mubr.msk.f32.gmra.mrb[12].mxu1 %vm235_vm0, %v230_v30  ;;  %859 = vmatprep.mubr.msk.f32.mxu0 %vm235_vm0, %v215_v31 }
  0x2c   : > { %883 = vmatprep.mubr.msk.f32.mxu1 %vm235_vm0, %v231_v32 }
  0x2e   : > { %860 = vmatmul.mubr.msk.f32.gmra.mrb[14].mxu0 %vm235_vm0, %v216_v33 }
  0x2f   : > { %884 = vmatmul.mubr.msk.f32.gmra.mrb[14].mxu1 %vm235_vm0, %v232_v34 }
  0xe5   : > { %v840_v36 = vpop.f32.mrb[0].mxu0 }
  0xe6   : > { %v864_v38 = vpop.f32.mrb[0].mxu1  ;;  %v565_v39 = vmul.f32 %v840_v36, %v1024_v35  ;;  %v398_v41 = vpop.f32.mrb[1].mxu0 }
  0xe7   : > { %v581_v40 = vmul.f32 %v864_v38, %v1024_v35  ;;  %v478_v42 = vpop.f32.mrb[1].mxu1  ;;  %v564_v43 = vmul.f32 %v1024_v35, %v398_v41 }
  0xe8   : > { %v580_v44 = vmul.f32 %v1024_v35, %v478_v42  ;;  %v604_v45 = vadd.f32 %v1029_v37, %v565_v39 }
  0xe9   : > { %v620_v46 = vadd.f32 %v1029_v37, %v581_v40  ;;  %v603_v47 = vadd.f32 %v1029_v37, %v564_v43  ;;  %v843_v49 = vpop.f32.mrb[2].mxu0 }
  0xea   : > { %v619_v48 = vadd.f32 %v1029_v37, %v580_v44  ;;  %v867_v50 = vpop.f32.mrb[2].mxu1  ;;  %v636_v51 = vmax.f32 %v604_v45, 0.0  ;;  %v567_v53 = vmul.f32 %v843_v49, %v1024_v35  ;;  %v408_v55 = vpop.f32.mrb[3].mxu0 }
  0xeb   : > { %v652_v52 = vmax.f32 %v620_v46, 0.0  ;;  %v583_v54 = vmul.f32 %v867_v50, %v1024_v35  ;;  %v488_v56 = vpop.f32.mrb[3].mxu1  ;;  %v635_v57 = vmax.f32 %v603_v47, 0.0  ;;  %v566_v59 = vmul.f32 %v1024_v35, %v408_v55 }
  0xec   : > { %v651_v58 = vmax.f32 %v619_v48, 0.0  ;;  %v582_v60 = vmul.f32 %v1024_v35, %v488_v56  ;;  %668 = vst.msk [vmem:[%s1042_s6 + $0x8] sm:$0xff] %vm235_vm0, %v636_v51  ;;  %v606_v61 = vadd.f32 %v1029_v37, %v567_v53 }
  0xed   : > { %684 = vst.msk [vmem:[%s1042_s6 + $0x88] sm:$0xff] %vm235_vm0, %v652_v52  ;;  %v622_v62 = vadd.f32 %v1029_v37, %v583_v54  ;;  %667 = vst.msk [vmem:[%s1042_s6] sm:$0xff] %vm235_vm0, %v635_v57  ;;  %v605_v63 = vadd.f32 %v1029_v37, %v566_v59  ;;  %v846_v1 = vpop.f32.mrb[4].mxu0 }
  0xee   : > { %683 = vst.msk [vmem:[%s1042_s6 + $0x80] sm:$0xff] %vm235_vm0, %v651_v58  ;;  %v621_v0 = vadd.f32 %v1029_v37, %v582_v60  ;;  %v870_v2 = vpop.f32.mrb[4].mxu1  ;;  %v638_v3 = vmax.f32 %v606_v61, 0.0  ;;  %v569_v5 = vmul.f32 %v846_v1, %v1024_v35  ;;  %v418_v7 = vpop.f32.mrb[5].mxu0 }
  0xef   : > { %v654_v4 = vmax.f32 %v622_v62, 0.0  ;;  %v585_v6 = vmul.f32 %v870_v2, %v1024_v35  ;;  %v498_v8 = vpop.f32.mrb[5].mxu1  ;;  %v637_v9 = vmax.f32 %v605_v63, 0.0  ;;  %v568_v11 = vmul.f32 %v1024_v35, %v418_v7 }
  0xf0   : > { %v653_v10 = vmax.f32 %v621_v0, 0.0  ;;  %v584_v12 = vmul.f32 %v1024_v35, %v498_v8  ;;  %670 = vst.msk [vmem:[%s1042_s6 + $0x18] sm:$0xff] %vm235_vm0, %v638_v3  ;;  %v608_v13 = vadd.f32 %v1029_v37, %v569_v5 }
  0xf1   : > { %686 = vst.msk [vmem:[%s1042_s6 + $0x98] sm:$0xff] %vm235_vm0, %v654_v4  ;;  %v624_v14 = vadd.f32 %v1029_v37, %v585_v6  ;;  %669 = vst.msk [vmem:[%s1042_s6 + $0x10] sm:$0xff] %vm235_vm0, %v637_v9  ;;  %v607_v15 = vadd.f32 %v1029_v37, %v568_v11  ;;  %v849_v17 = vpop.f32.mrb[6].mxu0 }
  0xf2   : > { %685 = vst.msk [vmem:[%s1042_s6 + $0x90] sm:$0xff] %vm235_vm0, %v653_v10  ;;  %v623_v16 = vadd.f32 %v1029_v37, %v584_v12  ;;  %v873_v18 = vpop.f32.mrb[6].mxu1  ;;  %v640_v19 = vmax.f32 %v608_v13, 0.0  ;;  %v571_v21 = vmul.f32 %v849_v17, %v1024_v35  ;;  %v428_v23 = vpop.f32.mrb[7].mxu0 }
  0xf3   : > { %v656_v20 = vmax.f32 %v624_v14, 0.0  ;;  %v587_v22 = vmul.f32 %v873_v18, %v1024_v35  ;;  %v508_v24 = vpop.f32.mrb[7].mxu1  ;;  %v639_v25 = vmax.f32 %v607_v15, 0.0  ;;  %v570_v27 = vmul.f32 %v1024_v35, %v428_v23 }
  0xf4   : > { %v655_v26 = vmax.f32 %v623_v16, 0.0  ;;  %v586_v28 = vmul.f32 %v1024_v35, %v508_v24  ;;  %672 = vst.msk [vmem:[%s1042_s6 + $0x28] sm:$0xff] %vm235_vm0, %v640_v19  ;;  %v610_v29 = vadd.f32 %v1029_v37, %v571_v21 }
  0xf5   : > { %688 = vst.msk [vmem:[%s1042_s6 + $0xa8] sm:$0xff] %vm235_vm0, %v656_v20  ;;  %v626_v30 = vadd.f32 %v1029_v37, %v587_v22  ;;  %671 = vst.msk [vmem:[%s1042_s6 + $0x20] sm:$0xff] %vm235_vm0, %v639_v25  ;;  %v609_v31 = vadd.f32 %v1029_v37, %v570_v27  ;;  %v852_v33 = vpop.f32.mrb[8].mxu0 }
  0xf6   : > { %687 = vst.msk [vmem:[%s1042_s6 + $0xa0] sm:$0xff] %vm235_vm0, %v655_v26  ;;  %v625_v32 = vadd.f32 %v1029_v37, %v586_v28  ;;  %v876_v34 = vpop.f32.mrb[8].mxu1  ;;  %v642_v36 = vmax.f32 %v610_v29, 0.0  ;;  %v573_v39 = vmul.f32 %v852_v33, %v1024_v35  ;;  %v438_v41 = vpop.f32.mrb[9].mxu0 }
  0xf7   : > { %v658_v38 = vmax.f32 %v626_v30, 0.0  ;;  %v589_v40 = vmul.f32 %v876_v34, %v1024_v35  ;;  %v518_v42 = vpop.f32.mrb[9].mxu1  ;;  %v641_v43 = vmax.f32 %v609_v31, 0.0  ;;  %v572_v45 = vmul.f32 %v1024_v35, %v438_v41 }
  0xf8   : > { %v657_v44 = vmax.f32 %v625_v32, 0.0  ;;  %v588_v46 = vmul.f32 %v1024_v35, %v518_v42  ;;  %674 = vst.msk [vmem:[%s1042_s6 + $0x38] sm:$0xff] %vm235_vm0, %v642_v36  ;;  %v612_v47 = vadd.f32 %v1029_v37, %v573_v39 }
  0xf9   : > { %690 = vst.msk [vmem:[%s1042_s6 + $0xb8] sm:$0xff] %vm235_vm0, %v658_v38  ;;  %v628_v48 = vadd.f32 %v1029_v37, %v589_v40  ;;  %673 = vst.msk [vmem:[%s1042_s6 + $0x30] sm:$0xff] %vm235_vm0, %v641_v43  ;;  %v611_v49 = vadd.f32 %v1029_v37, %v572_v45  ;;  %v855_v51 = vpop.f32.mrb[10].mxu0 }
  0xfa   : > { %689 = vst.msk [vmem:[%s1042_s6 + $0xb0] sm:$0xff] %vm235_vm0, %v657_v44  ;;  %v627_v50 = vadd.f32 %v1029_v37, %v588_v46  ;;  %v879_v52 = vpop.f32.mrb[10].mxu1  ;;  %v644_v53 = vmax.f32 %v612_v47, 0.0  ;;  %v575_v55 = vmul.f32 %v855_v51, %v1024_v35  ;;  %v448_v57 = vpop.f32.mrb[11].mxu0 }
  0xfb   : > { %v660_v54 = vmax.f32 %v628_v48, 0.0  ;;  %v591_v56 = vmul.f32 %v879_v52, %v1024_v35  ;;  %v528_v58 = vpop.f32.mrb[11].mxu1  ;;  %v643_v59 = vmax.f32 %v611_v49, 0.0  ;;  %v574_v61 = vmul.f32 %v1024_v35, %v448_v57 }
  0xfc   : > { %v659_v60 = vmax.f32 %v627_v50, 0.0  ;;  %v590_v62 = vmul.f32 %v1024_v35, %v528_v58  ;;  %676 = vst.msk [vmem:[%s1042_s6 + $0x48] sm:$0xff] %vm235_vm0, %v644_v53  ;;  %v614_v63 = vadd.f32 %v1029_v37, %v575_v55 }
  0xfd   : > { %692 = vst.msk [vmem:[%s1042_s6 + $0xc8] sm:$0xff] %vm235_vm0, %v660_v54  ;;  %v630_v0 = vadd.f32 %v1029_v37, %v591_v56  ;;  %675 = vst.msk [vmem:[%s1042_s6 + $0x40] sm:$0xff] %vm235_vm0, %v643_v59  ;;  %v613_v1 = vadd.f32 %v1029_v37, %v574_v61  ;;  %v858_v3 = vpop.f32.mrb[12].mxu0 }
  0xfe   : > { %691 = vst.msk [vmem:[%s1042_s6 + $0xc0] sm:$0xff] %vm235_vm0, %v659_v60  ;;  %v629_v2 = vadd.f32 %v1029_v37, %v590_v62  ;;  %v882_v4 = vpop.f32.mrb[12].mxu1  ;;  %v646_v5 = vmax.f32 %v614_v63, 0.0  ;;  %v577_v7 = vmul.f32 %v858_v3, %v1024_v35  ;;  %v458_v9 = vpop.f32.mrb[13].mxu0 }
  0xff   : > { %v662_v6 = vmax.f32 %v630_v0, 0.0  ;;  %v593_v8 = vmul.f32 %v882_v4, %v1024_v35  ;;  %v538_v10 = vpop.f32.mrb[13].mxu1  ;;  %v645_v11 = vmax.f32 %v613_v1, 0.0  ;;  %v576_v13 = vmul.f32 %v1024_v35, %v458_v9 }
 0x100   : > { %v661_v12 = vmax.f32 %v629_v2, 0.0  ;;  %v592_v14 = vmul.f32 %v1024_v35, %v538_v10  ;;  %678 = vst.msk [vmem:[%s1042_s6 + $0x58] sm:$0xff] %vm235_vm0, %v646_v5  ;;  %v616_v15 = vadd.f32 %v1029_v37, %v577_v7 }
 0x101   : > { %694 = vst.msk [vmem:[%s1042_s6 + $0xd8] sm:$0xff] %vm235_vm0, %v662_v6  ;;  %v632_v16 = vadd.f32 %v1029_v37, %v593_v8  ;;  %677 = vst.msk [vmem:[%s1042_s6 + $0x50] sm:$0xff] %vm235_vm0, %v645_v11  ;;  %v615_v17 = vadd.f32 %v1029_v37, %v576_v13  ;;  %v861_v19 = vpop.f32.mrb[14].mxu0 }
 0x102   : > { %693 = vst.msk [vmem:[%s1042_s6 + $0xd0] sm:$0xff] %vm235_vm0, %v661_v12  ;;  %v631_v18 = vadd.f32 %v1029_v37, %v592_v14  ;;  %v885_v20 = vpop.f32.mrb[14].mxu1  ;;  %v648_v21 = vmax.f32 %v616_v15, 0.0  ;;  %v579_v23 = vmul.f32 %v861_v19, %v1024_v35  ;;  %v468_v25 = vpop.f32.mrb[15].mxu0 }
 0x103   : > { %v664_v22 = vmax.f32 %v632_v16, 0.0  ;;  %v595_v24 = vmul.f32 %v885_v20, %v1024_v35  ;;  %v548_v26 = vpop.f32.mrb[15].mxu1  ;;  %v647_v27 = vmax.f32 %v615_v17, 0.0  ;;  %v578_v29 = vmul.f32 %v1024_v35, %v468_v25 }
 0x104   : > { %v663_v28 = vmax.f32 %v631_v18, 0.0  ;;  %v594_v30 = vmul.f32 %v1024_v35, %v548_v26  ;;  %680 = vst.msk [vmem:[%s1042_s6 + $0x68] sm:$0xff] %vm235_vm0, %v648_v21  ;;  %v618_v31 = vadd.f32 %v1029_v37, %v579_v23 }
 0x105   : > { %696 = vst.msk [vmem:[%s1042_s6 + $0xe8] sm:$0xff] %vm235_vm0, %v664_v22  ;;  %v634_v32 = vadd.f32 %v1029_v37, %v595_v24  ;;  %679 = vst.msk [vmem:[%s1042_s6 + $0x60] sm:$0xff] %vm235_vm0, %v647_v27  ;;  %v617_v33 = vadd.f32 %v1029_v37, %v578_v29 }
 0x106   : > { %695 = vst.msk [vmem:[%s1042_s6 + $0xe0] sm:$0xff] %vm235_vm0, %v663_v28  ;;  %v633_v34 = vadd.f32 %v1029_v37, %v594_v30  ;;  %v650_v36 = vmax.f32 %v618_v31, 0.0 }
 0x107   : > { %v666_v38 = vmax.f32 %v634_v32, 0.0  ;;  %v649_v35 = vmax.f32 %v617_v33, 0.0 }
 0x108   : > { %v665_v39 = vmax.f32 %v633_v34, 0.0  ;;  %682 = vst.msk [vmem:[%s1042_s6 + $0x78] sm:$0xff] %vm235_vm0, %v650_v36 }
 0x109   : > { %698 = vst.msk [vmem:[%s1042_s6 + $0xf8] sm:$0xff] %vm235_vm0, %v666_v38  ;;  %681 = vst.msk [vmem:[%s1042_s6 + $0x70] sm:$0xff] %vm235_vm0, %v649_v35 }
 0x10a   : > { %697 = vst.msk [vmem:[%s1042_s6 + $0xf0] sm:$0xff] %vm235_vm0, %v665_v39 }
 0x10b PF: > { %s14_s15 = sadd.s32 1, %s906_s15  }
 0x10c   : > { %p11_p4 = scmp.ge.s32.totalorder %s14_s15, 4  }
 0x10e   :  { %13 = sbr.rel (!%p11_p4) target bundleno = 1 (0x1), region = 66 }

// kernel: bottleneck_forward.5
= control target key start
LH: loop header
LB: loop body
LE: loop exit
PB: predicated region body
PF: predicated region fallthrough
CT: control target
= control target key end

     0   :  { %13 = vsyncpa [#allocation3], 0  ;;  %s2265_s0 = inlined_call_operand.vmem [shape: f32[512,16], index: 0, kind: input, shape index: {}]   ;;  %s2266_s1 = inlined_call_operand.vmem [shape: f32[16,32], index: 1, kind: input, shape index: {}]   ;;  %s2267_s2 = inlined_call_operand.vmem [shape: f32[1,32], index: 2, kind: input, shape index: {}]   ;;  %s2268_s3 = inlined_call_operand.vmem [shape: f32[1,32], index: 3, kind: input, shape index: {}]   ;;  %s2269_s4 = inlined_call_operand.vmem [shape: f32[512,16], index: 4, kind: input, shape index: {}]   ;;  %s2270_s5 = inlined_call_operand.vmem [shape: f32[16,32], index: 5, kind: input, shape index: {}]   ;;  %s2271_s6 = inlined_call_operand.vmem [shape: f32[1,32], index: 6, kind: input, shape index: {}]   ;;  %s2272_s7 = inlined_call_operand.vmem [shape: f32[1,32], index: 7, kind: input, shape index: {}]   ;;  %s2273_s8 = inlined_call_operand.hbm [shape: f32[512,32], index: 8, kind: output, shape index: {}]  }
   0x1   :  { %15 = vsyncpa [#allocation3 + $0x1], 0  ;;  %s1797_s27 = smov 0   ;;  %s1799_s28 = smov 0  }
   0x2   :  { %s1801_s29 = smov 0   ;;  %s1803_s30 = smov 0  }
   0x3 LB: > { %s1818_s9 = sadd.s32 4294967295, %s1747_s30   ;;  %s1381_s10 = sadd.s32 4294967294, %s1747_s30   ;;  %s1747_s30 = sphi %s1803_s30, %s2279_s30   ;;  %s1743_s29 = sphi %s1801_s29, %s2278_s29   ;;  %s1739_s28 = sphi %s1799_s28, %s2277_s28   ;;  %s1735_s27 = sphi %s1797_s27, %s2276_s27  }
   0x4   : > { %s1822_s11 = sadd.s32 1, %s1747_s30   ;;  %s206_s12 = sadd.s32 1, %s1743_s29 }
   0x5   : > { %s203_s13 = ssub.s32 %s1747_s30, %s1822_s11  ;;  %p216_p0 = scmp.ne.s32.totalorder %s1743_s29, %s1739_s28 }
   0x6   : > { %p204_p1 = scmp.eq.s32.totalorder %s203_s13, 0  ;;  %p217_p2 = scmp.eq.s32.totalorder %s1818_s9, 1 }
   0x7   : > { %p222_p3 = scmp.ne.s32.totalorder %s1739_s28, %s1735_s27  ;;  %p223_p4 = scmp.eq.s32.totalorder %s1381_s10, 1 }
   0x8   : > { %s1833_s14 = scalar_select %p204_p1, %s1743_s29, %s206_s12  }
   0x9   : > { %p1835_p5 = por %p217_p2, %p216_p0  ;;  %p1839_p6 = por %p223_p4, %p222_p3 }
   0xa   : > { %p1384_p7 = scmp.ge.s32.totalorder %s1747_s30, 1  ;;  %p277_p8 = scmp.lt.s32.totalorder %s1747_s30, 3 }
   0xc   : > { %p278_p9 = pnand %p1384_p7, %p277_p8 }
   0xd   : > { %v361_v0 = vld [vmem:[%s2266_s1] sm:$0xff] (!%p278_p9)  ;;  %v362_v1 = vld [vmem:[%s2266_s1 + $0x8] sm:$0xff] (!%p278_p9)  ;;  %s1386_s23 = sshll.u32 (!%p278_p9), %s1818_s9, 5  ;;  %vm363_vm0 = vcmask (!%p278_p9), 130048   ;;  %vm1260_vm1 = vcmask (!%p278_p9), 261120   ;;  %s1463_s18 = sshll.u32 (!%p278_p9), %s1818_s9, 12 }
   0xe   : > { %281 = sbr.rel (%p278_p9) target bundleno = 323 (0x143), region = 52  ;;  %v795_v2 = vld [vmem:[%s2270_s5] sm:$0xff] (!%p278_p9)  ;;  %v1636_v3 = vpack.c.bf16 (!%p278_p9), %v362_v1, %v361_v0  ;;  %v796_v4 = vld [vmem:[%s2270_s5 + $0x8] sm:$0xff] (!%p278_p9)  ;;  %p317_p10 = scmp.lt.s32.totalorder (!%p278_p9), %s1386_s23, 63 }
   0xf   : > { %v1640_v5 = vpack.c.bf16 (!%p278_p9), %v796_v4, %v795_v2  ;;  %s2214_s22 = scalar_lea.hbm (!%p278_p9), %s2273_s8, %s1463_s18  ;;  %s1749_s24 = smov (!%p278_p9), [#allocation2]  }
  0x10   : > { %1637 = vmatprep.subr.bf16.mxu0 (!%p278_p9), %v1636_v3  ;;  %s1689_s25 = sshll.u32 (!%p278_p9), %s1749_s24, 4  ;;  %s1690_s25 = int_to_ptr.vmem [resolvable:$false] %s1689_s25 }
  0x11   : > { %1641 = vmatprep.subr.bf16.mxu1 (!%p278_p9), %v1640_v5  ;;  %1639 = vmatpush3.bf16.msra.mxu0 (!%p278_p9), %v1636_v3  ;;  %s1691_s10 = scalar_lea.vmem (!%p278_p9), %s1690_s25, 8192 }
  0x12   : > { %1643 = vmatpush3.bf16.msra.mxu1 (!%p278_p9), %v1640_v5 }
  0x15   : > { %s2281_s23 = smov (!%p317_p10, %s1386_s23), 63 }
  0x16   : > { %s1387_s26 = sshll.u32 %s2281_s23, 3 }
  0x17   : > { %s1861_s13 = scalar_lea.vmem %s2265_s0, %s1387_s26  ;;  %s1866_s19 = scalar_lea.vmem %s2269_s4, %s1387_s26 }
  0x18   : > { %v329_v6 = vld [vmem:[%s1861_s13] sm:$0xff]  ;;  %v330_v8 = vld [vmem:[%s1861_s13 + $0x8] sm:$0xff]  ;;  %v331_v10 = vld [vmem:[%s1861_s13 + $0x10] sm:$0xff]  ;;  %s313_s26 = sand.u32 1, %s1739_s28  }
  0x19   : > { %v763_v7 = vld [vmem:[%s1866_s19] sm:$0xff]  ;;  %1536 = vmatprep.mubr.msk.f32.mxu0 %vm363_vm0, %v329_v6  ;;  %v764_v9 = vld [vmem:[%s1866_s19 + $0x8] sm:$0xff]  ;;  %v765_v11 = vld [vmem:[%s1866_s19 + $0x10] sm:$0xff]  ;;  %s2224_s9 = scalar_lea.sflag [#allocation3], %s313_s26 }
  0x1a   : > { %1588 = vmatprep.mubr.msk.f32.mxu1 %vm363_vm0, %v763_v7  ;;  %1537 = vmatmul.mubr.msk.f32.vlgmr.msra.gmra.mrb[0].mxu0 %vm363_vm0, %v330_v8  ;;  %v332_v12 = vld [vmem:[%s1861_s13 + $0x18] sm:$0xff]  ;;  %v333_v14 = vld [vmem:[%s1861_s13 + $0x20] sm:$0xff]  ;;  %v334_v16 = vld [vmem:[%s1861_s13 + $0x28] sm:$0xff] }
  0x1b   : > { %1589 = vmatmul.mubr.msk.f32.vlgmr.msra.gmra.mrb[0].mxu1 %vm363_vm0, %v764_v9  ;;  %1539 = vmatprep.mubr.msk.f32.mxu0 %vm363_vm0, %v331_v10  ;;  %v766_v13 = vld [vmem:[%s1866_s19 + $0x18] sm:$0xff]  ;;  %v767_v15 = vld [vmem:[%s1866_s19 + $0x20] sm:$0xff]  ;;  %v768_v17 = vld [vmem:[%s1866_s19 + $0x28] sm:$0xff] }
  0x1c   : > { %1591 = vmatprep.mubr.msk.f32.mxu1 %vm363_vm0, %v765_v11  ;;  %v335_v18 = vld [vmem:[%s1861_s13 + $0x30] sm:$0xff]  ;;  %v336_v20 = vld [vmem:[%s1861_s13 + $0x38] sm:$0xff]  ;;  %v337_v22 = vld [vmem:[%s1861_s13 + $0x40] sm:$0xff] }
  0x1d   : > { %v769_v19 = vld [vmem:[%s1866_s19 + $0x30] sm:$0xff]  ;;  %v770_v21 = vld [vmem:[%s1866_s19 + $0x38] sm:$0xff]  ;;  %v771_v23 = vld [vmem:[%s1866_s19 + $0x40] sm:$0xff] }
  0x1e   : > { %1540 = vmatmul.mubr.msk.f32.gmra.mrb[2].mxu0 %vm363_vm0, %v332_v12  ;;  %v338_v24 = vld [vmem:[%s1861_s13 + $0x48] sm:$0xff]  ;;  %v339_v26 = vld [vmem:[%s1861_s13 + $0x50] sm:$0xff]  ;;  %v340_v28 = vld [vmem:[%s1861_s13 + $0x58] sm:$0xff] }
  0x1f   : > { %1592 = vmatmul.mubr.msk.f32.gmra.mrb[2].mxu1 %vm363_vm0, %v766_v13  ;;  %1542 = vmatprep.mubr.msk.f32.mxu0 %vm363_vm0, %v333_v14  ;;  %v772_v25 = vld [vmem:[%s1866_s19 + $0x48] sm:$0xff]  ;;  %v773_v27 = vld [vmem:[%s1866_s19 + $0x50] sm:$0xff]  ;;  %v774_v29 = vld [vmem:[%s1866_s19 + $0x58] sm:$0xff] }
  0x20   : > { %1594 = vmatprep.mubr.msk.f32.mxu1 %vm363_vm0, %v767_v15  ;;  %v341_v30 = vld [vmem:[%s1861_s13 + $0x60] sm:$0xff]  ;;  %v342_v32 = vld [vmem:[%s1861_s13 + $0x68] sm:$0xff]  ;;  %v343_v34 = vld [vmem:[%s1861_s13 + $0x70] sm:$0xff] }
  0x21   : > { %v775_v31 = vld [vmem:[%s1866_s19 + $0x60] sm:$0xff]  ;;  %v776_v33 = vld [vmem:[%s1866_s19 + $0x68] sm:$0xff]  ;;  %v777_v35 = vld [vmem:[%s1866_s19 + $0x70] sm:$0xff] }
  0x22   : > { %1543 = vmatmul.mubr.msk.f32.gmra.mrb[4].mxu0 %vm363_vm0, %v334_v16  ;;  %v344_v36 = vld [vmem:[%s1861_s13 + $0x78] sm:$0xff]  ;;  %v345_v38 = vld [vmem:[%s1861_s13 + $0x80] sm:$0xff]  ;;  %v346_v40 = vld [vmem:[%s1861_s13 + $0x88] sm:$0xff] }
  0x23   : > { %1595 = vmatmul.mubr.msk.f32.gmra.mrb[4].mxu1 %vm363_vm0, %v768_v17  ;;  %1545 = vmatprep.mubr.msk.f32.mxu0 %vm363_vm0, %v335_v18  ;;  %v778_v37 = vld [vmem:[%s1866_s19 + $0x78] sm:$0xff]  ;;  %v779_v39 = vld [vmem:[%s1866_s19 + $0x80] sm:$0xff]  ;;  %v780_v41 = vld [vmem:[%s1866_s19 + $0x88] sm:$0xff] }
  0x24   : > { %1597 = vmatprep.mubr.msk.f32.mxu1 %vm363_vm0, %v769_v19  ;;  %v347_v42 = vld [vmem:[%s1861_s13 + $0x90] sm:$0xff]  ;;  %v348_v44 = vld [vmem:[%s1861_s13 + $0x98] sm:$0xff]  ;;  %v349_v46 = vld [vmem:[%s1861_s13 + $0xa0] sm:$0xff] }
  0x25   : > { %v781_v43 = vld [vmem:[%s1866_s19 + $0x90] sm:$0xff]  ;;  %v782_v45 = vld [vmem:[%s1866_s19 + $0x98] sm:$0xff]  ;;  %v783_v47 = vld [vmem:[%s1866_s19 + $0xa0] sm:$0xff] }
  0x26   : > { %1546 = vmatmul.mubr.msk.f32.gmra.mrb[6].mxu0 %vm363_vm0, %v336_v20  ;;  %v350_v48 = vld [vmem:[%s1861_s13 + $0xa8] sm:$0xff]  ;;  %v351_v50 = vld [vmem:[%s1861_s13 + $0xb0] sm:$0xff]  ;;  %v352_v52 = vld [vmem:[%s1861_s13 + $0xb8] sm:$0xff] }
  0x27   : > { %1598 = vmatmul.mubr.msk.f32.gmra.mrb[6].mxu1 %vm363_vm0, %v770_v21  ;;  %1548 = vmatprep.mubr.msk.f32.mxu0 %vm363_vm0, %v337_v22  ;;  %v784_v49 = vld [vmem:[%s1866_s19 + $0xa8] sm:$0xff]  ;;  %v785_v51 = vld [vmem:[%s1866_s19 + $0xb0] sm:$0xff]  ;;  %v786_v53 = vld [vmem:[%s1866_s19 + $0xb8] sm:$0xff] }
  0x28   : > { %1600 = vmatprep.mubr.msk.f32.mxu1 %vm363_vm0, %v771_v23  ;;  %v353_v54 = vld [vmem:[%s1861_s13 + $0xc0] sm:$0xff]  ;;  %v354_v56 = vld [vmem:[%s1861_s13 + $0xc8] sm:$0xff]  ;;  %v355_v58 = vld [vmem:[%s1861_s13 + $0xd0] sm:$0xff] }
  0x29   : > { %v787_v55 = vld [vmem:[%s1866_s19 + $0xc0] sm:$0xff]  ;;  %v788_v57 = vld [vmem:[%s1866_s19 + $0xc8] sm:$0xff]  ;;  %v789_v59 = vld [vmem:[%s1866_s19 + $0xd0] sm:$0xff] }
  0x2a   : > { %1549 = vmatmul.mubr.msk.f32.gmra.mrb[8].mxu0 %vm363_vm0, %v338_v24  ;;  %v356_v60 = vld [vmem:[%s1861_s13 + $0xd8] sm:$0xff]  ;;  %v357_v62 = vld [vmem:[%s1861_s13 + $0xe0] sm:$0xff]  ;;  %v358_v0 = vld [vmem:[%s1861_s13 + $0xe8] sm:$0xff] }
  0x2b   : > { %1601 = vmatmul.mubr.msk.f32.gmra.mrb[8].mxu1 %vm363_vm0, %v772_v25  ;;  %1551 = vmatprep.mubr.msk.f32.mxu0 %vm363_vm0, %v339_v26  ;;  %v790_v61 = vld [vmem:[%s1866_s19 + $0xd8] sm:$0xff]  ;;  %v791_v63 = vld [vmem:[%s1866_s19 + $0xe0] sm:$0xff]  ;;  %v792_v1 = vld [vmem:[%s1866_s19 + $0xe8] sm:$0xff] }
  0x2c   : > { %1603 = vmatprep.mubr.msk.f32.mxu1 %vm363_vm0, %v773_v27  ;;  %v359_v2 = vld [vmem:[%s1861_s13 + $0xf0] sm:$0xff]  ;;  %v360_v4 = vld [vmem:[%s1861_s13 + $0xf8] sm:$0xff]  ;;  %v1999_v6 = vld [vmem:[%s2267_s2] ss:$0 sm:$0xff]  ;;  %s1385_s13 = sshll.u32 %s313_s26, 8 }
  0x2d   : > { %v793_v3 = vld [vmem:[%s1866_s19 + $0xf0] sm:$0xff]  ;;  %v794_v5 = vld [vmem:[%s1866_s19 + $0xf8] sm:$0xff]  ;;  %v2004_v7 = vld [vmem:[%s2271_s6] ss:$0 sm:$0xff]  ;;  %s2035_s17 = scalar_lea.vmem [#allocation2], %s1385_s13 }
  0x2e   : > { %1552 = vmatmul.mubr.msk.f32.gmra.mrb[10].mxu0 %vm363_vm0, %v340_v28  ;;  %v2009_v8 = vld [vmem:[%s2268_s3] ss:$0 sm:$0xff]  ;;  %s1307_s19 = sshll.u32 %s2035_s17, 4  ;;  %s2216_s19 = int_to_ptr.vmem [resolvable:$true] %s1307_s19 }
  0x2f   : > { %1604 = vmatmul.mubr.msk.f32.gmra.mrb[10].mxu1 %vm363_vm0, %v774_v29  ;;  %1554 = vmatprep.mubr.msk.f32.mxu0 %vm363_vm0, %v341_v30  ;;  %v2015_v11 = vld [vmem:[%s2272_s7] ss:$0 sm:$0xff]  ;;  %s1685_s23 = scalar_lea.vmem %s2216_s19, 4096  ;;  %p1692_p0 = scmp.lt.s32.totalorder %s2216_s19, %s1690_s25 }
  0x30   : > { %1606 = vmatprep.mubr.msk.f32.mxu1 %vm363_vm0, %v775_v31  ;;  %p1686_p11 = scmp.ne.s32.totalorder %s2216_s19, %s1685_s23  ;;  %p1693_p1 = scmp.lt.s32.totalorder %s1691_s10, %s1685_s23 }
  0x32   : > { %1555 = vmatmul.mubr.msk.f32.gmra.mrb[12].mxu0 %vm363_vm0, %v342_v32  ;;  %p1687_p12 = pnand %p1686_p11, %p1835_p5  ;;  %p1694_p2 = por %p1693_p1, %p1692_p0 }
  0x33   : > { %1607 = vmatmul.mubr.msk.f32.gmra.mrb[12].mxu1 %vm363_vm0, %v776_v33  ;;  %1557 = vmatprep.mubr.msk.f32.mxu0 %vm363_vm0, %v343_v34 }
  0x34   : > { %1609 = vmatprep.mubr.msk.f32.mxu1 %vm363_vm0, %v777_v35  ;;  %p1688_p13 = pneg %p1687_p12 }
  0x36   : > { %1558 = vmatmul.mubr.msk.f32.gmra.mrb[14].mxu0 %vm363_vm0, %v344_v36  ;;  %p1695_p3 = pnand %p1694_p2, %p1688_p13 }
  0x37   : > { %1610 = vmatmul.mubr.msk.f32.gmra.mrb[14].mxu1 %vm363_vm0, %v778_v37  ;;  %1560 = vmatprep.mubr.msk.f32.mxu0 %vm363_vm0, %v345_v38 }
  0x38   : > { %1612 = vmatprep.mubr.msk.f32.mxu1 %vm363_vm0, %v779_v39 }
  0x3a   : > { %1561 = vmatmul.mubr.msk.f32.gmra.mrb[16].mxu0 %vm363_vm0, %v346_v40 }
  0x3b   : > { %1613 = vmatmul.mubr.msk.f32.gmra.mrb[16].mxu1 %vm363_vm0, %v780_v41  ;;  %1563 = vmatprep.mubr.msk.f32.mxu0 %vm363_vm0, %v347_v42 }
  0x3c   : > { %1615 = vmatprep.mubr.msk.f32.mxu1 %vm363_vm0, %v781_v43 }
  0x3e   : > { %1564 = vmatmul.mubr.msk.f32.gmra.mrb[18].mxu0 %vm363_vm0, %v348_v44 }
  0x3f   : > { %1616 = vmatmul.mubr.msk.f32.gmra.mrb[18].mxu1 %vm363_vm0, %v782_v45  ;;  %1566 = vmatprep.mubr.msk.f32.mxu0 %vm363_vm0, %v349_v46 }
  0x40   : > { %1618 = vmatprep.mubr.msk.f32.mxu1 %vm363_vm0, %v783_v47 }
  0x42   : > { %1567 = vmatmul.mubr.msk.f32.gmra.mrb[20].mxu0 %vm363_vm0, %v350_v48 }
  0x43   : > { %1619 = vmatmul.mubr.msk.f32.gmra.mrb[20].mxu1 %vm363_vm0, %v784_v49  ;;  %1569 = vmatprep.mubr.msk.f32.mxu0 %vm363_vm0, %v351_v50 }
  0x44   : > { %1621 = vmatprep.mubr.msk.f32.mxu1 %vm363_vm0, %v785_v51 }
  0x46   : > { %1570 = vmatmul.mubr.msk.f32.gmra.mrb[22].mxu0 %vm363_vm0, %v352_v52 }
  0x47   : > { %1622 = vmatmul.mubr.msk.f32.gmra.mrb[22].mxu1 %vm363_vm0, %v786_v53  ;;  %1572 = vmatprep.mubr.msk.f32.mxu0 %vm363_vm0, %v353_v54 }
  0x48   : > { %1624 = vmatprep.mubr.msk.f32.mxu1 %vm363_vm0, %v787_v55 }
  0x4a   : > { %1573 = vmatmul.mubr.msk.f32.gmra.mrb[24].mxu0 %vm363_vm0, %v354_v56 }
  0x4b   : > { %1625 = vmatmul.mubr.msk.f32.gmra.mrb[24].mxu1 %vm363_vm0, %v788_v57  ;;  %1575 = vmatprep.mubr.msk.f32.mxu0 %vm363_vm0, %v355_v58 }
  0x4c   : > { %1627 = vmatprep.mubr.msk.f32.mxu1 %vm363_vm0, %v789_v59 }
  0x4e   : > { %1576 = vmatmul.mubr.msk.f32.gmra.mrb[26].mxu0 %vm363_vm0, %v356_v60 }
  0x4f   : > { %1628 = vmatmul.mubr.msk.f32.gmra.mrb[26].mxu1 %vm363_vm0, %v790_v61  ;;  %1578 = vmatprep.mubr.msk.f32.mxu0 %vm363_vm0, %v357_v62 }
  0x50   : > { %1630 = vmatprep.mubr.msk.f32.mxu1 %vm363_vm0, %v791_v63 }
  0x52   : > { %1579 = vmatmul.mubr.msk.f32.gmra.mrb[28].mxu0 %vm363_vm0, %v358_v0 }
  0x53   : > { %1631 = vmatmul.mubr.msk.f32.gmra.mrb[28].mxu1 %vm363_vm0, %v792_v1  ;;  %1581 = vmatprep.mubr.msk.f32.mxu0 %vm363_vm0, %v359_v2 }
  0x54   : > { %1633 = vmatprep.mubr.msk.f32.mxu1 %vm363_vm0, %v793_v3 }
  0x56   : > { %1582 = vmatmul.mubr.msk.f32.gmra.mrb[30].mxu0 %vm363_vm0, %v360_v4 }
  0x57   : > { %1634 = vmatmul.mubr.msk.f32.gmra.mrb[30].mxu1 %vm363_vm0, %v794_v5 }
  0xed   : > { %v1538_v9 = vpop.f32.mrb[0].mxu0 }
  0xee   : > { %v1590_v10 = vpop.f32.mrb[0].mxu1  ;;  %v693_v12 = vmul.f32 %v1538_v9, %v1999_v6  ;;  %v526_v14 = vpop.f32.mrb[1].mxu0 }
  0xef   : > { %v1126_v13 = vmul.f32 %v1590_v10, %v2004_v7  ;;  %v959_v15 = vpop.f32.mrb[1].mxu1  ;;  %v692_v16 = vmul.f32 %v1999_v6, %v526_v14 }
  0xf0   : > { %v1125_v17 = vmul.f32 %v2004_v7, %v959_v15  ;;  %v732_v18 = vadd.f32 %v2009_v8, %v693_v12 }
  0xf1   : > { %v1165_v19 = vadd.f32 %v2015_v11, %v1126_v13  ;;  %v731_v20 = vadd.f32 %v2009_v8, %v692_v16  ;;  %v1541_v22 = vpop.f32.mrb[2].mxu0 }
  0xf2   : > { %v1164_v21 = vadd.f32 %v2015_v11, %v1125_v17  ;;  %v1593_v23 = vpop.f32.mrb[2].mxu1  ;;  %v695_v25 = vmul.f32 %v1541_v22, %v1999_v6  ;;  %v536_v27 = vpop.f32.mrb[3].mxu0 }
  0xf3   : > { %v1197_v24 = vadd.f32 %v1165_v19, %v732_v18  ;;  %v1128_v26 = vmul.f32 %v1593_v23, %v2004_v7  ;;  %v969_v28 = vpop.f32.mrb[3].mxu1  ;;  %v694_v30 = vmul.f32 %v1999_v6, %v536_v27 }
  0xf4   : > { %v1196_v29 = vadd.f32 %v1164_v21, %v731_v20  ;;  %v1127_v31 = vmul.f32 %v2004_v7, %v969_v28  ;;  %v734_v33 = vadd.f32 %v2009_v8, %v695_v25 }
  0xf5   : > { %v1229_v32 = vmax.f32 %v1197_v24, 0.0  ;;  %v1167_v34 = vadd.f32 %v2015_v11, %v1128_v26  ;;  %v733_v36 = vadd.f32 %v2009_v8, %v694_v30  ;;  %v1544_v38 = vpop.f32.mrb[4].mxu0 }
  0xf6   : > { %v1228_v35 = vmax.f32 %v1196_v29, 0.0  ;;  %v1166_v37 = vadd.f32 %v2015_v11, %v1127_v31  ;;  %v1596_v39 = vpop.f32.mrb[4].mxu1  ;;  %v697_v41 = vmul.f32 %v1544_v38, %v1999_v6  ;;  %v546_v43 = vpop.f32.mrb[5].mxu0 }
  0xf7   : > { %1262 = vst.msk [vmem:[%s2035_s17 + $0x8] sm:$0xff] %vm1260_vm1, %v1229_v32  ;;  %v1199_v40 = vadd.f32 %v1167_v34, %v734_v33  ;;  %v1130_v42 = vmul.f32 %v1596_v39, %v2004_v7  ;;  %v979_v44 = vpop.f32.mrb[5].mxu1  ;;  %v696_v46 = vmul.f32 %v1999_v6, %v546_v43 }
  0xf8   : > { %1261 = vst.msk [vmem:[%s2035_s17] sm:$0xff] %vm1260_vm1, %v1228_v35  ;;  %v1198_v45 = vadd.f32 %v1166_v37, %v733_v36  ;;  %v1129_v47 = vmul.f32 %v2004_v7, %v979_v44  ;;  %v736_v49 = vadd.f32 %v2009_v8, %v697_v41 }
  0xf9   : > { %v1231_v48 = vmax.f32 %v1199_v40, 0.0  ;;  %v1169_v50 = vadd.f32 %v2015_v11, %v1130_v42  ;;  %v735_v52 = vadd.f32 %v2009_v8, %v696_v46  ;;  %v1547_v54 = vpop.f32.mrb[6].mxu0 }
  0xfa   : > { %v1230_v51 = vmax.f32 %v1198_v45, 0.0  ;;  %v1168_v53 = vadd.f32 %v2015_v11, %v1129_v47  ;;  %v1599_v55 = vpop.f32.mrb[6].mxu1  ;;  %v699_v57 = vmul.f32 %v1547_v54, %v1999_v6  ;;  %v556_v59 = vpop.f32.mrb[7].mxu0 }
  0xfb   : > { %1264 = vst.msk [vmem:[%s2035_s17 + $0x18] sm:$0xff] %vm1260_vm1, %v1231_v48  ;;  %v1201_v56 = vadd.f32 %v1169_v50, %v736_v49  ;;  %v1132_v58 = vmul.f32 %v1599_v55, %v2004_v7  ;;  %v989_v60 = vpop.f32.mrb[7].mxu1  ;;  %v698_v62 = vmul.f32 %v1999_v6, %v556_v59 }
  0xfc   : > { %1263 = vst.msk [vmem:[%s2035_s17 + $0x10] sm:$0xff] %vm1260_vm1, %v1230_v51  ;;  %v1200_v61 = vadd.f32 %v1168_v53, %v735_v52  ;;  %v1131_v63 = vmul.f32 %v2004_v7, %v989_v60  ;;  %v738_v1 = vadd.f32 %v2009_v8, %v699_v57 }
  0xfd   : > { %v1233_v0 = vmax.f32 %v1201_v56, 0.0  ;;  %v1171_v2 = vadd.f32 %v2015_v11, %v1132_v58  ;;  %v737_v4 = vadd.f32 %v2009_v8, %v698_v62  ;;  %v1550_v9 = vpop.f32.mrb[8].mxu0 }
  0xfe   : > { %v1232_v3 = vmax.f32 %v1200_v61, 0.0  ;;  %v1170_v5 = vadd.f32 %v2015_v11, %v1131_v63  ;;  %v1602_v10 = vpop.f32.mrb[8].mxu1  ;;  %v701_v13 = vmul.f32 %v1550_v9, %v1999_v6  ;;  %v566_v15 = vpop.f32.mrb[9].mxu0 }
  0xff   : > { %1266 = vst.msk [vmem:[%s2035_s17 + $0x28] sm:$0xff] %vm1260_vm1, %v1233_v0  ;;  %v1203_v12 = vadd.f32 %v1171_v2, %v738_v1  ;;  %v1134_v14 = vmul.f32 %v1602_v10, %v2004_v7  ;;  %v999_v16 = vpop.f32.mrb[9].mxu1  ;;  %v700_v18 = vmul.f32 %v1999_v6, %v566_v15 }
 0x100   : > { %1265 = vst.msk [vmem:[%s2035_s17 + $0x20] sm:$0xff] %vm1260_vm1, %v1232_v3  ;;  %v1202_v17 = vadd.f32 %v1170_v5, %v737_v4  ;;  %v1133_v19 = vmul.f32 %v2004_v7, %v999_v16  ;;  %v740_v21 = vadd.f32 %v2009_v8, %v701_v13 }
 0x101   : > { %v1235_v20 = vmax.f32 %v1203_v12, 0.0  ;;  %v1173_v22 = vadd.f32 %v2015_v11, %v1134_v14  ;;  %v739_v24 = vadd.f32 %v2009_v8, %v700_v18  ;;  %v1553_v26 = vpop.f32.mrb[10].mxu0 }
 0x102   : > { %v1234_v23 = vmax.f32 %v1202_v17, 0.0  ;;  %v1172_v25 = vadd.f32 %v2015_v11, %v1133_v19  ;;  %v1605_v27 = vpop.f32.mrb[10].mxu1  ;;  %v703_v29 = vmul.f32 %v1553_v26, %v1999_v6  ;;  %v576_v31 = vpop.f32.mrb[11].mxu0 }
 0x103   : > { %1268 = vst.msk [vmem:[%s2035_s17 + $0x38] sm:$0xff] %vm1260_vm1, %v1235_v20  ;;  %v1205_v28 = vadd.f32 %v1173_v22, %v740_v21  ;;  %v1136_v30 = vmul.f32 %v1605_v27, %v2004_v7  ;;  %v1009_v32 = vpop.f32.mrb[11].mxu1  ;;  %v702_v34 = vmul.f32 %v1999_v6, %v576_v31 }
 0x104   : > { %1267 = vst.msk [vmem:[%s2035_s17 + $0x30] sm:$0xff] %vm1260_vm1, %v1234_v23  ;;  %v1204_v33 = vadd.f32 %v1172_v25, %v739_v24  ;;  %v1135_v35 = vmul.f32 %v2004_v7, %v1009_v32  ;;  %v742_v37 = vadd.f32 %v2009_v8, %v703_v29 }
 0x105   : > { %v1237_v36 = vmax.f32 %v1205_v28, 0.0  ;;  %v1175_v38 = vadd.f32 %v2015_v11, %v1136_v30  ;;  %v741_v40 = vadd.f32 %v2009_v8, %v702_v34  ;;  %v1556_v42 = vpop.f32.mrb[12].mxu0 }
 0x106   : > { %v1236_v39 = vmax.f32 %v1204_v33, 0.0  ;;  %v1174_v41 = vadd.f32 %v2015_v11, %v1135_v35  ;;  %v1608_v43 = vpop.f32.mrb[12].mxu1  ;;  %v705_v45 = vmul.f32 %v1556_v42, %v1999_v6  ;;  %v586_v47 = vpop.f32.mrb[13].mxu0 }
 0x107   : > { %1270 = vst.msk [vmem:[%s2035_s17 + $0x48] sm:$0xff] %vm1260_vm1, %v1237_v36  ;;  %v1207_v44 = vadd.f32 %v1175_v38, %v742_v37  ;;  %v1138_v46 = vmul.f32 %v1608_v43, %v2004_v7  ;;  %v1019_v48 = vpop.f32.mrb[13].mxu1  ;;  %v704_v50 = vmul.f32 %v1999_v6, %v586_v47 }
 0x108   : > { %1269 = vst.msk [vmem:[%s2035_s17 + $0x40] sm:$0xff] %vm1260_vm1, %v1236_v39  ;;  %v1206_v49 = vadd.f32 %v1174_v41, %v741_v40  ;;  %v1137_v51 = vmul.f32 %v2004_v7, %v1019_v48  ;;  %v744_v53 = vadd.f32 %v2009_v8, %v705_v45 }
 0x109   : > { %v1239_v52 = vmax.f32 %v1207_v44, 0.0  ;;  %v1177_v54 = vadd.f32 %v2015_v11, %v1138_v46  ;;  %v743_v56 = vadd.f32 %v2009_v8, %v704_v50  ;;  %v1559_v58 = vpop.f32.mrb[14].mxu0 }
 0x10a   : > { %v1238_v55 = vmax.f32 %v1206_v49, 0.0  ;;  %v1176_v57 = vadd.f32 %v2015_v11, %v1137_v51  ;;  %v1611_v59 = vpop.f32.mrb[14].mxu1  ;;  %v707_v61 = vmul.f32 %v1559_v58, %v1999_v6  ;;  %v596_v63 = vpop.f32.mrb[15].mxu0 }
 0x10b   : > { %1272 = vst.msk [vmem:[%s2035_s17 + $0x58] sm:$0xff] %vm1260_vm1, %v1239_v52  ;;  %v1209_v60 = vadd.f32 %v1177_v54, %v744_v53  ;;  %v1140_v62 = vmul.f32 %v1611_v59, %v2004_v7  ;;  %v1029_v0 = vpop.f32.mrb[15].mxu1  ;;  %v706_v2 = vmul.f32 %v1999_v6, %v596_v63 }
 0x10c   : > { %1271 = vst.msk [vmem:[%s2035_s17 + $0x50] sm:$0xff] %vm1260_vm1, %v1238_v55  ;;  %v1208_v1 = vadd.f32 %v1176_v57, %v743_v56  ;;  %v1139_v3 = vmul.f32 %v2004_v7, %v1029_v0  ;;  %v746_v5 = vadd.f32 %v2009_v8, %v707_v61 }
 0x10d   : > { %v1241_v4 = vmax.f32 %v1209_v60, 0.0  ;;  %v1179_v9 = vadd.f32 %v2015_v11, %v1140_v62  ;;  %v745_v12 = vadd.f32 %v2009_v8, %v706_v2  ;;  %v1562_v14 = vpop.f32.mrb[16].mxu0 }
 0x10e   : > { %v1240_v10 = vmax.f32 %v1208_v1, 0.0  ;;  %v1178_v13 = vadd.f32 %v2015_v11, %v1139_v3  ;;  %v1614_v15 = vpop.f32.mrb[16].mxu1  ;;  %v709_v17 = vmul.f32 %v1562_v14, %v1999_v6  ;;  %v606_v19 = vpop.f32.mrb[17].mxu0 }
 0x10f   : > { %1274 = vst.msk [vmem:[%s2035_s17 + $0x68] sm:$0xff] %vm1260_vm1, %v1241_v4  ;;  %v1211_v16 = vadd.f32 %v1179_v9, %v746_v5  ;;  %v1142_v18 = vmul.f32 %v1614_v15, %v2004_v7  ;;  %v1039_v20 = vpop.f32.mrb[17].mxu1  ;;  %v708_v22 = vmul.f32 %v1999_v6, %v606_v19 }
 0x110   : > { %1273 = vst.msk [vmem:[%s2035_s17 + $0x60] sm:$0xff] %vm1260_vm1, %v1240_v10  ;;  %v1210_v21 = vadd.f32 %v1178_v13, %v745_v12  ;;  %v1141_v23 = vmul.f32 %v2004_v7, %v1039_v20  ;;  %v748_v25 = vadd.f32 %v2009_v8, %v709_v17 }
 0x111   : > { %v1243_v24 = vmax.f32 %v1211_v16, 0.0  ;;  %v1181_v26 = vadd.f32 %v2015_v11, %v1142_v18  ;;  %v747_v28 = vadd.f32 %v2009_v8, %v708_v22  ;;  %v1565_v30 = vpop.f32.mrb[18].mxu0 }
 0x112   : > { %v1242_v27 = vmax.f32 %v1210_v21, 0.0  ;;  %v1180_v29 = vadd.f32 %v2015_v11, %v1141_v23  ;;  %v1617_v31 = vpop.f32.mrb[18].mxu1  ;;  %v711_v33 = vmul.f32 %v1565_v30, %v1999_v6  ;;  %v616_v35 = vpop.f32.mrb[19].mxu0 }
 0x113   : > { %1276 = vst.msk [vmem:[%s2035_s17 + $0x78] sm:$0xff] %vm1260_vm1, %v1243_v24  ;;  %v1213_v32 = vadd.f32 %v1181_v26, %v748_v25  ;;  %v1144_v34 = vmul.f32 %v1617_v31, %v2004_v7  ;;  %v1049_v36 = vpop.f32.mrb[19].mxu1  ;;  %v710_v38 = vmul.f32 %v1999_v6, %v616_v35 }
 0x114   : > { %1275 = vst.msk [vmem:[%s2035_s17 + $0x70] sm:$0xff] %vm1260_vm1, %v1242_v27  ;;  %v1212_v37 = vadd.f32 %v1180_v29, %v747_v28  ;;  %v1143_v39 = vmul.f32 %v2004_v7, %v1049_v36  ;;  %v750_v41 = vadd.f32 %v2009_v8, %v711_v33 }
 0x115   : > { %v1245_v40 = vmax.f32 %v1213_v32, 0.0  ;;  %v1183_v42 = vadd.f32 %v2015_v11, %v1144_v34  ;;  %v749_v44 = vadd.f32 %v2009_v8, %v710_v38  ;;  %v1568_v46 = vpop.f32.mrb[20].mxu0 }
 0x116   : > { %v1244_v43 = vmax.f32 %v1212_v37, 0.0  ;;  %v1182_v45 = vadd.f32 %v2015_v11, %v1143_v39  ;;  %v1620_v47 = vpop.f32.mrb[20].mxu1  ;;  %v713_v49 = vmul.f32 %v1568_v46, %v1999_v6  ;;  %v626_v51 = vpop.f32.mrb[21].mxu0 }
 0x117   : > { %1278 = vst.msk [vmem:[%s2035_s17 + $0x88] sm:$0xff] %vm1260_vm1, %v1245_v40  ;;  %v1215_v48 = vadd.f32 %v1183_v42, %v750_v41  ;;  %v1146_v50 = vmul.f32 %v1620_v47, %v2004_v7  ;;  %v1059_v52 = vpop.f32.mrb[21].mxu1  ;;  %v712_v54 = vmul.f32 %v1999_v6, %v626_v51 }
 0x118   : > { %1277 = vst.msk [vmem:[%s2035_s17 + $0x80] sm:$0xff] %vm1260_vm1, %v1244_v43  ;;  %v1214_v53 = vadd.f32 %v1182_v45, %v749_v44  ;;  %v1145_v55 = vmul.f32 %v2004_v7, %v1059_v52  ;;  %v752_v57 = vadd.f32 %v2009_v8, %v713_v49 }
 0x119   : > { %v1247_v56 = vmax.f32 %v1215_v48, 0.0  ;;  %v1185_v58 = vadd.f32 %v2015_v11, %v1146_v50  ;;  %v751_v60 = vadd.f32 %v2009_v8, %v712_v54  ;;  %v1571_v62 = vpop.f32.mrb[22].mxu0 }
 0x11a   : > { %v1246_v59 = vmax.f32 %v1214_v53, 0.0  ;;  %v1184_v61 = vadd.f32 %v2015_v11, %v1145_v55  ;;  %v1623_v63 = vpop.f32.mrb[22].mxu1  ;;  %v715_v1 = vmul.f32 %v1571_v62, %v1999_v6  ;;  %v636_v3 = vpop.f32.mrb[23].mxu0 }
 0x11b   : > { %1280 = vst.msk [vmem:[%s2035_s17 + $0x98] sm:$0xff] %vm1260_vm1, %v1247_v56  ;;  %v1217_v0 = vadd.f32 %v1185_v58, %v752_v57  ;;  %v1148_v2 = vmul.f32 %v1623_v63, %v2004_v7  ;;  %v1069_v4 = vpop.f32.mrb[23].mxu1  ;;  %v714_v9 = vmul.f32 %v1999_v6, %v636_v3 }
 0x11c   : > { %1279 = vst.msk [vmem:[%s2035_s17 + $0x90] sm:$0xff] %vm1260_vm1, %v1246_v59  ;;  %v1216_v5 = vadd.f32 %v1184_v61, %v751_v60  ;;  %v1147_v10 = vmul.f32 %v2004_v7, %v1069_v4  ;;  %v754_v13 = vadd.f32 %v2009_v8, %v715_v1 }
 0x11d   : > { %v1249_v12 = vmax.f32 %v1217_v0, 0.0  ;;  %v1187_v14 = vadd.f32 %v2015_v11, %v1148_v2  ;;  %v753_v16 = vadd.f32 %v2009_v8, %v714_v9  ;;  %v1574_v18 = vpop.f32.mrb[24].mxu0 }
 0x11e   : > { %v1248_v15 = vmax.f32 %v1216_v5, 0.0  ;;  %v1186_v17 = vadd.f32 %v2015_v11, %v1147_v10  ;;  %v1626_v19 = vpop.f32.mrb[24].mxu1  ;;  %v717_v21 = vmul.f32 %v1574_v18, %v1999_v6  ;;  %v646_v23 = vpop.f32.mrb[25].mxu0 }
 0x11f   : > { %1282 = vst.msk [vmem:[%s2035_s17 + $0xa8] sm:$0xff] %vm1260_vm1, %v1249_v12  ;;  %v1219_v20 = vadd.f32 %v1187_v14, %v754_v13  ;;  %v1150_v22 = vmul.f32 %v1626_v19, %v2004_v7  ;;  %v1079_v24 = vpop.f32.mrb[25].mxu1  ;;  %v716_v26 = vmul.f32 %v1999_v6, %v646_v23 }
 0x120   : > { %1281 = vst.msk [vmem:[%s2035_s17 + $0xa0] sm:$0xff] %vm1260_vm1, %v1248_v15  ;;  %v1218_v25 = vadd.f32 %v1186_v17, %v753_v16  ;;  %v1149_v27 = vmul.f32 %v2004_v7, %v1079_v24  ;;  %v756_v29 = vadd.f32 %v2009_v8, %v717_v21 }
 0x121   : > { %v1251_v28 = vmax.f32 %v1219_v20, 0.0  ;;  %v1189_v30 = vadd.f32 %v2015_v11, %v1150_v22  ;;  %v755_v32 = vadd.f32 %v2009_v8, %v716_v26  ;;  %v1577_v34 = vpop.f32.mrb[26].mxu0 }
 0x122   : > { %v1250_v31 = vmax.f32 %v1218_v25, 0.0  ;;  %v1188_v33 = vadd.f32 %v2015_v11, %v1149_v27  ;;  %v1629_v35 = vpop.f32.mrb[26].mxu1  ;;  %v719_v37 = vmul.f32 %v1577_v34, %v1999_v6  ;;  %v656_v39 = vpop.f32.mrb[27].mxu0 }
 0x123   : > { %1284 = vst.msk [vmem:[%s2035_s17 + $0xb8] sm:$0xff] %vm1260_vm1, %v1251_v28  ;;  %v1221_v36 = vadd.f32 %v1189_v30, %v756_v29  ;;  %v1152_v38 = vmul.f32 %v1629_v35, %v2004_v7  ;;  %v1089_v40 = vpop.f32.mrb[27].mxu1  ;;  %v718_v42 = vmul.f32 %v1999_v6, %v656_v39 }
 0x124   : > { %1283 = vst.msk [vmem:[%s2035_s17 + $0xb0] sm:$0xff] %vm1260_vm1, %v1250_v31  ;;  %v1220_v41 = vadd.f32 %v1188_v33, %v755_v32  ;;  %v1151_v43 = vmul.f32 %v2004_v7, %v1089_v40  ;;  %v758_v45 = vadd.f32 %v2009_v8, %v719_v37 }
 0x125   : > { %v1253_v44 = vmax.f32 %v1221_v36, 0.0  ;;  %v1191_v46 = vadd.f32 %v2015_v11, %v1152_v38  ;;  %v757_v48 = vadd.f32 %v2009_v8, %v718_v42  ;;  %v1580_v50 = vpop.f32.mrb[28].mxu0 }
 0x126   : > { %v1252_v47 = vmax.f32 %v1220_v41, 0.0  ;;  %v1190_v49 = vadd.f32 %v2015_v11, %v1151_v43  ;;  %v1632_v51 = vpop.f32.mrb[28].mxu1  ;;  %v721_v53 = vmul.f32 %v1580_v50, %v1999_v6  ;;  %v666_v55 = vpop.f32.mrb[29].mxu0 }
 0x127   : > { %1286 = vst.msk [vmem:[%s2035_s17 + $0xc8] sm:$0xff] %vm1260_vm1, %v1253_v44  ;;  %v1223_v52 = vadd.f32 %v1191_v46, %v758_v45  ;;  %v1154_v54 = vmul.f32 %v1632_v51, %v2004_v7  ;;  %v1099_v56 = vpop.f32.mrb[29].mxu1  ;;  %v720_v58 = vmul.f32 %v1999_v6, %v666_v55 }
 0x128   : > { %1285 = vst.msk [vmem:[%s2035_s17 + $0xc0] sm:$0xff] %vm1260_vm1, %v1252_v47  ;;  %v1222_v57 = vadd.f32 %v1190_v49, %v757_v48  ;;  %v1153_v59 = vmul.f32 %v2004_v7, %v1099_v56  ;;  %v760_v61 = vadd.f32 %v2009_v8, %v721_v53 }
 0x129   : > { %v1255_v60 = vmax.f32 %v1223_v52, 0.0  ;;  %v1193_v62 = vadd.f32 %v2015_v11, %v1154_v54  ;;  %v759_v0 = vadd.f32 %v2009_v8, %v720_v58  ;;  %v1583_v2 = vpop.f32.mrb[30].mxu0 }
 0x12a   : > { %v1254_v63 = vmax.f32 %v1222_v57, 0.0  ;;  %v1192_v1 = vadd.f32 %v2015_v11, %v1153_v59  ;;  %v1635_v3 = vpop.f32.mrb[30].mxu1  ;;  %v723_v5 = vmul.f32 %v1583_v2, %v1999_v6  ;;  %v676_v10 = vpop.f32.mrb[31].mxu0 }
 0x12b   : > { %1288 = vst.msk [vmem:[%s2035_s17 + $0xd8] sm:$0xff] %vm1260_vm1, %v1255_v60  ;;  %v1225_v4 = vadd.f32 %v1193_v62, %v760_v61  ;;  %v1156_v9 = vmul.f32 %v1635_v3, %v2004_v7  ;;  %v1109_v12 = vpop.f32.mrb[31].mxu1  ;;  %v722_v14 = vmul.f32 %v1999_v6, %v676_v10 }
 0x12c   : > { %1287 = vst.msk [vmem:[%s2035_s17 + $0xd0] sm:$0xff] %vm1260_vm1, %v1254_v63  ;;  %v1224_v13 = vadd.f32 %v1192_v1, %v759_v0  ;;  %v1155_v15 = vmul.f32 %v2004_v7, %v1109_v12  ;;  %v762_v17 = vadd.f32 %v2009_v8, %v723_v5 }
 0x12d   : > { %v1257_v16 = vmax.f32 %v1225_v4, 0.0  ;;  %v1195_v18 = vadd.f32 %v2015_v11, %v1156_v9  ;;  %v761_v20 = vadd.f32 %v2009_v8, %v722_v14 }
 0x12e   : > { %v1256_v19 = vmax.f32 %v1224_v13, 0.0  ;;  %v1194_v21 = vadd.f32 %v2015_v11, %v1155_v15 }
 0x12f   : > { %1290 = vst.msk [vmem:[%s2035_s17 + $0xe8] sm:$0xff] %vm1260_vm1, %v1257_v16  ;;  %v1227_v6 = vadd.f32 %v1195_v18, %v762_v17 }
 0x130   : > { %1289 = vst.msk [vmem:[%s2035_s17 + $0xe0] sm:$0xff] %vm1260_vm1, %v1256_v19  ;;  %v1226_v7 = vadd.f32 %v1194_v21, %v761_v20 }
 0x131   : > { %v1259_v22 = vmax.f32 %v1227_v6, 0.0 }
 0x132   : > { %v1258_v8 = vmax.f32 %v1226_v7, 0.0 }
 0x133   : > { %1292 = vst.msk [vmem:[%s2035_s17 + $0xf8] sm:$0xff] %vm1260_vm1, %v1259_v22 }
 0x134   : > { %1291 = vst.msk [vmem:[%s2035_s17 + $0xf0] sm:$0xff] %vm1260_vm1, %v1258_v8 }
 0x135   : > { %1698 = shalt.err (!%p1695_p3)
}
 0x136   : > { %s1699_s26 = scalar_lea.hbm %s2214_s22, 4096  ;;  %s1703_s17 = scalar_lea.hbm %s2273_s8, 8192 }
 0x137   : > { %p1700_p4 = scmp.ne.s32.totalorder %s2214_s22, %s1699_s26  ;;  %p1704_p9 = scmp.lt.u32.totalorder %s2214_s22, %s2273_s8 }
 0x138   : > { %p1705_p10 = scmp.lt.u32.totalorder %s1703_s17, %s1699_s26  ;;  %p1707_p12 = scmp.lt.u32.totalorder %s1699_s26, %s2214_s22 }
 0x139   : > { %p1701_p7 = pnand %p1700_p4, %p1835_p5 }
 0x13a   : > { %p1706_p11 = por %p1705_p10, %p1704_p9 }
 0x13b   : > { %p1702_p8 = pneg %p1701_p7 }
 0x13c   : > { %p1708_p13 = por %p1707_p12, %p1706_p11 }
 0x13e   : > { %p1709_p0 = pnand %p1708_p13, %p1702_p8 }
 0x140   : > { %1712 = shalt.err (!%p1709_p0)
}
 0x141   : > { %s1750_s21 = smov 128   ;;  %s1751_s23 = smov 8  }
 0x142   : > { %1644 = dma.vmem_to_hbm [thread:$0]  (%p1835_p5), %s2216_s19, 4096, %s2214_s22, %s2224_s9, %s1750_s21, %s1750_s21, %s1751_s23  }
 0x143 PF: > { %p1650_p1 = scmp.ge.s32.totalorder %s1747_s30, 2  ;;  %s1322_s24 = sand.u32 1, %s1735_s27  }
 0x144   : > { %s1323_s25 = scalar_lea.sflag [#allocation3], %s1322_s24 }
 0x145   : > { %p1647_p2 = pnand %p1650_p1, %p1839_p6 }
 0x147   : > { %1730 = dma.done.wait (!%p1647_p2), %s1323_s25, 4096  }
 0x148   : > { %1732 = vsyncadd (!%p1647_p2), %s1323_s25, 4294963200  ;;  %p18_p3 = scmp.ge.s32.totalorder %s1822_s11, 4   ;;  %s2276_s27 = smov %s1739_s28 }
 0x149   : > { %s2277_s28 = smov %s1743_s29  ;;  %s2278_s29 = smov %s1833_s14 }
 0x14a   : > { %s2279_s30 = smov %s1822_s11  ;;  %20 = sbr.rel (!%p18_p3) target bundleno = 3 (0x3), region = 90 }
 0x151   :  { %1328 = vsyncpa [#allocation3], 1 }
 0x152   :  { %1330 = vsyncpa [#allocation3 + $0x1], 1 }

// kernel: bottleneck_forward.4
= control target key start
LH: loop header
LB: loop body
LE: loop exit
PB: predicated region body
PF: predicated region fallthrough
CT: control target
= control target key end

     0   :  { %s5552_s15 = smov 0   ;;  %s5554_s16 = smov 0   ;;  %s6675_s0 = inlined_call_operand.vmem [shape: f32[2,6,10,10,16], index: 0, kind: input, shape index: {}]   ;;  %s6676_s1 = inlined_call_operand.vmem [shape: f32[1,27,16,16], index: 1, kind: input, shape index: {}]   ;;  %s6677_s2 = inlined_call_operand.vmem [shape: f32[1,16], index: 2, kind: input, shape index: {}]   ;;  %s6678_s3 = inlined_call_operand.vmem [shape: f32[1,16], index: 3, kind: input, shape index: {}]   ;;  %s6679_s4 = inlined_call_operand.vmem [shape: f32[2,4,64,16], index: 4, kind: output, shape index: {}]  }
   0x1   :  { %s5556_s17 = smov 0   ;;  %s5558_s18 = smov 0  }
   0x2   :  { %s5560_s19 = smov 0  }
   0x3 LB: > { %s26_s20 = sadd.s32 1, %s5517_s17  ;;  %s33_s21 = sadd.s32 1, %s5521_s18  ;;  %s5525_s19 = sphi %s5560_s19, %s14_s19   ;;  %s5521_s18 = sphi %s5558_s18, %s6735_s18   ;;  %s5517_s17 = sphi %s5556_s17, %s6734_s17   ;;  %s5513_s16 = sphi %s5554_s16, %s6733_s16   ;;  %s5509_s15 = sphi %s5552_s15, %s6732_s15  }
   0x4   : > { %p27_p0 = scmp.ge.s32.totalorder %s26_s20, 4  ;;  %p4106_p1 = scmp.ge.s32.totalorder %s5525_s19, 1 }
   0x5   : > { %p216_p2 = scmp.lt.s32.totalorder %s5525_s19, 9 }
   0x6   : > { %s6737_s20 = smov (%p27_p0, %s26_s20), 0  ;;  %s6739_s21 = smov (!%p27_p0, %s33_s21), %s5521_s18 }
   0x7   : > { %p217_p3 = pnand %p4106_p1, %p216_p2  ;;  %p35_p4 = scmp.ge.s32.totalorder %s6739_s21, 2 }
   0x9   : > { %s6741_s21 = smov (%p35_p4, %s6739_s21), 0  ;;  %220 = sbr.rel (%p217_p3) target bundleno = 464 (0x1d0), region = 36 }
  0x10   : > { %v4111_v0 = vld [vmem:[%s6676_s1 + $0x10] sm:$0xff]  ;;  %v4112_v1 = vld [vmem:[%s6676_s1 + $0x18] sm:$0xff]  ;;  %p263_p5 = scmp.lt.s32.totalorder %s5513_s16, 1  ;;  %v316_v5 = vld [vmem:[%s6676_s1] sm:$0xff]  ;;  %s294_s12 = smul.u32 160, %s5509_s15  ;;  %vm334_vm0 = vcmask 1046528  }
  0x11   : > { %v4259_v2 = vld [vmem:[%s6676_s1 + $0xd0] sm:$0xff]  ;;  %v5125_v3 = vpack.c.bf16 %v4112_v1, %v4111_v0  ;;  %v4260_v4 = vld [vmem:[%s6676_s1 + $0xd8] sm:$0xff]  ;;  %v317_v6 = vld [vmem:[%s6676_s1 + $0x8] sm:$0xff]  ;;  %vm362_vm1 = vcmask 130048   ;;  %vm605_vm2 = vcmask 1045504   ;;  %p284_p6 = scmp.lt.s32.totalorder %s5509_s15, 3 }
  0x12   : > { %v5602_v7 = vpack.c.bf16 %v4260_v4, %v4259_v2  ;;  %s6743_s16 = smov (!%p263_p5, %s5513_s16), 1  ;;  %v5606_v8 = vpack.c.bf16 %v317_v6, %v316_v5  ;;  %v4269_v9 = vld [vmem:[%s6676_s1 + $0xe0] sm:$0xff]  ;;  %v4270_v10 = vld [vmem:[%s6676_s1 + $0xe8] sm:$0xff]  ;;  %v4279_v12 = vld [vmem:[%s6676_s1 + $0xf0] sm:$0xff] }
  0x13   : > { %5126 = vmatprep.subr.bf16.mxu1 %v5125_v3  ;;  %v5615_v11 = vpack.c.bf16 %v4270_v10, %v4269_v9  ;;  %s5443_s13 = smul.u32 960, %s6743_s16  ;;  %v4280_v13 = vld [vmem:[%s6676_s1 + $0xf8] sm:$0xff]  ;;  %v4129_v21 = vld [vmem:[%s6676_s1 + $0x20] sm:$0xff]  ;;  %v4130_v22 = vld [vmem:[%s6676_s1 + $0x28] sm:$0xff]  ;;  %s6745_s15 = smov (!%p284_p6, %s5509_s15), 3 }
  0x14   : > { %6700 = vst [vmem:[#allocation2_spill] sm:$0xff] %v5602_v7  ;;  %5178 = vmatprep.subr.bf16.mxu0 %v5602_v7  ;;  %5128 = vmatpush3.bf16.msra.mxu1 %v5125_v3  ;;  %v5664_v27 = vpack.c.bf16 %v4280_v13, %v4279_v12  ;;  %v4289_v28 = vld [vmem:[%s6676_s1 + $0x100] sm:$0xff]  ;;  %v4290_v29 = vld [vmem:[%s6676_s1 + $0x108] sm:$0xff]  ;;  %v5725_v54 = vpack.c.bf16 %v4130_v22, %v4129_v21  ;;  %s4109_s27 = sshll.u32 %s6743_s16, 5 }
  0x15   : > { %5180 = vmatpush3.bf16.msra.mxu0 %v5602_v7  ;;  %5130 = vmatprep.subr.bf16.mxu1 %v5606_v8  ;;  %s270_s23 = scalar_lea.vmem %s6675_s0, %s5443_s13  ;;  %v5739_v60 = vpack.c.bf16 %v4290_v29, %v4289_v28 }
  0x16   : > { %5182 = vmatprep.subr.bf16.mxu0 %v5615_v11  ;;  %s5625_s24 = scalar_lea.vmem %s270_s23, %s294_s12 }
  0x17   : > { %v5634_v14 = vld [vmem:[%s5625_s24] sm:$0xff]  ;;  %v5637_v15 = vld [vmem:[%s5625_s24 + $0x8] sm:$0x3]  ;;  %v5640_v16 = vld [vmem:[%s5625_s24 + $0xb0] sm:$0xff] }
  0x18   : > { %v335_v17 = vrot.slane %v5634_v14, 1  ;;  %v336_v18 = vrot.slane %v5637_v15, 1  ;;  %v5645_v19 = vld [vmem:[%s5625_s24 + $0xb8] sm:$0x3]  ;;  %v1660_v20 = vrot.slane %v5640_v16, 1  ;;  %v5656_v24 = vld [vmem:[%s5625_s24 + $0x10] sm:$0xff] }
  0x19   : > { %v1661_v23 = vrot.slane %v5645_v19, 1  ;;  %v5659_v25 = vld [vmem:[%s5625_s24 + $0x18] sm:$0x3]  ;;  %v5662_v26 = vld [vmem:[%s5625_s24 + $0xc0] sm:$0xff]  ;;  %v1817_v31 = vrot.slane %v5645_v19, 2  ;;  %v338_v32 = vrot.slane %v5656_v24, 1 }
  0x1a   : > { %v337_v30 = vsel %vm334_vm0, %v335_v17, %v336_v18  ;;  %v339_v33 = vrot.slane %v5659_v25, 1  ;;  %v5677_v34 = vld [vmem:[%s5625_s24 + $0xc8] sm:$0x3]  ;;  %v5680_v35 = vld [vmem:[%s5625_s24 + $0x20] sm:$0xff]  ;;  %v1663_v37 = vrot.slane %v5662_v26, 1  ;;  %v5693_v41 = vld [vmem:[%s5625_s24 + $0xd0] sm:$0xff] }
  0x1b   : > { %4697 = vmatprep.mubr.msk.f32.mxu1 %vm362_vm1, %v337_v30  ;;  %v5684_v36 = vsel %vm334_vm0, %v1660_v20, %v1661_v23  ;;  %v1664_v38 = vrot.slane %v5677_v34, 1  ;;  %v1820_v39 = vrot.slane %v5677_v34, 2  ;;  %v5690_v40 = vld [vmem:[%s5625_s24 + $0x28] sm:$0x3]  ;;  %v341_v43 = vrot.slane %v5680_v35, 1  ;;  %v5707_v47 = vld [vmem:[%s5625_s24 + $0x30] sm:$0xff] }
  0x1c   : > { %4905 = vmatprep.mubr.msk.f32.mxu0 %vm362_vm1, %v5684_v36  ;;  %v5698_v42 = vsel %vm334_vm0, %v338_v32, %v339_v33  ;;  %v342_v44 = vrot.slane %v5690_v40, 1  ;;  %v5703_v45 = vld [vmem:[%s5625_s24 + $0xd8] sm:$0x3]  ;;  %v1666_v46 = vrot.slane %v5693_v41, 1  ;;  %v344_v51 = vrot.slane %v5707_v47, 1  ;;  %v5720_v52 = vld [vmem:[%s5625_s24 + $0xe0] sm:$0xff] }
  0x1d   : > { %4698 = vmatmul.mubr.msk.f32.vlgmr.msra.gmra.mrb[0].mxu1 %vm362_vm1, %v5698_v42  ;;  %v5712_v48 = vsel %vm334_vm0, %v1663_v37, %v1664_v38  ;;  %v1667_v49 = vrot.slane %v5703_v45, 1  ;;  %v5716_v50 = vld [vmem:[%s5625_s24 + $0x38] sm:$0x3]  ;;  %v5723_v53 = vld [vmem:[%s5625_s24 + $0x40] sm:$0xff]  ;;  %v4208_v57 = vld [vmem:[%s5625_s24 + $0xe8] sm:$0x3] }
  0x1e   : > { %6701 = vst [vmem:[#allocation3_spill] sm:$0xff] %v5712_v48  ;;  %5132 = vmatpush3.bf16.msra.mxu1 %v5606_v8  ;;  %4906 = vmatmul.mubr.msk.f32.vlgmr.msra.gmra.mrb[0].mxu0 %vm362_vm1, %v5712_v48  ;;  %v5731_v55 = vsel %vm334_vm0, %v341_v43, %v342_v44  ;;  %v345_v56 = vrot.slane %v5716_v50, 1  ;;  %v1669_v58 = vrot.slane %v5720_v52, 1  ;;  %v5737_v59 = vld [vmem:[%s5625_s24 + $0x48] sm:$0x3]  ;;  %v1670_v62 = vrot.slane %v4208_v57, 1 }
  0x1f   : > { %5184 = vmatpush3.bf16.msra.mxu0 %v5615_v11  ;;  %4700 = vmatprep.mubr.msk.f32.mxu1 %vm362_vm1, %v5731_v55  ;;  %v5745_v61 = vsel %vm334_vm0, %v1666_v46, %v1667_v49  ;;  %v347_v63 = vrot.slane %v5723_v53, 1  ;;  %v348_v0 = vrot.slane %v5737_v59, 1  ;;  %v5750_v1 = vld [vmem:[%s5625_s24 + $0x50] sm:$0xff]  ;;  %v5753_v2 = vld [vmem:[%s5625_s24 + $0x58] sm:$0x3]  ;;  %v1816_v4 = vrot.slane %v5640_v16, 2 }
  0x20   : > { %6702 = vst [vmem:[#allocation4_spill] sm:$0xff] %v5745_v61  ;;  %4908 = vmatprep.mubr.msk.f32.mxu0 %vm362_vm1, %v5745_v61  ;;  %v5758_v3 = vsel %vm334_vm0, %v344_v51, %v345_v56  ;;  %5186 = vmatprep.subr.bf16.mxu0 %v5664_v27  ;;  %v350_v5 = vrot.slane %v5750_v1, 1  ;;  %v351_v6 = vrot.slane %v5753_v2, 1  ;;  %v5765_v8 = vld [vmem:[%s5625_s24 + $0x60] sm:$0xff]  ;;  %v5768_v9 = vld [vmem:[%s5625_s24 + $0x68] sm:$0x3]  ;;  %v5773_v10 = vsel %vm334_vm0, %v1669_v58, %v1670_v62 }
  0x21   : > { %4701 = vmatmul.mubr.msk.f32.gmra.mrb[2].mxu1 %vm362_vm1, %v5758_v3  ;;  %6703 = vst [vmem:[#allocation5_spill] sm:$0xff] %v5773_v10  ;;  %v5776_v11 = vsel %vm334_vm0, %v347_v63, %v348_v0  ;;  %v1819_v12 = vrot.slane %v5662_v26, 2  ;;  %v353_v13 = vrot.slane %v5765_v8, 1  ;;  %v5781_v17 = vld [vmem:[%s5625_s24 + $0x70] sm:$0xff]  ;;  %v5784_v18 = vld [vmem:[%s5625_s24 + $0x78] sm:$0x3]  ;;  %5134 = vmatprep.subr.bf16.mxu1 %v5725_v54  ;;  %v5797_v21 = vsel %vm605_vm2, %v1816_v4, %v1817_v31 }
  0x22   : > { %v5788_v20 = vld [vmem:[%s5625_s24 + $0xf0] sm:$0xff]  ;;  %4909 = vmatmul.mubr.msk.f32.gmra.mrb[2].mxu0 %vm362_vm1, %v5773_v10  ;;  %4703 = vmatprep.mubr.msk.f32.mxu1 %vm362_vm1, %v5776_v11  ;;  %6704 = vst [vmem:[#allocation6_spill] sm:$0xff] %v5797_v21  ;;  %v5800_v22 = vsel %vm334_vm0, %v350_v5, %v351_v6  ;;  %v354_v23 = vrot.slane %v5768_v9, 1  ;;  %v1822_v28 = vrot.slane %v5693_v41, 2  ;;  %v5805_v29 = vld [vmem:[%s5625_s24 + $0xf8] sm:$0x3] }
  0x23   : > { %4921 = vmatprep.mubr.msk.f32.mxu0 %vm362_vm1, %v5797_v21  ;;  %v5810_v19 = vsel %vm605_vm2, %v1819_v12, %v1820_v39  ;;  %v1823_v30 = vrot.slane %v5703_v45, 2  ;;  %v356_v31 = vrot.slane %v5781_v17, 1  ;;  %v357_v32 = vrot.slane %v5784_v18, 1  ;;  %v5821_v43 = vld [vmem:[%s5625_s24 + $0x100] sm:$0xff]  ;;  %v5824_v44 = vld [vmem:[%s5625_s24 + $0x108] sm:$0x3] }
  0x24   : > { %6705 = vst [vmem:[#allocation7_spill] sm:$0xff] %v5810_v19  ;;  %v5816_v33 = vsel %vm334_vm0, %v353_v13, %v354_v23  ;;  %v1825_v34 = vrot.slane %v5720_v52, 2  ;;  %v1826_v37 = vrot.slane %v4208_v57, 2  ;;  %v1828_v38 = vrot.slane %v5788_v20, 2  ;;  %v5833_v46 = vld [vmem:[%s5625_s24 + $0x110] sm:$0xff]  ;;  %v5859_v4 = vld [vmem:[%s5625_s24 + $0x120] sm:$0xff] }
  0x25   : > { %4704 = vmatmul.mubr.msk.f32.gmra.mrb[4].mxu1 %vm362_vm1, %v5800_v22  ;;  %v5829_v39 = vsel %vm605_vm2, %v1822_v28, %v1823_v30  ;;  %v1829_v45 = vrot.slane %v5805_v29, 2  ;;  %v5836_v49 = vld [vmem:[%s5625_s24 + $0x118] sm:$0x3]  ;;  %v5843_v51 = vsel %vm334_vm0, %v356_v31, %v357_v32  ;;  %v1831_v57 = vrot.slane %v5821_v43, 2  ;;  %6709 = vst [vmem:[#allocation11_spill] sm:$0xff] %v5859_v4  ;;  %v4139_v5 = vld [vmem:[%s6676_s1 + $0x30] sm:$0xff] }
  0x26   : > { %6706 = vst [vmem:[#allocation8_spill] sm:$0xff] %v5829_v39  ;;  %4922 = vmatmul.mubr.msk.f32.vlgmr.msra.gmra.mrb[0].mxu0 %vm362_vm1, %v5810_v19  ;;  %4706 = vmatprep.mubr.msk.f32.mxu1 %vm362_vm1, %v5816_v33  ;;  %v5849_v56 = vsel %vm605_vm2, %v1825_v34, %v1826_v37  ;;  %v1832_v58 = vrot.slane %v5824_v44, 2  ;;  %v1834_v63 = vrot.slane %v5833_v46, 2  ;;  %v1835_v0 = vrot.slane %v5836_v49, 2  ;;  %v4140_v6 = vld [vmem:[%s6676_s1 + $0x38] sm:$0xff] }
  0x27   : > { %5188 = vmatpush3.bf16.msra.mxu0 %v5664_v27  ;;  %4924 = vmatprep.mubr.msk.f32.mxu0 %vm362_vm1, %v5829_v39  ;;  %6707 = vst [vmem:[#allocation9_spill] sm:$0xff] %v5849_v56  ;;  %v5854_v62 = vsel %vm605_vm2, %v1828_v38, %v1829_v45  ;;  %v5862_v27 = vld [vmem:[%s5625_s24 + $0x128] sm:$0x3]  ;;  %v2210_v13 = vrot.slane %v5859_v4, 2  ;;  %v5137_v30 = vpack.c.bf16 %v4140_v6, %v4139_v5  ;;  %v4300_v32 = vld [vmem:[%s6676_s1 + $0x118] sm:$0xff]  ;;  %v607_v34 = vrot.slane %v5637_v15, 2 }
  0x28   : > { %6708 = vst [vmem:[#allocation10_spill] sm:$0xff] %v5854_v62  ;;  %5190 = vmatprep.subr.bf16.mxu0 %v5739_v60  ;;  %v5880_v12 = vsel %vm605_vm2, %v1831_v57, %v1832_v58  ;;  %v2211_v23 = vrot.slane %v5862_v27, 2  ;;  %v5885_v28 = vsel %vm605_vm2, %v1834_v63, %v1835_v0  ;;  %v606_v37 = vrot.slane %v5634_v14, 2 }
  0x29   : > { %4707 = vmatmul.mubr.msk.f32.gmra.mrb[6].mxu1 %vm362_vm1, %v5843_v51  ;;  %6710 = vst [vmem:[#allocation12_spill] sm:$0xff] %v5880_v12  ;;  %6711 = vst [vmem:[#allocation13_spill] sm:$0xff] %v5885_v28  ;;  %v610_v45 = vrot.slane %v5659_v25, 2  ;;  %v609_v57 = vrot.slane %v5656_v24, 2  ;;  %v612_v15 = vrot.slane %v5680_v35, 2  ;;  %v613_v58 = vrot.slane %v5690_v40, 2 }
  0x2a   : > { %4925 = vmatmul.mubr.msk.f32.gmra.mrb[2].mxu0 %vm362_vm1, %v5849_v56  ;;  %4713 = vmatprep.mubr.msk.f32.mxu1 %vm362_vm1, %v5634_v14  ;;  %v5897_v31 = vsel %vm605_vm2, %v2210_v13, %v2211_v23  ;;  %v608_v14 = vsel %vm605_vm2, %v606_v37, %v607_v34  ;;  %v4149_v25 = vld [vmem:[%s6676_s1 + $0x40] sm:$0xff]  ;;  %v615_v40 = vrot.slane %v5707_v47, 2  ;;  %v616_v0 = vrot.slane %v5716_v50, 2 }
  0x2b   : > { %4927 = vmatprep.mubr.msk.f32.mxu0 %vm362_vm1, %v5854_v62  ;;  %v5941_v63 = vsel %vm605_vm2, %v609_v57, %v610_v45  ;;  %v618_v5 = vrot.slane %v5723_v53, 2  ;;  %v619_v6 = vrot.slane %v5737_v59, 2  ;;  %v5950_v13 = vsel %vm605_vm2, %v612_v15, %v613_v58  ;;  %v5966_v59 = vld [vmem:[%s5625_s24 + $0x130] sm:$0xff]  ;;  %v4330_v45 = vld [vmem:[%s6676_s1 + $0x128] sm:$0xff] }
  0x2c   : > { %v5957_v50 = vsel %vm605_vm2, %v615_v40, %v616_v0  ;;  %v624_v34 = vrot.slane %v5765_v8, 2  ;;  %v625_v37 = vrot.slane %v5768_v9, 2  ;;  %v627_v57 = vrot.slane %v5781_v17, 2 }
  0x2d   : > { %4714 = vmatmul.mubr.msk.f32.vlgmr.msra.gmra.mrb[0].mxu1 %vm362_vm1, %v5656_v24  ;;  %v1672_v58 = vrot.slane %v5788_v20, 1  ;;  %v1676_v40 = vrot.slane %v5824_v44, 1  ;;  %v1678_v44 = vrot.slane %v5833_v46, 1 }
  0x2e   : > { %5136 = vmatpush3.bf16.msra.mxu1 %v5725_v54  ;;  %4928 = vmatmul.mubr.msk.f32.gmra.mrb[4].mxu0 %vm362_vm1, %v5880_v12  ;;  %v4299_v54 = vld [vmem:[%s6676_s1 + $0x110] sm:$0xff]  ;;  %v5993_v15 = vsel %vm605_vm2, %v624_v34, %v625_v37  ;;  %v4218_v34 = vld [vmem:[%s5625_s24 + $0x138] sm:$0x3] }
  0x2f   : > { %4716 = vmatprep.mubr.msk.f32.mxu1 %vm362_vm1, %v5680_v35  ;;  %4930 = vmatprep.mubr.msk.f32.mxu0 %vm362_vm1, %v5885_v28  ;;  %v5193_v38 = vpack.c.bf16 %v4300_v32, %v4299_v54  ;;  %v621_v54 = vrot.slane %v5750_v1, 2  ;;  %v622_v32 = vrot.slane %v5753_v2, 2  ;;  %v4329_v2 = vld [vmem:[%s6676_s1 + $0x120] sm:$0xff] }
  0x30   : > { %5138 = vmatprep.subr.bf16.mxu1 %v5137_v30  ;;  %v5197_v0 = vpack.c.bf16 %v4330_v45, %v4329_v2  ;;  %v2452_v2 = vrot.slane %v4218_v34, 1 }
  0x31   : > { %4717 = vmatmul.mubr.msk.f32.gmra.mrb[2].mxu1 %vm362_vm1, %v5707_v47  ;;  %v5986_v9 = vsel %vm605_vm2, %v621_v54, %v622_v32  ;;  %v2089_v54 = vrot.slane %v5859_v4, 1  ;;  %v2090_v32 = vrot.slane %v5862_v27, 1  ;;  %v2451_v27 = vrot.slane %v5966_v59, 1 }
  0x32   : > { %4931 = vmatmul.mubr.msk.f32.gmra.mrb[6].mxu0 %vm362_vm1, %v5897_v31  ;;  %4719 = vmatprep.mubr.msk.f32.mxu1 %vm362_vm1, %v5723_v53 }
  0x33   : > { %4937 = vmatprep.mubr.msk.f32.mxu0 %vm362_vm1, %v5662_v26  ;;  %v6040_v45 = vsel %vm334_vm0, %v2089_v54, %v2090_v32  ;;  %v6103_v54 = vld [vmem:[%s5625_s24 + $0x140] sm:$0xff] }
  0x34   : > { %6715 = vst [vmem:[#allocation17_spill] sm:$0xff] %v6040_v45  ;;  %v4349_v32 = vld [vmem:[%s6676_s1 + $0x140] sm:$0xff] }
  0x35   : > { %4720 = vmatmul.mubr.msk.f32.gmra.mrb[4].mxu1 %vm362_vm1, %v5750_v1 }
  0x36   : > { %4938 = vmatmul.mubr.msk.f32.vlgmr.msra.gmra.mrb[0].mxu0 %vm362_vm1, %v5693_v41  ;;  %4722 = vmatprep.mubr.msk.f32.mxu1 %vm362_vm1, %v5765_v8 }
  0x37   : > { %5192 = vmatpush3.bf16.msra.mxu0 %v5739_v60  ;;  %4940 = vmatprep.mubr.msk.f32.mxu0 %vm362_vm1, %v5720_v52  ;;  %v4150_v60 = vld [vmem:[%s6676_s1 + $0x48] sm:$0xff] }
  0x38   : > { %5194 = vmatprep.subr.bf16.mxu0 %v5193_v38  ;;  %v5141_v23 = vpack.c.bf16 %v4150_v60, %v4149_v25  ;;  %v1673_v25 = vrot.slane %v5805_v29, 1  ;;  %v1675_v60 = vrot.slane %v5821_v43, 1 }
  0x39   : > { %4723 = vmatmul.mubr.msk.f32.gmra.mrb[6].mxu1 %vm362_vm1, %v5781_v17 }
  0x3a   : > { %4941 = vmatmul.mubr.msk.f32.gmra.mrb[2].mxu0 %vm362_vm1, %v5788_v20  ;;  %4729 = vmatprep.mubr.msk.f32.mxu1 %vm362_vm1, %v608_v14  ;;  %v628_v14 = vrot.slane %v5784_v18, 2  ;;  %v6011_v29 = vsel %vm334_vm0, %v1672_v58, %v1673_v25  ;;  %v6071_v25 = vld [vmem:[%s5625_s24 + $0x80] sm:$0xff] }
  0x3b   : > { %4943 = vmatprep.mubr.msk.f32.mxu0 %vm362_vm1, %v5821_v43  ;;  %6712 = vst [vmem:[#allocation14_spill] sm:$0xff] %v6011_v29 }
  0x3c   : > { %v6006_v18 = vsel %vm605_vm2, %v627_v57, %v628_v14  ;;  %v4340_v14 = vld [vmem:[%s6676_s1 + $0x138] sm:$0xff] }
  0x3d   : > { %4730 = vmatmul.mubr.msk.f32.vlgmr.msra.gmra.mrb[0].mxu1 %vm362_vm1, %v5941_v63 }
  0x3e   : > { %5140 = vmatpush3.bf16.msra.mxu1 %v5137_v30  ;;  %4944 = vmatmul.mubr.msk.f32.gmra.mrb[4].mxu0 %vm362_vm1, %v5833_v46  ;;  %v5969_v30 = vsel %vm605_vm2, %v618_v5, %v619_v6  ;;  %v1679_v5 = vrot.slane %v5836_v49, 1  ;;  %v6016_v6 = vsel %vm334_vm0, %v1675_v60, %v1676_v40  ;;  %v4160_v49 = vld [vmem:[%s6676_s1 + $0x58] sm:$0xff]  ;;  %v4169_v60 = vld [vmem:[%s6676_s1 + $0x60] sm:$0xff]  ;;  %v4170_v40 = vld [vmem:[%s6676_s1 + $0x68] sm:$0xff] }
  0x3f   : > { %4732 = vmatprep.mubr.msk.f32.mxu1 %vm362_vm1, %v5950_v13  ;;  %4946 = vmatprep.mubr.msk.f32.mxu0 %vm362_vm1, %v5859_v4  ;;  %6713 = vst [vmem:[#allocation15_spill] sm:$0xff] %v6016_v6  ;;  %v6191_v4 = vld [vmem:[%s5625_s24 + $0x178] sm:$0x3] }
  0x40   : > { %5142 = vmatprep.subr.bf16.mxu1 %v5141_v23  ;;  %v6037_v37 = vsel %vm334_vm0, %v1678_v44, %v1679_v5  ;;  %v2573_v44 = vrot.slane %v4218_v34, 2  ;;  %v5149_v5 = vpack.c.bf16 %v4170_v40, %v4169_v60  ;;  %v4350_v34 = vld [vmem:[%s6676_s1 + $0x148] sm:$0xff]  ;;  %v4179_v60 = vld [vmem:[%s6676_s1 + $0x70] sm:$0xff]  ;;  %v2874_v7 = vrot.slane %v6191_v4, 1 }
  0x41   : > { %4733 = vmatmul.mubr.msk.f32.gmra.mrb[2].mxu1 %vm362_vm1, %v5957_v50  ;;  %6714 = vst [vmem:[#allocation16_spill] sm:$0xff] %v6037_v37  ;;  %v6161_v40 = vld [vmem:[%s5625_s24 + $0x190] sm:$0xff] }
  0x42   : > { %4947 = vmatmul.mubr.msk.f32.gmra.mrb[6].mxu0 %vm362_vm1, %v5966_v59  ;;  %4735 = vmatprep.mubr.msk.f32.mxu1 %vm362_vm1, %v5969_v30 }
  0x43   : > { %4953 = vmatprep.mubr.msk.f32.mxu0 %vm362_vm1, %v5712_v48 }
  0x45   : > { %4736 = vmatmul.mubr.msk.f32.gmra.mrb[4].mxu1 %vm362_vm1, %v5986_v9 }
  0x46   : > { %4954 = vmatmul.mubr.msk.f32.vlgmr.msra.gmra.mrb[0].mxu0 %vm362_vm1, %v5745_v61  ;;  %4738 = vmatprep.mubr.msk.f32.mxu1 %vm362_vm1, %v5993_v15 }
  0x47   : > { %5196 = vmatpush3.bf16.msra.mxu0 %v5193_v38  ;;  %4956 = vmatprep.mubr.msk.f32.mxu0 %vm362_vm1, %v5773_v10  ;;  %v4159_v38 = vld [vmem:[%s6676_s1 + $0x50] sm:$0xff] }
  0x48   : > { %5198 = vmatprep.subr.bf16.mxu0 %v5197_v0  ;;  %v5145_v57 = vpack.c.bf16 %v4160_v49, %v4159_v38  ;;  %v6121_v49 = vld [vmem:[%s5625_s24 + $0x150] sm:$0xff] }
  0x49   : > { %4739 = vmatmul.mubr.msk.f32.gmra.mrb[6].mxu1 %vm362_vm1, %v6006_v18 }
  0x4a   : > { %4957 = vmatmul.mubr.msk.f32.gmra.mrb[2].mxu0 %vm362_vm1, %v6011_v29  ;;  %4745 = vmatprep.mubr.msk.f32.mxu1 %vm362_vm1, %v5656_v24  ;;  %v2453_v24 = vsel %vm334_vm0, %v2451_v27, %v2452_v2  ;;  %v6124_v27 = vld [vmem:[%s5625_s24 + $0x160] sm:$0xff]  ;;  %v5205_v2 = vpack.c.bf16 %v4350_v34, %v4349_v32  ;;  %v6169_v32 = vld [vmem:[%s5625_s24 + $0x158] sm:$0x3] }
  0x4b   : > { %4959 = vmatprep.mubr.msk.f32.mxu0 %vm362_vm1, %v6016_v6  ;;  %v6222_v6 = vld [vmem:[%s5625_s24 + $0x198] sm:$0x3] }
  0x4d   : > { %4746 = vmatmul.mubr.msk.f32.vlgmr.msra.gmra.mrb[0].mxu1 %vm362_vm1, %v5680_v35 }
  0x4e   : > { %5144 = vmatpush3.bf16.msra.mxu1 %v5141_v23  ;;  %4960 = vmatmul.mubr.msk.f32.gmra.mrb[4].mxu0 %vm362_vm1, %v6037_v37  ;;  %v4339_v23 = vld [vmem:[%s6676_s1 + $0x130] sm:$0xff] }
  0x4f   : > { %4748 = vmatprep.mubr.msk.f32.mxu1 %vm362_vm1, %v5707_v47  ;;  %4962 = vmatprep.mubr.msk.f32.mxu0 %vm362_vm1, %v6040_v45  ;;  %v5201_v58 = vpack.c.bf16 %v4340_v14, %v4339_v23  ;;  %v6141_v23 = vld [vmem:[%s5625_s24 + $0x180] sm:$0xff]  ;;  %v6146_v14 = vld [vmem:[%s5625_s24 + $0x148] sm:$0x3]  ;;  %v2870_v45 = vrot.slane %v6124_v27, 1 }
  0x50   : > { %5146 = vmatprep.subr.bf16.mxu1 %v5145_v57  ;;  %v2876_v21 = vrot.slane %v6141_v23, 1  ;;  %v3021_v61 = vrot.slane %v6146_v14, 2 }
  0x51   : > { %4749 = vmatmul.mubr.msk.f32.gmra.mrb[2].mxu1 %vm362_vm1, %v5723_v53 }
  0x52   : > { %4963 = vmatmul.mubr.msk.f32.gmra.mrb[6].mxu0 %vm362_vm1, %v2453_v24  ;;  %4751 = vmatprep.mubr.msk.f32.mxu1 %vm362_vm1, %v5750_v1  ;;  %v6138_v24 = vld [vmem:[%s5625_s24 + $0x170] sm:$0xff] }
  0x53   : > { %4969 = vmatprep.mubr.msk.f32.mxu0 %vm362_vm1, %v5810_v19 }
  0x55   : > { %4752 = vmatmul.mubr.msk.f32.gmra.mrb[4].mxu1 %vm362_vm1, %v5765_v8 }
  0x56   : > { %4970 = vmatmul.mubr.msk.f32.vlgmr.msra.gmra.mrb[0].mxu0 %vm362_vm1, %v5829_v39  ;;  %4754 = vmatprep.mubr.msk.f32.mxu1 %vm362_vm1, %v5781_v17  ;;  %v2873_v39 = vrot.slane %v6138_v24, 1 }
  0x57   : > { %5200 = vmatpush3.bf16.msra.mxu0 %v5197_v0  ;;  %4972 = vmatprep.mubr.msk.f32.mxu0 %vm362_vm1, %v5849_v56  ;;  %v2572_v0 = vrot.slane %v5966_v59, 2  ;;  %v6100_v59 = vld [vmem:[%s5625_s24 + $0x88] sm:$0x3] }
  0x58   : > { %5202 = vmatprep.subr.bf16.mxu0 %v5201_v58  ;;  %v883_v38 = vrot.slane %v6100_v59, 1 }
  0x59   : > { %4755 = vmatmul.mubr.msk.f32.gmra.mrb[6].mxu1 %vm362_vm1, %v6071_v25 }
  0x5a   : > { %4973 = vmatmul.mubr.msk.f32.gmra.mrb[2].mxu0 %vm362_vm1, %v5854_v62  ;;  %4761 = vmatprep.mubr.msk.f32.mxu1 %vm362_vm1, %v5698_v42  ;;  %v2574_v42 = vsel %vm605_vm2, %v2572_v0, %v2573_v44  ;;  %v2864_v0 = vrot.slane %v6103_v54, 1  ;;  %v6165_v44 = vld [vmem:[%s5625_s24 + $0x1a0] sm:$0xff]  ;;  %v1004_v62 = vrot.slane %v6100_v59, 2 }
  0x5b   : > { %4975 = vmatprep.mubr.msk.f32.mxu0 %vm362_vm1, %v5880_v12  ;;  %v4359_v12 = vld [vmem:[%s6676_s1 + $0x150] sm:$0xff] }
  0x5d   : > { %4762 = vmatmul.mubr.msk.f32.vlgmr.msra.gmra.mrb[0].mxu1 %vm362_vm1, %v5731_v55 }
  0x5e   : > { %5148 = vmatpush3.bf16.msra.mxu1 %v5145_v57  ;;  %4976 = vmatmul.mubr.msk.f32.gmra.mrb[4].mxu0 %vm362_vm1, %v5885_v28  ;;  %v6196_v28 = vld [vmem:[%s5625_s24 + $0x188] sm:$0x3] }
  0x5f   : > { %4764 = vmatprep.mubr.msk.f32.mxu1 %vm362_vm1, %v5758_v3  ;;  %4978 = vmatprep.mubr.msk.f32.mxu0 %vm362_vm1, %v5897_v31  ;;  %v882_v31 = vrot.slane %v6071_v25, 1  ;;  %v2877_v37 = vrot.slane %v6196_v28, 1 }
  0x60   : > { %5150 = vmatprep.subr.bf16.mxu1 %v5149_v5 }
  0x61   : > { %4765 = vmatmul.mubr.msk.f32.gmra.mrb[2].mxu1 %vm362_vm1, %v5776_v11  ;;  %v6133_v57 = vsel %vm334_vm0, %v882_v31, %v883_v38  ;;  %v2867_v31 = vrot.slane %v6121_v49, 1  ;;  %v6184_v38 = vld [vmem:[%s5625_s24 + $0x1b0] sm:$0xff] }
  0x62   : > { %4979 = vmatmul.mubr.msk.f32.gmra.mrb[6].mxu0 %vm362_vm1, %v2574_v42  ;;  %4767 = vmatprep.mubr.msk.f32.mxu1 %vm362_vm1, %v5800_v22  ;;  %v2865_v42 = vrot.slane %v6146_v14, 1 }
  0x63   : > { %4985 = vmatprep.mubr.msk.f32.mxu0 %vm362_vm1, %v6103_v54 }
  0x65   : > { %4768 = vmatmul.mubr.msk.f32.gmra.mrb[4].mxu1 %vm362_vm1, %v5816_v33 }
  0x66   : > { %4986 = vmatmul.mubr.msk.f32.vlgmr.msra.gmra.mrb[0].mxu0 %vm362_vm1, %v6121_v49  ;;  %4770 = vmatprep.mubr.msk.f32.mxu1 %vm362_vm1, %v5843_v51 }
  0x67   : > { %5204 = vmatpush3.bf16.msra.mxu0 %v5201_v58  ;;  %4988 = vmatprep.mubr.msk.f32.mxu0 %vm362_vm1, %v6124_v27  ;;  %v4180_v58 = vld [vmem:[%s6676_s1 + $0x78] sm:$0xff] }
  0x68   : > { %5206 = vmatprep.subr.bf16.mxu0 %v5205_v2  ;;  %v5153_v34 = vpack.c.bf16 %v4180_v58, %v4179_v60  ;;  %v2868_v60 = vrot.slane %v6169_v32, 1  ;;  %v2866_v58 = vsel %vm334_vm0, %v2864_v0, %v2865_v42  ;;  %v4360_v0 = vld [vmem:[%s6676_s1 + $0x158] sm:$0xff]  ;;  %v1003_v42 = vrot.slane %v6071_v25, 2 }
  0x69   : > { %4771 = vmatmul.mubr.msk.f32.gmra.mrb[6].mxu1 %vm362_vm1, %v6133_v57  ;;  %v5209_v59 = vpack.c.bf16 %v4360_v0, %v4359_v12  ;;  %v6239_v12 = vsel %vm334_vm0, %v2873_v39, %v2874_v7  ;;  %v2882_v0 = vrot.slane %v6165_v44, 1  ;;  %v4189_v7 = vld [vmem:[%s6676_s1 + $0x80] sm:$0xff]  ;;  %v4190_v39 = vld [vmem:[%s6676_s1 + $0x88] sm:$0xff] }
  0x6a   : > { %4989 = vmatmul.mubr.msk.f32.gmra.mrb[2].mxu0 %vm362_vm1, %v6138_v24  ;;  %4777 = vmatprep.mubr.msk.f32.mxu1 %vm362_vm1, %v5941_v63  ;;  %v6174_v63 = vld [vmem:[%s5625_s24 + $0x168] sm:$0x3]  ;;  %v6212_v56 = vsel %vm334_vm0, %v2867_v31, %v2868_v60  ;;  %v2879_v60 = vrot.slane %v6161_v40, 1  ;;  %v5157_v48 = vpack.c.bf16 %v4190_v39, %v4189_v7  ;;  %v3036_v39 = vrot.slane %v6222_v6, 2 }
  0x6b   : > { %4991 = vmatprep.mubr.msk.f32.mxu0 %vm362_vm1, %v6141_v23  ;;  %v6227_v31 = vld [vmem:[%s5625_s24 + $0x1a8] sm:$0x3] }
  0x6c   : > { %v2883_v29 = vrot.slane %v6227_v31, 1 }
  0x6d   : > { %4778 = vmatmul.mubr.msk.f32.vlgmr.msra.gmra.mrb[0].mxu1 %vm362_vm1, %v5950_v13 }
  0x6e   : > { %5152 = vmatpush3.bf16.msra.mxu1 %v5149_v5  ;;  %4992 = vmatmul.mubr.msk.f32.gmra.mrb[4].mxu0 %vm362_vm1, %v6161_v40  ;;  %v2871_v5 = vrot.slane %v6174_v63, 1  ;;  %v6272_v10 = vsel %vm334_vm0, %v2882_v0, %v2883_v29  ;;  %v3033_v0 = vrot.slane %v6196_v28, 2  ;;  %v3035_v28 = vrot.slane %v6161_v40, 2 }
  0x6f   : > { %4780 = vmatprep.mubr.msk.f32.mxu1 %vm362_vm1, %v5957_v50  ;;  %4994 = vmatprep.mubr.msk.f32.mxu0 %vm362_vm1, %v6165_v44 }
  0x70   : > { %5154 = vmatprep.subr.bf16.mxu1 %v5153_v34  ;;  %v6217_v19 = vsel %vm334_vm0, %v2870_v45, %v2871_v5  ;;  %v6234_v45 = vsel %vm605_vm2, %v1003_v42, %v1004_v62  ;;  %v6244_v5 = vsel %vm334_vm0, %v2876_v21, %v2877_v37  ;;  %v6249_v62 = vld [vmem:[%s5625_s24 + $0x1b8] sm:$0x3]  ;;  %v2885_v37 = vrot.slane %v6184_v38, 1 }
  0x71   : > { %4781 = vmatmul.mubr.msk.f32.gmra.mrb[2].mxu1 %vm362_vm1, %v5969_v30  ;;  %v3020_v42 = vrot.slane %v6103_v54, 2  ;;  %v3024_v54 = vrot.slane %v6169_v32, 2  ;;  %v3030_v32 = vrot.slane %v6191_v4, 2 }
  0x72   : > { %4995 = vmatmul.mubr.msk.f32.gmra.mrb[6].mxu0 %vm362_vm1, %v6184_v38  ;;  %4783 = vmatprep.mubr.msk.f32.mxu1 %vm362_vm1, %v5986_v9 }
  0x73   : > { %5001 = vmatprep.mubr.msk.f32.mxu0 %vm362_vm1, %v2866_v58  ;;  %v2880_v58 = vrot.slane %v6222_v6, 1  ;;  %v3022_v14 = vsel %vm605_vm2, %v3020_v42, %v3021_v61  ;;  %v4220_v6 = vld [vmem:[%s6676_s1 + $0x98] sm:$0xff]  ;;  %v3042_v42 = vrot.slane %v6249_v62, 2 }
  0x75   : > { %4784 = vmatmul.mubr.msk.f32.gmra.mrb[4].mxu1 %vm362_vm1, %v5993_v15  ;;  %v6266_v21 = vsel %vm334_vm0, %v2879_v60, %v2880_v58  ;;  %v4370_v60 = vld [vmem:[%s6676_s1 + $0x168] sm:$0xff]  ;;  %v3032_v58 = vrot.slane %v6141_v23, 2 }
  0x76   : > { %5002 = vmatmul.mubr.msk.f32.vlgmr.msra.gmra.mrb[0].mxu0 %vm362_vm1, %v6212_v56  ;;  %4786 = vmatprep.mubr.msk.f32.mxu1 %vm362_vm1, %v6006_v18 }
  0x77   : > { %5208 = vmatpush3.bf16.msra.mxu0 %v5205_v2  ;;  %5004 = vmatprep.mubr.msk.f32.mxu0 %vm362_vm1, %v6217_v19  ;;  %v2886_v2 = vrot.slane %v6249_v62, 1  ;;  %v315_v62 = vld [vmem:[%s5625_s24 + $0x98] sm:$0x3] }
  0x78   : > { %5210 = vmatprep.subr.bf16.mxu0 %v5209_v59 }
  0x79   : > { %4787 = vmatmul.mubr.msk.f32.gmra.mrb[6].mxu1 %vm362_vm1, %v6234_v45  ;;  %v6285_v29 = vsel %vm334_vm0, %v2885_v37, %v2886_v2  ;;  %v3038_v37 = vrot.slane %v6165_v44, 2  ;;  %v3041_v2 = vrot.slane %v6184_v38, 2 }
  0x7a   : > { %5005 = vmatmul.mubr.msk.f32.gmra.mrb[2].mxu0 %vm362_vm1, %v6239_v12  ;;  %4793 = vmatprep.mubr.msk.f32.mxu1 %vm362_vm1, %v5680_v35  ;;  %v3023_v35 = vrot.slane %v6121_v49, 2 }
  0x7b   : > { %5007 = vmatprep.mubr.msk.f32.mxu0 %vm362_vm1, %v6244_v5 }
  0x7c   : > { %v6305_v61 = vsel %vm605_vm2, %v3023_v35, %v3024_v54 }
  0x7d   : > { %4794 = vmatmul.mubr.msk.f32.vlgmr.msra.gmra.mrb[0].mxu1 %vm362_vm1, %v5707_v47  ;;  %v3026_v47 = vrot.slane %v6124_v27, 2 }
  0x7e   : > { %5156 = vmatpush3.bf16.msra.mxu1 %v5153_v34  ;;  %5008 = vmatmul.mubr.msk.f32.gmra.mrb[4].mxu0 %vm362_vm1, %v6266_v21  ;;  %v3027_v34 = vrot.slane %v6174_v63, 2 }
  0x7f   : > { %4796 = vmatprep.mubr.msk.f32.mxu1 %vm362_vm1, %v5723_v53  ;;  %5010 = vmatprep.mubr.msk.f32.mxu0 %vm362_vm1, %v6272_v10  ;;  %v4369_v53 = vld [vmem:[%s6676_s1 + $0x160] sm:$0xff] }
  0x80   : > { %5158 = vmatprep.subr.bf16.mxu1 %v5157_v48  ;;  %v6310_v63 = vsel %vm605_vm2, %v3026_v47, %v3027_v34  ;;  %v5213_v7 = vpack.c.bf16 %v4370_v60, %v4369_v53  ;;  %v1366_v34 = vrot.slane %v315_v62, 2  ;;  %v4326_v60 = vld [vmem:[%s5625_s24 + $0x1c8] sm:$0x3] }
  0x81   : > { %4797 = vmatmul.mubr.msk.f32.gmra.mrb[2].mxu1 %vm362_vm1, %v5750_v1  ;;  %v3029_v1 = vrot.slane %v6138_v24, 2 }
  0x82   : > { %5011 = vmatmul.mubr.msk.f32.gmra.mrb[6].mxu0 %vm362_vm1, %v6285_v29  ;;  %4799 = vmatprep.mubr.msk.f32.mxu1 %vm362_vm1, %v5765_v8  ;;  %v6321_v8 = vld [vmem:[%s5625_s24 + $0x90] sm:$0xff] }
  0x83   : > { %5017 = vmatprep.mubr.msk.f32.mxu0 %vm362_vm1, %v3022_v14  ;;  %v6326_v4 = vsel %vm605_vm2, %v3029_v1, %v3030_v32  ;;  %v1245_v14 = vrot.slane %v315_v62, 1  ;;  %v3297_v1 = vrot.slane %v4326_v60, 1  ;;  %v6718_v62 = vld [vmem:[#allocation5_spill] sm:$0xff] }
  0x85   : > { %4800 = vmatmul.mubr.msk.f32.gmra.mrb[4].mxu1 %vm362_vm1, %v5781_v17  ;;  %v6331_v17 = vsel %vm605_vm2, %v3032_v58, %v3033_v0  ;;  %v4200_v0 = vld [vmem:[%s5625_s24 + $0xa8] sm:$0x3] }
  0x86   : > { %5018 = vmatmul.mubr.msk.f32.vlgmr.msra.gmra.mrb[0].mxu0 %vm362_vm1, %v6305_v61  ;;  %4802 = vmatprep.mubr.msk.f32.mxu1 %vm362_vm1, %v6071_v25  ;;  %v3039_v25 = vrot.slane %v6227_v31, 2  ;;  %v6350_v31 = vsel %vm605_vm2, %v3035_v28, %v3036_v39  ;;  %v4250_v39 = vld [vmem:[%s6676_s1 + $0xc8] sm:$0xff] }
  0x87   : > { %5212 = vmatpush3.bf16.msra.mxu0 %v5209_v59  ;;  %5020 = vmatprep.mubr.msk.f32.mxu0 %vm362_vm1, %v6310_v63  ;;  %v4219_v59 = vld [vmem:[%s6676_s1 + $0x90] sm:$0xff] }
  0x88   : > { %5214 = vmatprep.subr.bf16.mxu0 %v5213_v7  ;;  %v6355_v35 = vsel %vm605_vm2, %v3038_v37, %v3039_v25  ;;  %v5161_v54 = vpack.c.bf16 %v4220_v6, %v4219_v59  ;;  %v3418_v25 = vrot.slane %v4326_v60, 2  ;;  %v6716_v6 = vld [vmem:[#allocation3_spill] sm:$0xff] }
  0x89   : > { %4803 = vmatmul.mubr.msk.f32.gmra.mrb[6].mxu1 %vm362_vm1, %v6321_v8 }
  0x8a   : > { %5021 = vmatmul.mubr.msk.f32.gmra.mrb[2].mxu0 %vm362_vm1, %v6326_v4  ;;  %4809 = vmatprep.mubr.msk.f32.mxu1 %vm362_vm1, %v5731_v55  ;;  %v6366_v55 = vsel %vm605_vm2, %v3041_v2, %v3042_v42  ;;  %v6717_v42 = vld [vmem:[#allocation4_spill] sm:$0xff] }
  0x8b   : > { %5023 = vmatprep.mubr.msk.f32.mxu0 %vm362_vm1, %v6331_v17 }
  0x8d   : > { %4810 = vmatmul.mubr.msk.f32.vlgmr.msra.gmra.mrb[0].mxu1 %vm362_vm1, %v5758_v3  ;;  %v4380_v3 = vld [vmem:[%s6676_s1 + $0x178] sm:$0xff] }
  0x8e   : > { %5160 = vmatpush3.bf16.msra.mxu1 %v5157_v48  ;;  %5024 = vmatmul.mubr.msk.f32.gmra.mrb[4].mxu0 %vm362_vm1, %v6350_v31  ;;  %v4379_v48 = vld [vmem:[%s6676_s1 + $0x170] sm:$0xff] }
  0x8f   : > { %4812 = vmatprep.mubr.msk.f32.mxu1 %vm362_vm1, %v5776_v11  ;;  %5026 = vmatprep.mubr.msk.f32.mxu0 %vm362_vm1, %v6355_v35  ;;  %v1244_v11 = vrot.slane %v6321_v8, 1 }
  0x90   : > { %5162 = vmatprep.subr.bf16.mxu1 %v5161_v54 }
  0x91   : > { %4813 = vmatmul.mubr.msk.f32.gmra.mrb[2].mxu1 %vm362_vm1, %v5800_v22  ;;  %v5217_v22 = vpack.c.bf16 %v4380_v3, %v4379_v48  ;;  %v1246_v47 = vsel %vm334_vm0, %v1244_v11, %v1245_v14  ;;  %v1814_v3 = vrot.slane %v4200_v0, 2  ;;  %v6719_v14 = vld [vmem:[#allocation14_spill] sm:$0xff] }
  0x92   : > { %5027 = vmatmul.mubr.msk.f32.gmra.mrb[6].mxu0 %vm362_vm1, %v6366_v55  ;;  %4815 = vmatprep.mubr.msk.f32.mxu1 %vm362_vm1, %v5816_v33  ;;  %v4229_v33 = vld [vmem:[%s6676_s1 + $0xa0] sm:$0xff] }
  0x93   : > { %5033 = vmatprep.mubr.msk.f32.mxu0 %vm362_vm1, %v6121_v49 }
  0x95   : > { %4816 = vmatmul.mubr.msk.f32.gmra.mrb[4].mxu1 %vm362_vm1, %v5843_v51  ;;  %v4230_v51 = vld [vmem:[%s6676_s1 + $0xa8] sm:$0xff] }
  0x96   : > { %5034 = vmatmul.mubr.msk.f32.vlgmr.msra.gmra.mrb[0].mxu0 %vm362_vm1, %v6124_v27  ;;  %4818 = vmatprep.mubr.msk.f32.mxu1 %vm362_vm1, %v6133_v57  ;;  %v5165_v49 = vpack.c.bf16 %v4230_v51, %v4229_v33  ;;  %v6415_v57 = vld [vmem:[%s5625_s24 + $0x1c0] sm:$0xff]  ;;  %v6725_v51 = vld [vmem:[#allocation8_spill] sm:$0xff] }
  0x97   : > { %5216 = vmatpush3.bf16.msra.mxu0 %v5213_v7  ;;  %5036 = vmatprep.mubr.msk.f32.mxu0 %vm362_vm1, %v6138_v24  ;;  %v4400_v7 = vld [vmem:[%s6676_s1 + $0x198] sm:$0xff]  ;;  %v3417_v37 = vrot.slane %v6415_v57, 2  ;;  %v6724_v33 = vld [vmem:[#allocation2_spill] sm:$0xff] }
  0x98   : > { %5218 = vmatprep.subr.bf16.mxu0 %v5217_v22 }
  0x99   : > { %4819 = vmatmul.mubr.msk.f32.gmra.mrb[6].mxu1 %vm362_vm1, %v1246_v47  ;;  %v6518_v2 = vsel %vm605_vm2, %v3417_v37, %v3418_v25 }
  0x9a   : > { %5037 = vmatmul.mubr.msk.f32.gmra.mrb[2].mxu0 %vm362_vm1, %v6141_v23  ;;  %4825 = vmatprep.mubr.msk.f32.mxu1 %vm362_vm1, %v5950_v13  ;;  %v4389_v13 = vld [vmem:[%s6676_s1 + $0x180] sm:$0xff] }
  0x9b   : > { %5039 = vmatprep.mubr.msk.f32.mxu0 %vm362_vm1, %v6161_v40 }
  0x9d   : > { %4826 = vmatmul.mubr.msk.f32.vlgmr.msra.gmra.mrb[0].mxu1 %vm362_vm1, %v5957_v50  ;;  %v4390_v50 = vld [vmem:[%s6676_s1 + $0x188] sm:$0xff] }
  0x9e   : > { %5164 = vmatpush3.bf16.msra.mxu1 %v5161_v54  ;;  %5040 = vmatmul.mubr.msk.f32.gmra.mrb[4].mxu0 %vm362_vm1, %v6165_v44  ;;  %v4410_v54 = vld [vmem:[%s6676_s1 + $0x1a8] sm:$0xff] }
  0x9f   : > { %4828 = vmatprep.mubr.msk.f32.mxu1 %vm362_vm1, %v5969_v30  ;;  %5042 = vmatprep.mubr.msk.f32.mxu0 %vm362_vm1, %v6184_v38  ;;  %v1365_v30 = vrot.slane %v6321_v8, 2 }
  0xa0   : > { %5166 = vmatprep.subr.bf16.mxu1 %v5165_v49 }
  0xa1   : > { %4829 = vmatmul.mubr.msk.f32.gmra.mrb[2].mxu1 %vm362_vm1, %v5986_v9  ;;  %v5221_v9 = vpack.c.bf16 %v4390_v50, %v4389_v13  ;;  %v1367_v53 = vsel %vm605_vm2, %v1365_v30, %v1366_v34  ;;  %v6729_v13 = vld [vmem:[#allocation13_spill] sm:$0xff]  ;;  %v5485_v30 = vld [vmem:[%s5625_s24 + $0xc0] sm:$0xff] }
  0xa2   : > { %5043 = vmatmul.mubr.msk.f32.gmra.mrb[6].mxu0 %vm362_vm1, %v6415_v57  ;;  %4831 = vmatprep.mubr.msk.f32.mxu1 %vm362_vm1, %v5993_v15  ;;  %v6442_v15 = vld [vmem:[%s5625_s24 + $0xa0] sm:$0xff] }
  0xa3   : > { %5049 = vmatprep.mubr.msk.f32.mxu0 %vm362_vm1, %v6212_v56  ;;  %v4239_v56 = vld [vmem:[%s6676_s1 + $0xb0] sm:$0xff]  ;;  %v1813_v48 = vrot.slane %v6442_v15, 2 }
  0xa5   : > { %4832 = vmatmul.mubr.msk.f32.gmra.mrb[4].mxu1 %vm362_vm1, %v6006_v18  ;;  %v4240_v18 = vld [vmem:[%s6676_s1 + $0xb8] sm:$0xff]  ;;  %v1815_v47 = vsel %vm605_vm2, %v1813_v48, %v1814_v3 }
  0xa6   : > { %5050 = vmatmul.mubr.msk.f32.vlgmr.msra.gmra.mrb[0].mxu0 %vm362_vm1, %v6217_v19  ;;  %4834 = vmatprep.mubr.msk.f32.mxu1 %vm362_vm1, %v6234_v45  ;;  %v3296_v45 = vrot.slane %v6415_v57, 1  ;;  %v5169_v32 = vpack.c.bf16 %v4240_v18, %v4239_v56 }
  0xa7   : > { %5220 = vmatpush3.bf16.msra.mxu0 %v5217_v22  ;;  %5052 = vmatprep.mubr.msk.f32.mxu0 %vm362_vm1, %v6239_v12  ;;  %v6720_v22 = vld [vmem:[#allocation15_spill] sm:$0xff] }
  0xa8   : > { %5222 = vmatprep.subr.bf16.mxu0 %v5221_v9  ;;  %v6468_v58 = vsel %vm334_vm0, %v3296_v45, %v3297_v1 }
  0xa9   : > { %4835 = vmatmul.mubr.msk.f32.gmra.mrb[6].mxu1 %vm362_vm1, %v1367_v53 }
  0xaa   : > { %5053 = vmatmul.mubr.msk.f32.gmra.mrb[2].mxu0 %vm362_vm1, %v6244_v5  ;;  %4841 = vmatprep.mubr.msk.f32.mxu1 %vm362_vm1, %v6442_v15 }
  0xab   : > { %5055 = vmatprep.mubr.msk.f32.mxu0 %vm362_vm1, %v6266_v21 }
  0xad   : > { %4842 = vmatmul.mubr.msk.f32.vlgmr.msra.gmra.mrb[0].mxu1 %vm362_vm1, %v5640_v16  ;;  %v4399_v16 = vld [vmem:[%s6676_s1 + $0x190] sm:$0xff] }
  0xae   : > { %5168 = vmatpush3.bf16.msra.mxu1 %v5165_v49  ;;  %5056 = vmatmul.mubr.msk.f32.gmra.mrb[4].mxu0 %vm362_vm1, %v6272_v10  ;;  %v5225_v8 = vpack.c.bf16 %v4400_v7, %v4399_v16  ;;  %v6728_v49 = vld [vmem:[#allocation12_spill] sm:$0xff] }
  0xaf   : > { %4844 = vmatprep.mubr.msk.f32.mxu1 %vm362_vm1, %v5662_v26  ;;  %5058 = vmatprep.mubr.msk.f32.mxu0 %vm362_vm1, %v6285_v29  ;;  %v1657_v26 = vrot.slane %v6442_v15, 1 }
  0xb0   : > { %5170 = vmatprep.subr.bf16.mxu1 %v5169_v32 }
  0xb1   : > { %4845 = vmatmul.mubr.msk.f32.gmra.mrb[2].mxu1 %vm362_vm1, %v5693_v41  ;;  %v1658_v41 = vrot.slane %v4200_v0, 1 }
  0xb2   : > { %5059 = vmatmul.mubr.msk.f32.gmra.mrb[6].mxu0 %vm362_vm1, %v6468_v58  ;;  %4847 = vmatprep.mubr.msk.f32.mxu1 %vm362_vm1, %v5720_v52 }
  0xb3   : > { %5065 = vmatprep.mubr.msk.f32.mxu0 %vm362_vm1, %v6305_v61  ;;  %v1659_v28 = vsel %vm334_vm0, %v1657_v26, %v1658_v41  ;;  %v4249_v61 = vld [vmem:[%s6676_s1 + $0xc0] sm:$0xff] }
  0xb4   : > { %v5173_v59 = vpack.c.bf16 %v4250_v39, %v4249_v61 }
  0xb5   : > { %4848 = vmatmul.mubr.msk.f32.gmra.mrb[4].mxu1 %vm362_vm1, %v5788_v20 }
  0xb6   : > { %5066 = vmatmul.mubr.msk.f32.vlgmr.msra.gmra.mrb[0].mxu0 %vm362_vm1, %v6310_v63  ;;  %4850 = vmatprep.mubr.msk.f32.mxu1 %vm362_vm1, %v5821_v43 }
  0xb7   : > { %5224 = vmatpush3.bf16.msra.mxu0 %v5221_v9  ;;  %5068 = vmatprep.mubr.msk.f32.mxu0 %vm362_vm1, %v6326_v4  ;;  %v4420_v9 = vld [vmem:[%s6678_s3] ss:$0 sm:$0xff] }
  0xb8   : > { %5226 = vmatprep.subr.bf16.mxu0 %v5225_v8 }
  0xb9   : > { %4851 = vmatmul.mubr.msk.f32.gmra.mrb[6].mxu1 %vm362_vm1, %v5833_v46 }
  0xba   : > { %5069 = vmatmul.mubr.msk.f32.gmra.mrb[2].mxu0 %vm362_vm1, %v6331_v17  ;;  %4857 = vmatprep.mubr.msk.f32.mxu1 %vm362_vm1, %v1659_v28 }
  0xbb   : > { %5071 = vmatprep.mubr.msk.f32.mxu0 %vm362_vm1, %v6350_v31 }
  0xbd   : > { %4858 = vmatmul.mubr.msk.f32.vlgmr.msra.gmra.mrb[0].mxu1 %vm362_vm1, %v5684_v36  ;;  %v4409_v36 = vld [vmem:[%s6676_s1 + $0x1a0] sm:$0xff] }
  0xbe   : > { %5172 = vmatpush3.bf16.msra.mxu1 %v5169_v32  ;;  %5072 = vmatmul.mubr.msk.f32.gmra.mrb[4].mxu0 %vm362_vm1, %v6355_v35  ;;  %v5229_v11 = vpack.c.bf16 %v4410_v54, %v4409_v36 }
  0xbf   : > { %4860 = vmatprep.mubr.msk.f32.mxu1 %vm362_vm1, %v6716_v6  ;;  %5074 = vmatprep.mubr.msk.f32.mxu0 %vm362_vm1, %v6366_v55 }
  0xc0   : > { %5174 = vmatprep.subr.bf16.mxu1 %v5173_v59 }
  0xc1   : > { %4861 = vmatmul.mubr.msk.f32.gmra.mrb[2].mxu1 %vm362_vm1, %v6717_v42 }
  0xc2   : > { %5075 = vmatmul.mubr.msk.f32.gmra.mrb[6].mxu0 %vm362_vm1, %v6518_v2  ;;  %4863 = vmatprep.mubr.msk.f32.mxu1 %vm362_vm1, %v6718_v62 }
  0xc3   : > { %5081 = vmatprep.mubr.msk.f32.mxu0 %vm362_vm1, %v6124_v27  ;;  %v6721_v27 = vld [vmem:[#allocation16_spill] sm:$0xff] }
  0xc5   : > { %4864 = vmatmul.mubr.msk.f32.gmra.mrb[4].mxu1 %vm362_vm1, %v6719_v14 }
  0xc6   : > { %5082 = vmatmul.mubr.msk.f32.vlgmr.msra.gmra.mrb[0].mxu0 %vm362_vm1, %v6138_v24  ;;  %4866 = vmatprep.mubr.msk.f32.mxu1 %vm362_vm1, %v6720_v22  ;;  %v6722_v24 = vld [vmem:[#allocation6_spill] sm:$0xff] }
  0xc7   : > { %5228 = vmatpush3.bf16.msra.mxu0 %v5225_v8  ;;  %5084 = vmatprep.mubr.msk.f32.mxu0 %vm362_vm1, %v6141_v23  ;;  %v6723_v23 = vld [vmem:[#allocation7_spill] sm:$0xff] }
  0xc8   : > { %5230 = vmatprep.subr.bf16.mxu0 %v5229_v11 }
  0xc9   : > { %4867 = vmatmul.mubr.msk.f32.gmra.mrb[6].mxu1 %vm362_vm1, %v6721_v27 }
  0xca   : > { %5085 = vmatmul.mubr.msk.f32.gmra.mrb[2].mxu0 %vm362_vm1, %v6161_v40  ;;  %4873 = vmatprep.mubr.msk.f32.mxu1 %vm362_vm1, %v1815_v47  ;;  %v4327_v40 = vld [vmem:[%s5625_s24 + $0x1d0] sm:$0xff] }
  0xcb   : > { %5087 = vmatprep.mubr.msk.f32.mxu0 %vm362_vm1, %v6165_v44  ;;  %v6726_v44 = vld [vmem:[#allocation9_spill] sm:$0xff]  ;;  %v3658_v50 = vrot.slane %v4327_v40, 1 }
  0xcd   : > { %4874 = vmatmul.mubr.msk.f32.vlgmr.msra.gmra.mrb[0].mxu1 %vm362_vm1, %v6722_v24 }
  0xce   : > { %5176 = vmatpush3.bf16.msra.mxu1 %v5173_v59  ;;  %5088 = vmatmul.mubr.msk.f32.gmra.mrb[4].mxu0 %vm362_vm1, %v6184_v38  ;;  %v6727_v38 = vld [vmem:[#allocation10_spill] sm:$0xff] }
  0xcf   : > { %4876 = vmatprep.mubr.msk.f32.mxu1 %vm362_vm1, %v6723_v23  ;;  %5090 = vmatprep.mubr.msk.f32.mxu0 %vm362_vm1, %v6415_v57  ;;  %v4328_v57 = vld [vmem:[%s5625_s24 + $0x1d8] sm:$0x3] }
  0xd0   : > { %5233 = vmatprep.subr.bf16.mxu1 %v6724_v33 }
  0xd1   : > { %4877 = vmatmul.mubr.msk.f32.gmra.mrb[2].mxu1 %vm362_vm1, %v6725_v51 }
  0xd2   : > { %5091 = vmatmul.mubr.msk.f32.gmra.mrb[6].mxu0 %vm362_vm1, %v4327_v40  ;;  %4879 = vmatprep.mubr.msk.f32.mxu1 %vm362_vm1, %v6726_v44 }
  0xd3   : > { %5097 = vmatprep.mubr.msk.f32.mxu0 %vm362_vm1, %v6217_v19  ;;  %v5484_v19 = vld [vmem:[%s5625_s24 + $0xb0] sm:$0xff] }
  0xd5   : > { %4880 = vmatmul.mubr.msk.f32.gmra.mrb[4].mxu1 %vm362_vm1, %v6727_v38 }
  0xd6   : > { %5098 = vmatmul.mubr.msk.f32.vlgmr.msra.gmra.mrb[0].mxu0 %vm362_vm1, %v6239_v12  ;;  %4882 = vmatprep.mubr.msk.f32.mxu1 %vm362_vm1, %v6728_v49  ;;  %v3659_v12 = vrot.slane %v4328_v57, 1 }
  0xd7   : > { %5232 = vmatpush3.bf16.msra.mxu0 %v5229_v11  ;;  %5100 = vmatprep.mubr.msk.f32.mxu0 %vm362_vm1, %v6244_v5  ;;  %v5486_v5 = vld [vmem:[%s5625_s24 + $0xd0] sm:$0xff]  ;;  %s4108_s24 = sshll.u32 %s6745_s15, 3 }
  0xd8   : > { %s291_s28 = sadd.s32 %s4109_s27, %s4108_s24 }
  0xd9   : > { %4883 = vmatmul.mubr.msk.f32.gmra.mrb[6].mxu1 %vm362_vm1, %v6729_v13  ;;  %s4110_s7 = sshll.u32 %s291_s28, 3 }
  0xda   : > { %5101 = vmatmul.mubr.msk.f32.gmra.mrb[2].mxu0 %vm362_vm1, %v6266_v21  ;;  %4889 = vmatprep.mubr.msk.f32.mxu1 %vm362_vm1, %v5484_v19  ;;  %v3660_v21 = vsel %vm334_vm0, %v3658_v50, %v3659_v12  ;;  %s6642_s8 = scalar_lea.vmem %s6679_s4, %s4110_s7 }
  0xdb   : > { %5103 = vmatprep.mubr.msk.f32.mxu0 %vm362_vm1, %v6272_v10  ;;  %v3779_v10 = vrot.slane %v4327_v40, 2 }
  0xdd   : > { %4890 = vmatmul.mubr.msk.f32.vlgmr.msra.gmra.mrb[0].mxu1 %vm362_vm1, %v5485_v30 }
  0xde   : > { %5234 = vmatpush3.bf16.msra.mxu1 %v6724_v33  ;;  %5104 = vmatmul.mubr.msk.f32.gmra.mrb[4].mxu0 %vm362_vm1, %v6285_v29 }
  0xdf   : > { %4892 = vmatprep.mubr.msk.f32.mxu1 %vm362_vm1, %v5486_v5  ;;  %5106 = vmatprep.mubr.msk.f32.mxu0 %vm362_vm1, %v6468_v58 }
  0xe1   : > { %4893 = vmatmul.mubr.msk.f32.gmra.mrb[2].mxu1 %vm362_vm1, %v5720_v52  ;;  %v6730_v52 = vld [vmem:[#allocation11_spill] sm:$0xff] }
  0xe2   : > { %5107 = vmatmul.mubr.msk.f32.gmra.mrb[6].mxu0 %vm362_vm1, %v3660_v21  ;;  %4895 = vmatprep.mubr.msk.f32.mxu1 %vm362_vm1, %v5788_v20  ;;  %v3780_v20 = vrot.slane %v4328_v57, 2 }
  0xe3   : > { %5113 = vmatprep.mubr.msk.f32.mxu0 %vm362_vm1, %v6310_v63 }
  0xe5   : > { %4896 = vmatmul.mubr.msk.f32.gmra.mrb[4].mxu1 %vm362_vm1, %v5821_v43  ;;  %v3781_v43 = vsel %vm605_vm2, %v3779_v10, %v3780_v20 }
  0xe6   : > { %5114 = vmatmul.mubr.msk.f32.vlgmr.msra.gmra.mrb[0].mxu0 %vm362_vm1, %v6326_v4  ;;  %4898 = vmatprep.mubr.msk.f32.mxu1 %vm362_vm1, %v5833_v46  ;;  %v6731_v46 = vld [vmem:[#allocation17_spill] sm:$0xff] }
  0xe7   : > { %5116 = vmatprep.mubr.msk.f32.mxu0 %vm362_vm1, %v6331_v17 }
  0xe9   : > { %4899 = vmatmul.mubr.msk.f32.gmra.mrb[6].mxu1 %vm362_vm1, %v6730_v52 }
  0xea   : > { %5117 = vmatmul.mubr.msk.f32.gmra.mrb[2].mxu0 %vm362_vm1, %v6350_v31  ;;  %4911 = vmatprep.mubr.msk.f32.mxu1 %vm362_vm1, %v6719_v14 }
  0xeb   : > { %5119 = vmatprep.mubr.msk.f32.mxu0 %vm362_vm1, %v6355_v35  ;;  %v4419_v35 = vld [vmem:[%s6677_s2] ss:$0 sm:$0xff] }
  0xed   : > { %4912 = vmatmul.mubr.msk.f32.vlgmr.msra.gmra.mrb[4].mxu1 %vm362_vm1, %v6720_v22 }
  0xee   : > { %5120 = vmatmul.mubr.msk.f32.gmra.mrb[4].mxu0 %vm362_vm1, %v6366_v55  ;;  %4914 = vmatprep.mubr.msk.f32.mxu1 %vm362_vm1, %v6721_v27 }
  0xef   : > { %5122 = vmatprep.mubr.msk.f32.mxu0 %vm362_vm1, %v6518_v2 }
  0xf1   : > { %4915 = vmatmul.mubr.msk.f32.gmra.mrb[6].mxu1 %vm362_vm1, %v6731_v46 }
  0xf2   : > { %5123 = vmatmul.mubr.msk.f32.gmra.mrb[6].mxu0 %vm362_vm1, %v3781_v43 }
 0x1b0   : > { %v4891_v29 = vpop.f32.mrb[0].mxu1 }
 0x1b1   : > { %v2041_v63 = vpop.f32.mrb[1].mxu1 }
 0x1b4   : > { %v4894_v4 = vpop.f32.mrb[2].mxu1 }
 0x1b5   : > { %v2051_v17 = vpop.f32.mrb[3].mxu1 }
 0x1b9   : > { %v5115_v31 = vpop.f32.mrb[0].mxu0 }
 0x1ba   : > { %v5235_v55 = vadd.f32 %v5115_v31, %v4891_v29  ;;  %v3853_v34 = vpop.f32.mrb[1].mxu0 }
 0x1bb   : > { %v5236_v53 = vadd.f32 %v3853_v34, %v2041_v63 }
 0x1bc   : > { %v3908_v15 = vmul.f32 %v5235_v55, %v4419_v35 }
 0x1bd   : > { %v3907_v60 = vmul.f32 %v5236_v53, %v4419_v35  ;;  %v5118_v56 = vpop.f32.mrb[2].mxu0 }
 0x1be   : > { %v3923_v18 = vadd.f32 %v4420_v9, %v3908_v15  ;;  %v5237_v45 = vadd.f32 %v5118_v56, %v4894_v4  ;;  %v3863_v1 = vpop.f32.mrb[3].mxu0 }
 0x1bf   : > { %v3922_v32 = vadd.f32 %v4420_v9, %v3907_v60  ;;  %v5238_v58 = vadd.f32 %v3863_v1, %v2051_v17 }
 0x1c0   : > { %v3931_v0 = vmax.f32 %v3923_v18, 0.0  ;;  %v3910_v16 = vmul.f32 %v5237_v45, %v4419_v35  ;;  %v4913_v7 = vpop.f32.mrb[4].mxu1 }
 0x1c1   : > { %v3930_v26 = vmax.f32 %v3922_v32, 0.0  ;;  %v3909_v41 = vmul.f32 %v5238_v58, %v4419_v35  ;;  %v5121_v8 = vpop.f32.mrb[4].mxu0  ;;  %v2183_v28 = vpop.f32.mrb[5].mxu1 }
 0x1c2   : > { %3939 = vst.msk [vmem:[%s6642_s8 + $0x8] sm:$0xff] %vm362_vm1, %v3931_v0  ;;  %v3925_v61 = vadd.f32 %v4420_v9, %v3910_v16  ;;  %v5239_v39 = vadd.f32 %v5121_v8, %v4913_v7  ;;  %v3873_v37 = vpop.f32.mrb[5].mxu0 }
 0x1c3   : > { %3938 = vst.msk [vmem:[%s6642_s8] sm:$0xff] %vm362_vm1, %v3930_v26  ;;  %v3924_v25 = vadd.f32 %v4420_v9, %v3909_v41  ;;  %v5240_v59 = vadd.f32 %v3873_v37, %v2183_v28 }
 0x1c4   : > { %v3933_v6 = vmax.f32 %v3925_v61, 0.0  ;;  %v3912_v2 = vmul.f32 %v5239_v39, %v4419_v35  ;;  %v4916_v42 = vpop.f32.mrb[6].mxu1 }
 0x1c5   : > { %v3932_v36 = vmax.f32 %v3924_v25, 0.0  ;;  %v3911_v54 = vmul.f32 %v5240_v59, %v4419_v35  ;;  %v5124_v62 = vpop.f32.mrb[6].mxu0  ;;  %v2193_v48 = vpop.f32.mrb[7].mxu1 }
 0x1c6   : > { %3941 = vst.msk [vmem:[%s6642_s8 + $0x18] sm:$0xff] %vm362_vm1, %v3933_v6  ;;  %v3927_v3 = vadd.f32 %v4420_v9, %v3912_v2  ;;  %v5241_v11 = vadd.f32 %v5124_v62, %v4916_v42  ;;  %v3883_v14 = vpop.f32.mrb[7].mxu0 }
 0x1c7   : > { %3940 = vst.msk [vmem:[%s6642_s8 + $0x10] sm:$0xff] %vm362_vm1, %v3932_v36  ;;  %v3926_v22 = vadd.f32 %v4420_v9, %v3911_v54  ;;  %v5242_v47 = vadd.f32 %v3883_v14, %v2193_v48 }
 0x1c8   : > { %v3935_v27 = vmax.f32 %v3927_v3, 0.0  ;;  %v3914_v24 = vmul.f32 %v5241_v11, %v4419_v35 }
 0x1c9   : > { %v3934_v23 = vmax.f32 %v3926_v22, 0.0  ;;  %v3913_v40 = vmul.f32 %v5242_v47, %v4419_v35 }
 0x1ca   : > { %3943 = vst.msk [vmem:[%s6642_s8 + $0x28] sm:$0xff] %vm362_vm1, %v3935_v27  ;;  %v3929_v33 = vadd.f32 %v4420_v9, %v3914_v24 }
 0x1cb   : > { %3942 = vst.msk [vmem:[%s6642_s8 + $0x20] sm:$0xff] %vm362_vm1, %v3934_v23  ;;  %v3928_v51 = vadd.f32 %v4420_v9, %v3913_v40 }
 0x1cc   : > { %v3937_v44 = vmax.f32 %v3929_v33, 0.0 }
 0x1cd   : > { %v3936_v38 = vmax.f32 %v3928_v51, 0.0 }
 0x1ce   : > { %3945 = vst.msk [vmem:[%s6642_s8 + $0x38] sm:$0xff] %vm362_vm1, %v3937_v44 }
 0x1cf   : > { %3944 = vst.msk [vmem:[%s6642_s8 + $0x30] sm:$0xff] %vm362_vm1, %v3936_v38 }
 0x1d0 PF: > { %s14_s19 = sadd.s32 1, %s5525_s19   ;;  %s6732_s15 = smov %s5517_s17 }
 0x1d1   : > { %p11_p7 = scmp.ge.s32.totalorder %s14_s19, 10   ;;  %s6733_s16 = smov %s5521_s18 }
 0x1d2   : > { %s6734_s17 = smov %s6737_s20  ;;  %s6735_s18 = smov %s6741_s21 }
 0x1d3   :  { %13 = sbr.rel (!%p11_p7) target bundleno = 3 (0x3), region = 104 }

</bundles_post_ra>
